<compile_context>
chip_gen: v7x
topology: tpu7x:2x2x1
jax: 0.10.0
libtpu: 0.0.40
codegen_flags: <defaults>
</compile_context>

<pallas_src>
import functools
import math

import jax
import jax.numpy as jnp
from jax import lax
from jax.experimental import pallas as pl
from jax.experimental.pallas import tpu as pltpu

# Set to jnp.bfloat16 on v6e/v7x to halve matmul-operand DMA bytes / VMEM per
# tile (accumulation stays f32, epilogue stays f32).  Kept f32 here so the
# numerics match the PyTorch reference module closely.
MATMUL_INPUT_DTYPE = jnp.float32


# ------------------------------ small helpers -------------------------------
def _round_up(x, m):
    return (x + m - 1) // m * m


def _choose_k_tile(k, max_tk=1024):
    """Largest multiple of 128 that divides k exactly (full k if small/unaligned)."""
    if k <= max_tk or k % 128 != 0:
        return k
    best = 128
    for f in range(1, k // 128 + 1):
        tk = 128 * f
        if k % tk == 0 and tk <= max_tk:
            best = tk
    return best


# --------------------- tiled matmul + bias (+ReLU) kernel -------------------
def _matmul_bias_act_kernel(x_ref, w_ref, b_ref, o_ref, acc_ref, *, apply_relu):
    @pl.when(pl.program_id(1) == 0)
    def _init():
        acc_ref[...] = jnp.zeros_like(acc_ref)

    acc_ref[...] += jnp.dot(x_ref[...], w_ref[...],
                            preferred_element_type=jnp.float32)

    @pl.when(pl.program_id(1) == pl.num_programs(1) - 1)
    def _epilogue():
        y = acc_ref[...] + b_ref[...]          # (1, N) bias broadcasts over rows
        if apply_relu:
            y = jnp.maximum(y, 0.0)
        o_ref[...] = y.astype(o_ref.dtype)


def matmul_bias_act(x, w, b, *, apply_relu):
    """x: (M, K), w: (K, N), b: (1, N)  ->  (M, N) float32.

    Grid = (M tiles ["parallel"], K tiles ["arbitrary"]); N (<=128 here) stays a
    full, lane-dense block.  Only M is padded (to a multiple of 8); partial M
    tiles at the grid boundary are masked by Pallas.
    """
    M, K = x.shape
    K2, N = w.shape
    assert K == K2, (K, K2)

    Mp = _round_up(M, 8)
    if Mp != M:
        x = jnp.pad(x, ((0, Mp - M), (0, 0)))

    tm = min(256, Mp)
    tk = _choose_k_tile(K)
    gm = pl.cdiv(Mp, tm)
    gk = K // tk

    x = x.astype(MATMUL_INPUT_DTYPE)
    w = w.astype(MATMUL_INPUT_DTYPE)
    b = b.astype(jnp.float32)

    out = pl.pallas_call(
        functools.partial(_matmul_bias_act_kernel, apply_relu=apply_relu),
        out_shape=jax.ShapeDtypeStruct((Mp, N), jnp.float32),
        grid=(gm, gk),
        in_specs=[
            pl.BlockSpec((tm, tk), lambda i, k: (i, k)),
            pl.BlockSpec((tk, N), lambda i, k: (k, 0)),
            pl.BlockSpec((1, N), lambda i, k: (0, 0)),
        ],
        out_specs=pl.BlockSpec((tm, N), lambda i, k: (i, 0)),
        scratch_shapes=[pltpu.VMEM((tm, N), jnp.float32)],
        compiler_params=pltpu.CompilerParams(
            dimension_semantics=("parallel", "arbitrary")),
        cost_estimate=pl.CostEstimate(
            flops=2 * Mp * K * N,
            transcendentals=0,
            bytes_accessed=(Mp * K + K * N + Mp * N) * 4),
    )(x, w, b)
    return out[:M]


# ----------------------------- fused fc1 + fc2 ------------------------------
def _fused_fc_kernel(x_ref, w1_ref, b1_ref, w2_ref, b2_ref, o_ref):
    h = jnp.dot(x_ref[...], w1_ref[...],
                preferred_element_type=jnp.float32) + b1_ref[...]
    y = jnp.dot(h.astype(w2_ref.dtype), w2_ref[...],
                preferred_element_type=jnp.float32) + b2_ref[...]
    o_ref[...] = y.astype(o_ref.dtype)


def fused_fc(x, w1, b1, w2, b2):
    """(M,2048) @ (2048,128) + b1, then @ (128,128[pad of 10]) + b2 -> (M,128)."""
    M, K1 = x.shape
    _, N1 = w1.shape
    _, N2 = w2.shape

    Mp = _round_up(M, 8)
    if Mp != M:
        x = jnp.pad(x, ((0, Mp - M), (0, 0)))
    tm = min(256, Mp)
    gm = pl.cdiv(Mp, tm)

    out = pl.pallas_call(
        _fused_fc_kernel,
        out_shape=jax.ShapeDtypeStruct((Mp, N2), jnp.float32),
        grid=(gm,),
        in_specs=[
            pl.BlockSpec((tm, K1), lambda i: (i, 0)),
            pl.BlockSpec((K1, N1), lambda i: (0, 0)),
            pl.BlockSpec((1, N1), lambda i: (0, 0)),
            pl.BlockSpec((N1, N2), lambda i: (0, 0)),
            pl.BlockSpec((1, N2), lambda i: (0, 0)),
        ],
        out_specs=pl.BlockSpec((tm, N2), lambda i: (i, 0)),
        compiler_params=pltpu.CompilerParams(dimension_semantics=("parallel",)),
        cost_estimate=pl.CostEstimate(
            flops=2 * Mp * (K1 * N1 + N1 * N2),
            transcendentals=0,
            bytes_accessed=(Mp * K1 + K1 * N1 + N1 * N2 + Mp * N2) * 4),
    )(x.astype(MATMUL_INPUT_DTYPE), w1.astype(MATMUL_INPUT_DTYPE),
      b1, w2.astype(MATMUL_INPUT_DTYPE), b2)
    return out[:M]


# ----------------------------- conv via im2col ------------------------------
def _im2col_nhwc(x, kh, kw, stride):
    """x: (N, H, W, C) NHWC -> patches (N*OH*OW, KH*KW*C), channel lane-dense."""
    n, h, w, c = x.shape
    oh = (h - kh) // stride + 1
    ow = (w - kw) // stride + 1
    cols = []
    for i in range(kh):
        for j in range(kw):
            cols.append(x[:, i:i + stride * oh:stride, j:j + stride * ow:stride, :])
    p = jnp.stack(cols, axis=3)                     # (N, OH, OW, KH*KW, C)
    return p.reshape(n * oh * ow, kh * kw * c), oh, ow


def conv2d_act(x_nhwc, w_kc, b_1n, kh, kw, stride, *, apply_relu=True):
    """w_kc: (KH*KW*IC, OC) (pre-layouted), b_1n: (1, OC). Output stays NHWC."""
    n = x_nhwc.shape[0]
    oc = w_kc.shape[1]
    patches, oh, ow = _im2col_nhwc(x_nhwc, kh, kw, stride)
    y = matmul_bias_act(patches, w_kc, b_1n, apply_relu=apply_relu)
    return y.reshape(n, oh, ow, oc)


# ------------------------------- parameters ---------------------------------
def init_params(key, in_channels=1):
    """PyTorch-layout parameters (Conv2d OIHW, Linear (out, in)) with PyTorch-like init."""
    def uniform(k, shape, fan_in):
        bound = 1.0 / math.sqrt(fan_in)
        return jax.random.uniform(k, shape, jnp.float32, -bound, bound)

    ks = jax.random.split(key, 10)
    p = {}
    p["conv1_w"] = uniform(ks[0], (64, in_channels, 8, 8), in_channels * 8 * 8)
    p["conv1_b"] = uniform(ks[1], (64,), in_channels * 8 * 8)
    p["conv2_w"] = uniform(ks[2], (128, 64, 6, 6), 64 * 6 * 6)
    p["conv2_b"] = uniform(ks[3], (128,), 64 * 6 * 6)
    p["conv3_w"] = uniform(ks[4], (128, 128, 5, 5), 128 * 5 * 5)
    p["conv3_b"] = uniform(ks[5], (128,), 128 * 5 * 5)
    p["fc1_w"] = uniform(ks[6], (128, 128 * 4 * 4), 128 * 4 * 4)   # (out, in)
    p["fc1_b"] = uniform(ks[7], (128,), 128 * 4 * 4)
    p["fc2_w"] = uniform(ks[8], (10, 128), 128)
    p["fc2_b"] = uniform(ks[9], (10,), 128)
    return p


def prepare_params(params):
    """One-time conversion of PyTorch-layout params into matmul-ready layout.

    Done once outside the jitted forward so no per-call weight transposes,
    reshapes or padding copies happen at inference time.
    """
    prep = {}
    for name in ("conv1", "conv2", "conv3"):
        w = params[name + "_w"]                      # (OC, IC, KH, KW)
        oc, ic, kh, kw = w.shape
        # (KH, KW, IC, OC) flattened -> matches NHWC im2col feature order.
        prep[name + "_w"] = (jnp.transpose(w, (2, 3, 1, 0))
                             .reshape(kh * kw * ic, oc).astype(jnp.float32))
        prep[name + "_b"] = params[name + "_b"].reshape(1, oc).astype(jnp.float32)

    # fc1: PyTorch consumes an NCHW flatten (C,H,W order).  We flatten NHWC,
    # so permute fc1's input columns (C,H,W)->(H,W,C) and store as (in, out).
    w1 = params["fc1_w"].reshape(128, 128, 4, 4)                 # (out, C, H, W)
    w1 = jnp.transpose(w1, (2, 3, 1, 0)).reshape(4 * 4 * 128, 128)  # (H*W*C, out)
    prep["fc1_w"] = w1.astype(jnp.float32)
    prep["fc1_b"] = params["fc1_b"].reshape(1, 128).astype(jnp.float32)

    # fc2: store as (in, out) and zero-pad out 10 -> 128 so stores stay lane-dense.
    prep["fc2_w"] = (jnp.zeros((128, 128), jnp.float32)
                     .at[:, :10].set(params["fc2_w"].T.astype(jnp.float32)))
    prep["fc2_b"] = (jnp.zeros((1, 128), jnp.float32)
                     .at[0, :10].set(params["fc2_b"].astype(jnp.float32)))
    return prep


# --------------------------------- forward ----------------------------------
def cnn_forward(prepared, x_nchw):
    """x_nchw: (N, 1, 28, 28) float32 (PyTorch layout) -> logits (N, 10)."""
    x = jnp.transpose(x_nchw, (0, 2, 3, 1))              # -> NHWC once (C=1: ~free)
    x = conv2d_act(x, prepared["conv1_w"], prepared["conv1_b"], 8, 8, 1)  # (N,21,21,64)
    x = conv2d_act(x, prepared["conv2_w"], prepared["conv2_b"], 6, 6, 2)  # (N, 8, 8,128)
    x = conv2d_act(x, prepared["conv3_w"], prepared["conv3_b"], 5, 5, 1)  # (N, 4, 4,128)
    x = x.reshape(x.shape[0], -1)   # NHWC flatten; fc1 columns pre-permuted to match
    logits = fused_fc(x, prepared["fc1_w"], prepared["fc1_b"],
                      prepared["fc2_w"], prepared["fc2_b"])
    return logits[:, :10]


# --------------------------- plain-JAX reference ----------------------------
def cnn_reference(params, x):
    def conv(y, w, b, stride):
        y = lax.conv_general_dilated(y, w, (stride, stride), "VALID",
                                     dimension_numbers=("NCHW", "OIHW", "NCHW"),
                                     precision=lax.Precision.HIGHEST)
        return jax.nn.relu(y + b[None, :, None, None])

    y = conv(x, params["conv1_w"], params["conv1_b"], 1)
    y = conv(y, params["conv2_w"], params["conv2_b"], 2)
    y = conv(y, params["conv3_w"], params["conv3_b"], 1)
    y = y.reshape(y.shape[0], -1)                               # NCHW flatten
    y = jnp.dot(y, params["fc1_w"].T, precision=lax.Precision.HIGHEST) + params["fc1_b"]
    y = jnp.dot(y, params["fc2_w"].T, precision=lax.Precision.HIGHEST) + params["fc2_b"]
    return y


if __name__ == "__main__":
    key = jax.random.PRNGKey(0)
    k_param, k_x = jax.random.split(key)
    params = init_params(k_param, in_channels=1)
    prepared = prepare_params(params)      # one-time layout prep, outside the jit
    # Spatial 28x28 and in_channels=1 are forced by fc1's 128*4*4 input (MNIST).
    x = jax.random.normal(k_x, (2, 1, 28, 28), dtype=jnp.float32)

    logits = jax.jit(cnn_forward)(prepared, x)
    logits = jax.block_until_ready(logits)
    assert logits.shape == (2, 10), logits.shape
    assert bool(jnp.all(jnp.isfinite(logits)))

    ref = cnn_reference(params, x)
    err = float(jnp.max(jnp.abs(logits - ref)))
    assert err < 3e-2, f"max abs diff vs reference = {err}"
    print("KERNEL_OK")
</pallas_src>

<mosaic_0001>
module attributes {stable_mosaic.version = 11 : i64} {
  func.func @_matmul_bias_act_kernel(%arg0: i32, %arg1: i32, %arg2: memref<256x64xf32, #tpu.memory_space<vmem>>, %arg3: memref<64x64xf32, #tpu.memory_space<vmem>>, %arg4: memref<1x64xf32, #tpu.memory_space<vmem>>, %arg5: memref<256x64xf32, #tpu.memory_space<vmem>>, %arg6: memref<256x64xf32, #tpu.memory_space<vmem>>) attributes {dimension_semantics = [#tpu.dimension_semantics<parallel>, #tpu.dimension_semantics<arbitrary>], iteration_bounds = array<i64: 4, 1>, scalar_prefetch = 0 : i64, scratch_operands = 1 : i64, tpu.core_type = #tpu.core_type<tc>, window_params = [{transform_indices = @transform_0, window_bounds = array<i64: 256, 64>}, {transform_indices = @transform_1, window_bounds = array<i64: 64, 64>}, {pipeline_mode = #tpu.pipeline_mode<synchronous>, transform_indices = @transform_2, window_bounds = array<i64: 1, 64>}, {transform_indices = @transform_3, window_bounds = array<i64: 256, 64>}]} {
    %c0_i32 = arith.constant 0 : i32
    %0 = arith.cmpi eq, %arg1, %c0_i32 : i32
    %1 = arith.extui %0 : i1 to i32
    %c0_i32_0 = arith.constant 0 : i32
    %2 = arith.cmpi ne, %1, %c0_i32_0 : i32
    scf.if %2 {
      %cst_10 = arith.constant 0.000000e+00 : f32
      %12 = vector.broadcast %cst_10 : f32 to vector<256x64xf32>
      %c0_11 = arith.constant 0 : index
      %c0_12 = arith.constant 0 : index
      %13 = vector.load %arg6[%c0_11, %c0_12] : memref<256x64xf32, #tpu.memory_space<vmem>>, vector<256x64xf32>
      tpu.vector_store %arg6[%c0_11, %c0_12], %12 {strides = array<i32>} : memref<256x64xf32, #tpu.memory_space<vmem>>, vector<256x64xf32>,
    } else {
    }
    %c0 = arith.constant 0 : index
    %c0_1 = arith.constant 0 : index
    %3 = vector.load %arg6[%c0, %c0_1] : memref<256x64xf32, #tpu.memory_space<vmem>>, vector<256x64xf32>
    %c0_2 = arith.constant 0 : index
    %c0_3 = arith.constant 0 : index
    %4 = vector.load %arg2[%c0_2, %c0_3] : memref<256x64xf32, #tpu.memory_space<vmem>>, vector<256x64xf32>
    %c0_4 = arith.constant 0 : index
    %c0_5 = arith.constant 0 : index
    %5 = vector.load %arg3[%c0_4, %c0_5] : memref<64x64xf32, #tpu.memory_space<vmem>>, vector<64x64xf32>
    %cst = arith.constant dense<0.000000e+00> : vector<256x64xf32>
    %6 = tpu.matmul %4, %5, %cst {dimension_numbers = #tpu.dot_dimension_numbers<[1], [0], [0], [1], [0, 0, 1, 1], [], []>} : vector<256x64xf32>, vector<64x64xf32>, vector<256x64xf32> -> vector<256x64xf32>
    %7 = arith.addf %3, %6 : vector<256x64xf32>
    %c0_6 = arith.constant 0 : index
    %c0_7 = arith.constant 0 : index
    %8 = vector.load %arg6[%c0_6, %c0_7] : memref<256x64xf32, #tpu.memory_space<vmem>>, vector<256x64xf32>
    tpu.vector_store %arg6[%c0_6, %c0_7], %7 {strides = array<i32>} : memref<256x64xf32, #tpu.memory_space<vmem>>, vector<256x64xf32>,
    %c0_i32_8 = arith.constant 0 : i32
    %9 = arith.cmpi eq, %arg1, %c0_i32_8 : i32
    %10 = arith.extui %9 : i1 to i32
    %c0_i32_9 = arith.constant 0 : i32
    %11 = arith.cmpi ne, %10, %c0_i32_9 : i32
    scf.if %11 {
      %c0_10 = arith.constant 0 : index
      %c0_11 = arith.constant 0 : index
      %12 = vector.load %arg6[%c0_10, %c0_11] : memref<256x64xf32, #tpu.memory_space<vmem>>, vector<256x64xf32>
      %c0_12 = arith.constant 0 : index
      %c0_13 = arith.constant 0 : index
      %13 = vector.load %arg4[%c0_12, %c0_13] : memref<1x64xf32, #tpu.memory_space<vmem>>, vector<1x64xf32>
      %14 = vector.broadcast %13 : vector<1x64xf32> to vector<256x64xf32>
      %15 = arith.addf %12, %14 : vector<256x64xf32>
      %cst_14 = arith.constant 0.000000e+00 : f32
      %16 = vector.broadcast %cst_14 : f32 to vector<256x64xf32>
      %17 = arith.maximumf %15, %16 : vector<256x64xf32>
      %c0_15 = arith.constant 0 : index
      %c0_16 = arith.constant 0 : index
      %18 = vector.load %arg5[%c0_15, %c0_16] : memref<256x64xf32, #tpu.memory_space<vmem>>, vector<256x64xf32>
      tpu.vector_store %arg5[%c0_15, %c0_16], %17 {strides = array<i32>} : memref<256x64xf32, #tpu.memory_space<vmem>>, vector<256x64xf32>,
    } else {
    }
    return
  }
  func.func @transform_0(%arg0: i32, %arg1: i32) -> (i32, i32) {
    %c0_i32 = arith.constant 0 : i32
    return %arg0, %arg1 : i32, i32
  }
  func.func @transform_1(%arg0: i32, %arg1: i32) -> (i32, i32) {
    %c0_i32 = arith.constant 0 : i32
    %c0_i32_0 = arith.constant 0 : i32
    return %arg1, %c0_i32 : i32, i32
  }
  func.func @transform_2(%arg0: i32, %arg1: i32) -> (i32, i32) {
    %c0_i32 = arith.constant 0 : i32
    %c0_i32_0 = arith.constant 0 : i32
    %c0_i32_1 = arith.constant 0 : i32
    return %c0_i32, %c0_i32_0 : i32, i32
  }
  func.func @transform_3(%arg0: i32, %arg1: i32) -> (i32, i32) {
    %c0_i32 = arith.constant 0 : i32
    %c0_i32_0 = arith.constant 0 : i32
    return %arg0, %c0_i32 : i32, i32
  }
}

module attributes {stable_mosaic.version = 11 : i64} {
  func.func @_matmul_bias_act_kernel(%arg0: i32, %arg1: i32, %arg2: memref<128x768xf32, #tpu.memory_space<vmem>>, %arg3: memref<768x128xf32, #tpu.memory_space<vmem>>, %arg4: memref<1x128xf32, #tpu.memory_space<vmem>>, %arg5: memref<128x128xf32, #tpu.memory_space<vmem>>, %arg6: memref<128x128xf32, #tpu.memory_space<vmem>>) attributes {dimension_semantics = [#tpu.dimension_semantics<parallel>, #tpu.dimension_semantics<arbitrary>], iteration_bounds = array<i64: 1, 3>, scalar_prefetch = 0 : i64, scratch_operands = 1 : i64, tpu.core_type = #tpu.core_type<tc>, window_params = [{transform_indices = @transform_0, window_bounds = array<i64: 128, 768>}, {transform_indices = @transform_1, window_bounds = array<i64: 768, 128>}, {pipeline_mode = #tpu.pipeline_mode<synchronous>, transform_indices = @transform_2, window_bounds = array<i64: 1, 128>}, {transform_indices = @transform_3, window_bounds = array<i64: 128, 128>}]} {
    %c0_i32 = arith.constant 0 : i32
    %0 = arith.cmpi eq, %arg1, %c0_i32 : i32
    %1 = arith.extui %0 : i1 to i32
    %c0_i32_0 = arith.constant 0 : i32
    %2 = arith.cmpi ne, %1, %c0_i32_0 : i32
    scf.if %2 {
      %cst_9 = arith.constant 0.000000e+00 : f32
      %12 = vector.broadcast %cst_9 : f32 to vector<128x128xf32>
      %c0_10 = arith.constant 0 : index
      %c0_11 = arith.constant 0 : index
      %13 = vector.load %arg6[%c0_10, %c0_11] : memref<128x128xf32, #tpu.memory_space<vmem>>, vector<128x128xf32>
      tpu.vector_store %arg6[%c0_10, %c0_11], %12 {strides = array<i32>} : memref<128x128xf32, #tpu.memory_space<vmem>>, vector<128x128xf32>,
    } else {
    }
    %c0 = arith.constant 0 : index
    %c0_1 = arith.constant 0 : index
    %3 = vector.load %arg6[%c0, %c0_1] : memref<128x128xf32, #tpu.memory_space<vmem>>, vector<128x128xf32>
    %c0_2 = arith.constant 0 : index
    %c0_3 = arith.constant 0 : index
    %4 = vector.load %arg2[%c0_2, %c0_3] : memref<128x768xf32, #tpu.memory_space<vmem>>, vector<128x768xf32>
    %c0_4 = arith.constant 0 : index
    %c0_5 = arith.constant 0 : index
    %5 = vector.load %arg3[%c0_4, %c0_5] : memref<768x128xf32, #tpu.memory_space<vmem>>, vector<768x128xf32>
    %cst = arith.constant dense<0.000000e+00> : vector<128x128xf32>
    %6 = tpu.matmul %4, %5, %cst {dimension_numbers = #tpu.dot_dimension_numbers<[1], [0], [0], [1], [0, 0, 1, 1], [], []>} : vector<128x768xf32>, vector<768x128xf32>, vector<128x128xf32> -> vector<128x128xf32>
    %7 = arith.addf %3, %6 : vector<128x128xf32>
    %c0_6 = arith.constant 0 : index
    %c0_7 = arith.constant 0 : index
    %8 = vector.load %arg6[%c0_6, %c0_7] : memref<128x128xf32, #tpu.memory_space<vmem>>, vector<128x128xf32>
    tpu.vector_store %arg6[%c0_6, %c0_7], %7 {strides = array<i32>} : memref<128x128xf32, #tpu.memory_space<vmem>>, vector<128x128xf32>,
    %c2_i32 = arith.constant 2 : i32
    %9 = arith.cmpi eq, %arg1, %c2_i32 : i32
    %10 = arith.extui %9 : i1 to i32
    %c0_i32_8 = arith.constant 0 : i32
    %11 = arith.cmpi ne, %10, %c0_i32_8 : i32
    scf.if %11 {
      %c0_9 = arith.constant 0 : index
      %c0_10 = arith.constant 0 : index
      %12 = vector.load %arg6[%c0_9, %c0_10] : memref<128x128xf32, #tpu.memory_space<vmem>>, vector<128x128xf32>
      %c0_11 = arith.constant 0 : index
      %c0_12 = arith.constant 0 : index
      %13 = vector.load %arg4[%c0_11, %c0_12] : memref<1x128xf32, #tpu.memory_space<vmem>>, vector<1x128xf32>
      %14 = vector.broadcast %13 : vector<1x128xf32> to vector<128x128xf32>
      %15 = arith.addf %12, %14 : vector<128x128xf32>
      %cst_13 = arith.constant 0.000000e+00 : f32
      %16 = vector.broadcast %cst_13 : f32 to vector<128x128xf32>
      %17 = arith.maximumf %15, %16 : vector<128x128xf32>
      %c0_14 = arith.constant 0 : index
      %c0_15 = arith.constant 0 : index
      %18 = vector.load %arg5[%c0_14, %c0_15] : memref<128x128xf32, #tpu.memory_space<vmem>>, vector<128x128xf32>
      tpu.vector_store %arg5[%c0_14, %c0_15], %17 {strides = array<i32>} : memref<128x128xf32, #tpu.memory_space<vmem>>, vector<128x128xf32>,
    } else {
    }
    return
  }
  func.func @transform_0(%arg0: i32, %arg1: i32) -> (i32, i32) {
    %c0_i32 = arith.constant 0 : i32
    return %arg0, %arg1 : i32, i32
  }
  func.func @transform_1(%arg0: i32, %arg1: i32) -> (i32, i32) {
    %c0_i32 = arith.constant 0 : i32
    %c0_i32_0 = arith.constant 0 : i32
    return %arg1, %c0_i32 : i32, i32
  }
  func.func @transform_2(%arg0: i32, %arg1: i32) -> (i32, i32) {
    %c0_i32 = arith.constant 0 : i32
    %c0_i32_0 = arith.constant 0 : i32
    %c0_i32_1 = arith.constant 0 : i32
    return %c0_i32, %c0_i32_0 : i32, i32
  }
  func.func @transform_3(%arg0: i32, %arg1: i32) -> (i32, i32) {
    %c0_i32 = arith.constant 0 : i32
    %c0_i32_0 = arith.constant 0 : i32
    return %arg0, %c0_i32 : i32, i32
  }
}

module attributes {stable_mosaic.version = 11 : i64} {
  func.func @_matmul_bias_act_kernel(%arg0: i32, %arg1: i32, %arg2: memref<32x640xf32, #tpu.memory_space<vmem>>, %arg3: memref<640x128xf32, #tpu.memory_space<vmem>>, %arg4: memref<1x128xf32, #tpu.memory_space<vmem>>, %arg5: memref<32x128xf32, #tpu.memory_space<vmem>>, %arg6: memref<32x128xf32, #tpu.memory_space<vmem>>) attributes {dimension_semantics = [#tpu.dimension_semantics<parallel>, #tpu.dimension_semantics<arbitrary>], iteration_bounds = array<i64: 1, 5>, scalar_prefetch = 0 : i64, scratch_operands = 1 : i64, tpu.core_type = #tpu.core_type<tc>, window_params = [{transform_indices = @transform_0, window_bounds = array<i64: 32, 640>}, {transform_indices = @transform_1, window_bounds = array<i64: 640, 128>}, {pipeline_mode = #tpu.pipeline_mode<synchronous>, transform_indices = @transform_2, window_bounds = array<i64: 1, 128>}, {transform_indices = @transform_3, window_bounds = array<i64: 32, 128>}]} {
    %c0_i32 = arith.constant 0 : i32
    %0 = arith.cmpi eq, %arg1, %c0_i32 : i32
    %1 = arith.extui %0 : i1 to i32
    %c0_i32_0 = arith.constant 0 : i32
    %2 = arith.cmpi ne, %1, %c0_i32_0 : i32
    scf.if %2 {
      %cst_9 = arith.constant 0.000000e+00 : f32
      %12 = vector.broadcast %cst_9 : f32 to vector<32x128xf32>
      %c0_10 = arith.constant 0 : index
      %c0_11 = arith.constant 0 : index
      %13 = vector.load %arg6[%c0_10, %c0_11] : memref<32x128xf32, #tpu.memory_space<vmem>>, vector<32x128xf32>
      tpu.vector_store %arg6[%c0_10, %c0_11], %12 {strides = array<i32>} : memref<32x128xf32, #tpu.memory_space<vmem>>, vector<32x128xf32>,
    } else {
    }
    %c0 = arith.constant 0 : index
    %c0_1 = arith.constant 0 : index
    %3 = vector.load %arg6[%c0, %c0_1] : memref<32x128xf32, #tpu.memory_space<vmem>>, vector<32x128xf32>
    %c0_2 = arith.constant 0 : index
    %c0_3 = arith.constant 0 : index
    %4 = vector.load %arg2[%c0_2, %c0_3] : memref<32x640xf32, #tpu.memory_space<vmem>>, vector<32x640xf32>
    %c0_4 = arith.constant 0 : index
    %c0_5 = arith.constant 0 : index
    %5 = vector.load %arg3[%c0_4, %c0_5] : memref<640x128xf32, #tpu.memory_space<vmem>>, vector<640x128xf32>
    %cst = arith.constant dense<0.000000e+00> : vector<32x128xf32>
    %6 = tpu.matmul %4, %5, %cst {dimension_numbers = #tpu.dot_dimension_numbers<[1], [0], [0], [1], [0, 0, 1, 1], [], []>} : vector<32x640xf32>, vector<640x128xf32>, vector<32x128xf32> -> vector<32x128xf32>
    %7 = arith.addf %3, %6 : vector<32x128xf32>
    %c0_6 = arith.constant 0 : index
    %c0_7 = arith.constant 0 : index
    %8 = vector.load %arg6[%c0_6, %c0_7] : memref<32x128xf32, #tpu.memory_space<vmem>>, vector<32x128xf32>
    tpu.vector_store %arg6[%c0_6, %c0_7], %7 {strides = array<i32>} : memref<32x128xf32, #tpu.memory_space<vmem>>, vector<32x128xf32>,
    %c4_i32 = arith.constant 4 : i32
    %9 = arith.cmpi eq, %arg1, %c4_i32 : i32
    %10 = arith.extui %9 : i1 to i32
    %c0_i32_8 = arith.constant 0 : i32
    %11 = arith.cmpi ne, %10, %c0_i32_8 : i32
    scf.if %11 {
      %c0_9 = arith.constant 0 : index
      %c0_10 = arith.constant 0 : index
      %12 = vector.load %arg6[%c0_9, %c0_10] : memref<32x128xf32, #tpu.memory_space<vmem>>, vector<32x128xf32>
      %c0_11 = arith.constant 0 : index
      %c0_12 = arith.constant 0 : index
      %13 = vector.load %arg4[%c0_11, %c0_12] : memref<1x128xf32, #tpu.memory_space<vmem>>, vector<1x128xf32>
      %14 = vector.broadcast %13 : vector<1x128xf32> to vector<32x128xf32>
      %15 = arith.addf %12, %14 : vector<32x128xf32>
      %cst_13 = arith.constant 0.000000e+00 : f32
      %16 = vector.broadcast %cst_13 : f32 to vector<32x128xf32>
      %17 = arith.maximumf %15, %16 : vector<32x128xf32>
      %c0_14 = arith.constant 0 : index
      %c0_15 = arith.constant 0 : index
      %18 = vector.load %arg5[%c0_14, %c0_15] : memref<32x128xf32, #tpu.memory_space<vmem>>, vector<32x128xf32>
      tpu.vector_store %arg5[%c0_14, %c0_15], %17 {strides = array<i32>} : memref<32x128xf32, #tpu.memory_space<vmem>>, vector<32x128xf32>,
    } else {
    }
    return
  }
  func.func @transform_0(%arg0: i32, %arg1: i32) -> (i32, i32) {
    %c0_i32 = arith.constant 0 : i32
    return %arg0, %arg1 : i32, i32
  }
  func.func @transform_1(%arg0: i32, %arg1: i32) -> (i32, i32) {
    %c0_i32 = arith.constant 0 : i32
    %c0_i32_0 = arith.constant 0 : i32
    return %arg1, %c0_i32 : i32, i32
  }
  func.func @transform_2(%arg0: i32, %arg1: i32) -> (i32, i32) {
    %c0_i32 = arith.constant 0 : i32
    %c0_i32_0 = arith.constant 0 : i32
    %c0_i32_1 = arith.constant 0 : i32
    return %c0_i32, %c0_i32_0 : i32, i32
  }
  func.func @transform_3(%arg0: i32, %arg1: i32) -> (i32, i32) {
    %c0_i32 = arith.constant 0 : i32
    %c0_i32_0 = arith.constant 0 : i32
    return %arg0, %c0_i32 : i32, i32
  }
}

module attributes {stable_mosaic.version = 11 : i64} {
  func.func @_fused_fc_kernel(%arg0: i32, %arg1: memref<8x2048xf32, #tpu.memory_space<vmem>>, %arg2: memref<2048x128xf32, #tpu.memory_space<vmem>>, %arg3: memref<1x128xf32, #tpu.memory_space<vmem>>, %arg4: memref<128x128xf32, #tpu.memory_space<vmem>>, %arg5: memref<1x128xf32, #tpu.memory_space<vmem>>, %arg6: memref<8x128xf32, #tpu.memory_space<vmem>>) attributes {dimension_semantics = [#tpu.dimension_semantics<parallel>], iteration_bounds = array<i64: 1>, scalar_prefetch = 0 : i64, scratch_operands = 0 : i64, tpu.core_type = #tpu.core_type<tc>, window_params = [{transform_indices = @transform_0, window_bounds = array<i64: 8, 2048>}, {pipeline_mode = #tpu.pipeline_mode<synchronous>, transform_indices = @transform_1, window_bounds = array<i64: 2048, 128>}, {pipeline_mode = #tpu.pipeline_mode<synchronous>, transform_indices = @transform_2, window_bounds = array<i64: 1, 128>}, {pipeline_mode = #tpu.pipeline_mode<synchronous>, transform_indices = @transform_3, window_bounds = array<i64: 128, 128>}, {pipeline_mode = #tpu.pipeline_mode<synchronous>, transform_indices = @transform_4, window_bounds = array<i64: 1, 128>}, {transform_indices = @transform_5, window_bounds = array<i64: 8, 128>}]} {
    %c0 = arith.constant 0 : index
    %c0_0 = arith.constant 0 : index
    %0 = vector.load %arg1[%c0, %c0_0] : memref<8x2048xf32, #tpu.memory_space<vmem>>, vector<8x2048xf32>
    %c0_1 = arith.constant 0 : index
    %c0_2 = arith.constant 0 : index
    %1 = vector.load %arg2[%c0_1, %c0_2] : memref<2048x128xf32, #tpu.memory_space<vmem>>, vector<2048x128xf32>
    %cst = arith.constant dense<0.000000e+00> : vector<8x128xf32>
    %2 = tpu.matmul %0, %1, %cst {dimension_numbers = #tpu.dot_dimension_numbers<[1], [0], [0], [1], [0, 0, 1, 1], [], []>} : vector<8x2048xf32>, vector<2048x128xf32>, vector<8x128xf32> -> vector<8x128xf32>
    %c0_3 = arith.constant 0 : index
    %c0_4 = arith.constant 0 : index
    %3 = vector.load %arg3[%c0_3, %c0_4] : memref<1x128xf32, #tpu.memory_space<vmem>>, vector<1x128xf32>
    %4 = vector.broadcast %3 : vector<1x128xf32> to vector<8x128xf32>
    %5 = arith.addf %2, %4 : vector<8x128xf32>
    %c0_5 = arith.constant 0 : index
    %c0_6 = arith.constant 0 : index
    %6 = vector.load %arg4[%c0_5, %c0_6] : memref<128x128xf32, #tpu.memory_space<vmem>>, vector<128x128xf32>
    %cst_7 = arith.constant dense<0.000000e+00> : vector<8x128xf32>
    %7 = tpu.matmul %5, %6, %cst_7 {dimension_numbers = #tpu.dot_dimension_numbers<[1], [0], [0], [1], [0, 0, 1, 1], [], []>} : vector<8x128xf32>, vector<128x128xf32>, vector<8x128xf32> -> vector<8x128xf32>
    %c0_8 = arith.constant 0 : index
    %c0_9 = arith.constant 0 : index
    %8 = vector.load %arg5[%c0_8, %c0_9] : memref<1x128xf32, #tpu.memory_space<vmem>>, vector<1x128xf32>
    %9 = vector.broadcast %8 : vector<1x128xf32> to vector<8x128xf32>
    %10 = arith.addf %7, %9 : vector<8x128xf32>
    %c0_10 = arith.constant 0 : index
    %c0_11 = arith.constant 0 : index
    %11 = vector.load %arg6[%c0_10, %c0_11] : memref<8x128xf32, #tpu.memory_space<vmem>>, vector<8x128xf32>
    tpu.vector_store %arg6[%c0_10, %c0_11], %10 {strides = array<i32>} : memref<8x128xf32, #tpu.memory_space<vmem>>, vector<8x128xf32>,
    return
  }
  func.func @transform_0(%arg0: i32) -> (i32, i32) {
    %c0_i32 = arith.constant 0 : i32
    %c0_i32_0 = arith.constant 0 : i32
    return %arg0, %c0_i32 : i32, i32
  }
  func.func @transform_1(%arg0: i32) -> (i32, i32) {
    %c0_i32 = arith.constant 0 : i32
    %c0_i32_0 = arith.constant 0 : i32
    %c0_i32_1 = arith.constant 0 : i32
    return %c0_i32, %c0_i32_0 : i32, i32
  }
  func.func @transform_2(%arg0: i32) -> (i32, i32) {
    %c0_i32 = arith.constant 0 : i32
    %c0_i32_0 = arith.constant 0 : i32
    %c0_i32_1 = arith.constant 0 : i32
    return %c0_i32, %c0_i32_0 : i32, i32
  }
  func.func @transform_3(%arg0: i32) -> (i32, i32) {
    %c0_i32 = arith.constant 0 : i32
    %c0_i32_0 = arith.constant 0 : i32
    %c0_i32_1 = arith.constant 0 : i32
    return %c0_i32, %c0_i32_0 : i32, i32
  }
  func.func @transform_4(%arg0: i32) -> (i32, i32) {
    %c0_i32 = arith.constant 0 : i32
    %c0_i32_0 = arith.constant 0 : i32
    %c0_i32_1 = arith.constant 0 : i32
    return %c0_i32, %c0_i32_0 : i32, i32
  }
  func.func @transform_5(%arg0: i32) -> (i32, i32) {
    %c0_i32 = arith.constant 0 : i32
    %c0_i32_0 = arith.constant 0 : i32
    return %arg0, %c0_i32 : i32, i32
  }
}

</mosaic_0001>

<bundles_post_ra>
// kernel: cnn_forward.4
= control target key start
LH: loop header
LB: loop body
LE: loop exit
PB: predicated region body
PF: predicated region fallthrough
CT: control target
= control target key end

     0   :  { %s1655_s12 = smov 0   ;;  %s1657_s13 = smov 0   ;;  %s2113_s0 = inlined_call_operand.vmem [shape: f32[888,64], index: 0, kind: input, shape index: {}]   ;;  %s2114_s1 = inlined_call_operand.vmem [shape: f32[64,64], index: 1, kind: input, shape index: {}]   ;;  %s2115_s2 = inlined_call_operand.vmem [shape: f32[1,64], index: 2, kind: input, shape index: {}]   ;;  %s2116_s3 = inlined_call_operand.vmem [shape: f32[888,64], index: 3, kind: output, shape index: {}]  }
   0x1   :  { %s1659_s14 = smov 0   ;;  %s1661_s15 = smov 0  }
   0x2   :  { %s1663_s16 = smov 0  }
   0x3 LB: > { %s1235_s17 = sadd.s32 4294967295, %s1600_s16   ;;  %s25_s18 = sadd.s32 1, %s1596_s15  ;;  %s1600_s16 = sphi %s1663_s16, %s13_s16   ;;  %s1596_s15 = sphi %s1661_s15, %s2126_s15   ;;  %s1592_s14 = sphi %s1659_s14, %s2125_s14   ;;  %s1588_s13 = sphi %s1657_s13, %s2124_s13   ;;  %s1584_s12 = sphi %s1655_s12, %s2123_s12  }
   0x4   : > { %p27_p0 = scmp.ge.s32.totalorder %s25_s18, 4  ;;  %s107_s19 = sadd.s32 1, %s1588_s13 }
   0x5   : > { %p117_p1 = scmp.ne.s32.totalorder %s1588_s13, %s1584_s12  ;;  %p118_p2 = scmp.eq.s32.totalorder %s1235_s17, 3 }
   0x6   : > { %s2128_s18 = smov (%p27_p0, %s25_s18), 0  ;;  %p1240_p4 = scmp.ge.s32.totalorder %s1600_s16, 1 }
   0x7   : > { %p1687_p3 = por %p118_p2, %p117_p1  ;;  %s104_s21 = ssub.s32 %s1596_s15, %s2128_s18 }
   0x8   : > { %p174_p5 = scmp.lt.s32.totalorder %s1600_s16, 5  ;;  %p105_p6 = scmp.eq.s32.totalorder %s104_s21, 0 }
   0xa   : > { %p175_p7 = pnand %p1240_p4, %p174_p5 }
   0xb   : > { %s1696_s22 = scalar_select %p105_p6, %s1588_s13, %s107_s19  }
   0xc   : > { %178 = sbr.rel (%p175_p7) target bundleno = 345 (0x159), region = 32  ;;  %v338_v0 = vld [vmem:[%s2114_s1] sm:$0xff] (!%p175_p7)  ;;  %v339_v1 = vld [vmem:[%s2114_s1 + $0x8] sm:$0xff] (!%p175_p7)  ;;  %v340_v2 = vld [vmem:[%s2114_s1 + $0x10] sm:$0xff] (!%p175_p7)  ;;  %s1708_s29 = sshll.u32 (!%p175_p7), %s1592_s14, 5  ;;  %vm241_vm0 = vcmask (!%p175_p7), 523264  }
   0xd   : > { %v1401_v3 = vpack.c.bf16 (!%p175_p7), %v339_v1, %v338_v0  ;;  %v341_v4 = vld [vmem:[%s2114_s1 + $0x18] sm:$0xff] (!%p175_p7)  ;;  %p214_p8 = scmp.lt.s32.totalorder (!%p175_p7), %s1708_s29, 110  ;;  %v342_v6 = vld [vmem:[%s2114_s1 + $0x20] sm:$0xff] (!%p175_p7)  ;;  %v343_v7 = vld [vmem:[%s2114_s1 + $0x28] sm:$0xff] (!%p175_p7)  ;;  %v1634_v8 = vmov (!%p175_p7), 0.0   ;;  %s206_s26 = sand.u32 (!%p175_p7), 1, %s1584_s12  }
   0xe   : > { %v1405_v5 = vpack.c.bf16 (!%p175_p7), %v341_v4, %v340_v2  ;;  %243 = vst.msk [vmem:[#allocation2 + $0x8] sm:$0xff] (!%p175_p7), %vm241_vm0, %v1634_v8  ;;  %242 = vst.msk [vmem:[#allocation2] sm:$0xff] (!%p175_p7), %vm241_vm0, %v1634_v8  ;;  %v1409_v9 = vpack.c.bf16 (!%p175_p7), %v343_v7, %v342_v6  ;;  %v344_v10 = vld [vmem:[%s2114_s1 + $0x30] sm:$0xff] (!%p175_p7)  ;;  %v345_v11 = vld [vmem:[%s2114_s1 + $0x38] sm:$0xff] (!%p175_p7)  ;;  %s1844_s12 = sshll.u32 (!%p175_p7), %s206_s26, 8 }
   0xf   : > { %244 = vst.msk [vmem:[#allocation2 + $0x10] sm:$0xff] (!%p175_p7), %vm241_vm0, %v1634_v8  ;;  %245 = vst.msk [vmem:[#allocation2 + $0x18] sm:$0xff] (!%p175_p7), %vm241_vm0, %v1634_v8  ;;  %1402 = vmatprep.subr.bf16.mxu0 (!%p175_p7), %v1401_v3  ;;  %1417 = vmatprep.subr.bf16.mxu1 (!%p175_p7), %v1401_v3  ;;  %v1413_v14 = vpack.c.bf16 (!%p175_p7), %v345_v11, %v344_v10  ;;  %s1855_s30 = scalar_lea.vmem (!%p175_p7), [#allocation3], %s1844_s12  }
  0x10   : > { %246 = vst.msk [vmem:[#allocation2 + $0x20] sm:$0xff] (!%p175_p7), %vm241_vm0, %v1634_v8  ;;  %247 = vst.msk [vmem:[#allocation2 + $0x28] sm:$0xff] (!%p175_p7), %vm241_vm0, %v1634_v8  ;;  %1404 = vmatpush3.bf16.msra.mxu0 (!%p175_p7), %v1401_v3  ;;  %1421 = vmatpush3.bf16.msra.mxu1 (!%p175_p7), %v1401_v3 }
  0x11   : > { %248 = vst.msk [vmem:[#allocation2 + $0x30] sm:$0xff] (!%p175_p7), %vm241_vm0, %v1634_v8  ;;  %249 = vst.msk [vmem:[#allocation2 + $0x38] sm:$0xff] (!%p175_p7), %vm241_vm0, %v1634_v8  ;;  %1406 = vmatprep.subr.bf16.mxu0 (!%p175_p7), %v1405_v5  ;;  %1418 = vmatprep.subr.bf16.mxu1 (!%p175_p7), %v1405_v5 }
  0x12   : > { %250 = vst.msk [vmem:[#allocation2 + $0x40] sm:$0xff] (!%p175_p7), %vm241_vm0, %v1634_v8  ;;  %251 = vst.msk [vmem:[#allocation2 + $0x48] sm:$0xff] (!%p175_p7), %vm241_vm0, %v1634_v8 }
  0x13   : > { %252 = vst.msk [vmem:[#allocation2 + $0x50] sm:$0xff] %vm241_vm0, %v1634_v8  ;;  %253 = vst.msk [vmem:[#allocation2 + $0x58] sm:$0xff] %vm241_vm0, %v1634_v8  ;;  %s215_s9 = scalar_select %p214_p8, %s1708_s29, 110 }
  0x14   : > { %254 = vst.msk [vmem:[#allocation2 + $0x60] sm:$0xff] %vm241_vm0, %v1634_v8  ;;  %255 = vst.msk [vmem:[#allocation2 + $0x68] sm:$0xff] %vm241_vm0, %v1634_v8  ;;  %1408 = vmatpush3.bf16.msra.mxu0 %v1405_v5  ;;  %1422 = vmatpush3.bf16.msra.mxu1 %v1405_v5  ;;  %s878_s4 = ssub.s32 (%p1687_p3), 111, %s1708_s29  ;;  %s1294_s5 = sshll.u32 (%p1687_p3), %s1592_s14, 8 }
  0x15   : > { %256 = vst.msk [vmem:[#allocation2 + $0x70] sm:$0xff] %vm241_vm0, %v1634_v8  ;;  %257 = vst.msk [vmem:[#allocation2 + $0x78] sm:$0xff] %vm241_vm0, %v1634_v8  ;;  %s1243_s10 = sshll.u32 %s215_s9, 3  ;;  %1410 = vmatprep.subr.bf16.mxu0 %v1409_v9  ;;  %1419 = vmatprep.subr.bf16.mxu1 %v1409_v9  ;;  %v275_v45 = vld [vmem:[#allocation2 + $0x8] sm:$0xff]  ;;  %v274_v47 = vld [vmem:[#allocation2] sm:$0xff]  ;;  %p879_p9 = scmp.lt.s32.totalorder (%p1687_p3), %s878_s4, 32 }
  0x16   : > { %258 = vst.msk [vmem:[#allocation2 + $0x80] sm:$0xff] %vm241_vm0, %v1634_v8  ;;  %259 = vst.msk [vmem:[#allocation2 + $0x88] sm:$0xff] %vm241_vm0, %v1634_v8  ;;  %s1764_s25 = scalar_lea.vmem %s2113_s0, %s1243_s10  ;;  %v277_v57 = vld [vmem:[#allocation2 + $0x18] sm:$0xff]  ;;  %v276_v59 = vld [vmem:[#allocation2 + $0x10] sm:$0xff]  ;;  %s1976_s8 = scalar_lea.vmem (%p1687_p3), %s2116_s3, %s1294_s5  }
  0x17   : > { %260 = vst.msk [vmem:[#allocation2 + $0x90] sm:$0xff] %vm241_vm0, %v1634_v8  ;;  %261 = vst.msk [vmem:[#allocation2 + $0x98] sm:$0xff] %vm241_vm0, %v1634_v8  ;;  %v306_v12 = vld [vmem:[%s1764_s25] sm:$0xff]  ;;  %v307_v15 = vld [vmem:[%s1764_s25 + $0x8] sm:$0xff] }
  0x18   : > { %262 = vst.msk [vmem:[#allocation2 + $0xa0] sm:$0xff] %vm241_vm0, %v1634_v8  ;;  %263 = vst.msk [vmem:[#allocation2 + $0xa8] sm:$0xff] %vm241_vm0, %v1634_v8  ;;  %v322_v13 = vld [vmem:[%s1764_s25 + $0x80] sm:$0xff]  ;;  %1353 = vmatprep.mubr.msk.f32.mxu0 %vm241_vm0, %v306_v12  ;;  %1412 = vmatpush3.bf16.msra.mxu0 %v1409_v9  ;;  %v323_v16 = vld [vmem:[%s1764_s25 + $0x88] sm:$0xff] }
  0x19   : > { %264 = vst.msk [vmem:[#allocation2 + $0xb0] sm:$0xff] %vm241_vm0, %v1634_v8  ;;  %265 = vst.msk [vmem:[#allocation2 + $0xb8] sm:$0xff] %vm241_vm0, %v1634_v8  ;;  %1377 = vmatprep.mubr.msk.f32.mxu1 %vm241_vm0, %v322_v13  ;;  %1423 = vmatpush3.bf16.msra.mxu1 %v1409_v9  ;;  %v308_v17 = vld [vmem:[%s1764_s25 + $0x10] sm:$0xff]  ;;  %v309_v19 = vld [vmem:[%s1764_s25 + $0x18] sm:$0xff] }
  0x1a   : > { %266 = vst.msk [vmem:[#allocation2 + $0xc0] sm:$0xff] %vm241_vm0, %v1634_v8  ;;  %267 = vst.msk [vmem:[#allocation2 + $0xc8] sm:$0xff] %vm241_vm0, %v1634_v8  ;;  %1414 = vmatprep.subr.bf16.mxu0 %v1413_v14  ;;  %1420 = vmatprep.subr.bf16.mxu1 %v1413_v14  ;;  %v324_v18 = vld [vmem:[%s1764_s25 + $0x90] sm:$0xff]  ;;  %v325_v20 = vld [vmem:[%s1764_s25 + $0x98] sm:$0xff] }
  0x1b   : > { %268 = vst.msk [vmem:[#allocation2 + $0xd0] sm:$0xff] %vm241_vm0, %v1634_v8  ;;  %269 = vst.msk [vmem:[#allocation2 + $0xd8] sm:$0xff] %vm241_vm0, %v1634_v8  ;;  %v310_v21 = vld [vmem:[%s1764_s25 + $0x20] sm:$0xff]  ;;  %v311_v23 = vld [vmem:[%s1764_s25 + $0x28] sm:$0xff] }
  0x1c   : > { %270 = vst.msk [vmem:[#allocation2 + $0xe0] sm:$0xff] %vm241_vm0, %v1634_v8  ;;  %271 = vst.msk [vmem:[#allocation2 + $0xe8] sm:$0xff] %vm241_vm0, %v1634_v8  ;;  %1416 = vmatpush3.bf16.msra.mxu0 %v1413_v14  ;;  %v326_v22 = vld [vmem:[%s1764_s25 + $0xa0] sm:$0xff]  ;;  %v327_v24 = vld [vmem:[%s1764_s25 + $0xa8] sm:$0xff] }
  0x1d   : > { %272 = vst.msk [vmem:[#allocation2 + $0xf0] sm:$0xff] %vm241_vm0, %v1634_v8  ;;  %273 = vst.msk [vmem:[#allocation2 + $0xf8] sm:$0xff] %vm241_vm0, %v1634_v8  ;;  %1424 = vmatpush3.bf16.msra.mxu1 %v1413_v14  ;;  %v312_v25 = vld [vmem:[%s1764_s25 + $0x30] sm:$0xff]  ;;  %v313_v27 = vld [vmem:[%s1764_s25 + $0x38] sm:$0xff] }
  0x1e   : > { %v328_v26 = vld [vmem:[%s1764_s25 + $0xb0] sm:$0xff]  ;;  %v329_v28 = vld [vmem:[%s1764_s25 + $0xb8] sm:$0xff]  ;;  %v314_v29 = vld [vmem:[%s1764_s25 + $0x40] sm:$0xff] }
  0x1f   : > { %1354 = vmatmul.mubr.msk.f32.vlgmr.msra.gmra.mrb[0].mxu0 %vm241_vm0, %v307_v15  ;;  %v330_v30 = vld [vmem:[%s1764_s25 + $0xc0] sm:$0xff]  ;;  %v315_v31 = vld [vmem:[%s1764_s25 + $0x48] sm:$0xff]  ;;  %v316_v33 = vld [vmem:[%s1764_s25 + $0x50] sm:$0xff] }
  0x20   : > { %1378 = vmatmul.mubr.msk.f32.vlgmr.msra.gmra.mrb[0].mxu1 %vm241_vm0, %v323_v16  ;;  %1356 = vmatprep.mubr.msk.f32.mxu0 %vm241_vm0, %v308_v17  ;;  %v331_v32 = vld [vmem:[%s1764_s25 + $0xc8] sm:$0xff]  ;;  %v332_v34 = vld [vmem:[%s1764_s25 + $0xd0] sm:$0xff]  ;;  %v317_v35 = vld [vmem:[%s1764_s25 + $0x58] sm:$0xff] }
  0x21   : > { %1380 = vmatprep.mubr.msk.f32.mxu1 %vm241_vm0, %v324_v18  ;;  %v333_v36 = vld [vmem:[%s1764_s25 + $0xd8] sm:$0xff]  ;;  %v318_v37 = vld [vmem:[%s1764_s25 + $0x60] sm:$0xff]  ;;  %v319_v39 = vld [vmem:[%s1764_s25 + $0x68] sm:$0xff] }
  0x22   : > { %v334_v38 = vld [vmem:[%s1764_s25 + $0xe0] sm:$0xff]  ;;  %v335_v40 = vld [vmem:[%s1764_s25 + $0xe8] sm:$0xff]  ;;  %v320_v41 = vld [vmem:[%s1764_s25 + $0x70] sm:$0xff] }
  0x23   : > { %1357 = vmatmul.mubr.msk.f32.gmra.mrb[2].mxu0 %vm241_vm0, %v309_v19  ;;  %v336_v42 = vld [vmem:[%s1764_s25 + $0xf0] sm:$0xff]  ;;  %v321_v43 = vld [vmem:[%s1764_s25 + $0x78] sm:$0xff]  ;;  %v291_v46 = vld [vmem:[#allocation2 + $0x88] sm:$0xff] }
  0x24   : > { %1381 = vmatmul.mubr.msk.f32.gmra.mrb[2].mxu1 %vm241_vm0, %v325_v20  ;;  %1359 = vmatprep.mubr.msk.f32.mxu0 %vm241_vm0, %v310_v21  ;;  %v337_v44 = vld [vmem:[%s1764_s25 + $0xf8] sm:$0xff]  ;;  %v290_v48 = vld [vmem:[#allocation2 + $0x80] sm:$0xff]  ;;  %v292_v60 = vld [vmem:[#allocation2 + $0x90] sm:$0xff] }
  0x25   : > { %1383 = vmatprep.mubr.msk.f32.mxu1 %vm241_vm0, %v326_v22  ;;  %v293_v58 = vld [vmem:[#allocation2 + $0x98] sm:$0xff]  ;;  %v279_v5 = vld [vmem:[#allocation2 + $0x28] sm:$0xff]  ;;  %v278_v7 = vld [vmem:[#allocation2 + $0x20] sm:$0xff] }
  0x26   : > { %v295_v6 = vld [vmem:[#allocation2 + $0xa8] sm:$0xff]  ;;  %v294_v8 = vld [vmem:[#allocation2 + $0xa0] sm:$0xff]  ;;  %v281_v16 = vld [vmem:[#allocation2 + $0x38] sm:$0xff] }
  0x27   : > { %1360 = vmatmul.mubr.msk.f32.gmra.mrb[4].mxu0 %vm241_vm0, %v311_v23  ;;  %v1840_v9 = vld [vmem:[%s2115_s2] ss:$0 sm:$0xff]  ;;  %v297_v17 = vld [vmem:[#allocation2 + $0xb8] sm:$0xff]  ;;  %v280_v22 = vld [vmem:[#allocation2 + $0x30] sm:$0xff] }
  0x28   : > { %1384 = vmatmul.mubr.msk.f32.gmra.mrb[4].mxu1 %vm241_vm0, %v327_v24  ;;  %1362 = vmatprep.mubr.msk.f32.mxu0 %vm241_vm0, %v312_v25 }
  0x29   : > { %1386 = vmatprep.mubr.msk.f32.mxu1 %vm241_vm0, %v328_v26 }
  0x2b   : > { %1363 = vmatmul.mubr.msk.f32.gmra.mrb[6].mxu0 %vm241_vm0, %v313_v27  ;;  %v296_v27 = vld [vmem:[#allocation2 + $0xb0] sm:$0xff] }
  0x2c   : > { %1387 = vmatmul.mubr.msk.f32.gmra.mrb[6].mxu1 %vm241_vm0, %v329_v28  ;;  %1365 = vmatprep.mubr.msk.f32.mxu0 %vm241_vm0, %v314_v29 }
  0x2d   : > { %1389 = vmatprep.mubr.msk.f32.mxu1 %vm241_vm0, %v330_v30 }
  0x2f   : > { %1366 = vmatmul.mubr.msk.f32.gmra.mrb[8].mxu0 %vm241_vm0, %v315_v31 }
  0x30   : > { %1390 = vmatmul.mubr.msk.f32.gmra.mrb[8].mxu1 %vm241_vm0, %v331_v32  ;;  %1368 = vmatprep.mubr.msk.f32.mxu0 %vm241_vm0, %v316_v33 }
  0x31   : > { %1392 = vmatprep.mubr.msk.f32.mxu1 %vm241_vm0, %v332_v34 }
  0x33   : > { %1369 = vmatmul.mubr.msk.f32.gmra.mrb[10].mxu0 %vm241_vm0, %v317_v35 }
  0x34   : > { %1393 = vmatmul.mubr.msk.f32.gmra.mrb[10].mxu1 %vm241_vm0, %v333_v36  ;;  %1371 = vmatprep.mubr.msk.f32.mxu0 %vm241_vm0, %v318_v37 }
  0x35   : > { %1395 = vmatprep.mubr.msk.f32.mxu1 %vm241_vm0, %v334_v38  ;;  %v283_v38 = vld [vmem:[#allocation2 + $0x48] sm:$0xff] }
  0x37   : > { %1372 = vmatmul.mubr.msk.f32.gmra.mrb[12].mxu0 %vm241_vm0, %v319_v39  ;;  %v299_v39 = vld [vmem:[#allocation2 + $0xc8] sm:$0xff] }
  0x38   : > { %1396 = vmatmul.mubr.msk.f32.gmra.mrb[12].mxu1 %vm241_vm0, %v335_v40  ;;  %1374 = vmatprep.mubr.msk.f32.mxu0 %vm241_vm0, %v320_v41 }
  0x39   : > { %1398 = vmatprep.mubr.msk.f32.mxu1 %vm241_vm0, %v336_v42 }
  0x3b   : > { %1375 = vmatmul.mubr.msk.f32.gmra.mrb[14].mxu0 %vm241_vm0, %v321_v43 }
  0x3c   : > { %1399 = vmatmul.mubr.msk.f32.gmra.mrb[14].mxu1 %vm241_vm0, %v337_v44 }
  0xf2   : > { %v1355_v49 = vpop.f32.mrb[0].mxu0 }
  0xf3   : > { %v1379_v50 = vpop.f32.mrb[0].mxu1  ;;  %v669_v51 = vadd.f32 %v1355_v49, %v275_v45  ;;  %v509_v53 = vpop.f32.mrb[1].mxu0 }
  0xf4   : > { %v685_v52 = vadd.f32 %v1379_v50, %v291_v46  ;;  %v589_v54 = vpop.f32.mrb[1].mxu1  ;;  %v668_v55 = vadd.f32 %v509_v53, %v274_v47  ;;  %v282_v46 = vld [vmem:[#allocation2 + $0x40] sm:$0xff] }
  0xf5   : > { %v684_v56 = vadd.f32 %v589_v54, %v290_v48  ;;  %701 = vst.msk [vmem:[#allocation2 + $0x8] sm:$0xff] %vm241_vm0, %v669_v51  ;;  %v298_v51 = vld [vmem:[#allocation2 + $0xc0] sm:$0xff] }
  0xf6   : > { %717 = vst.msk [vmem:[#allocation2 + $0x88] sm:$0xff] %vm241_vm0, %v685_v52  ;;  %700 = vst.msk [vmem:[#allocation2] sm:$0xff] %vm241_vm0, %v668_v55  ;;  %v1358_v61 = vpop.f32.mrb[2].mxu0 }
  0xf7   : > { %716 = vst.msk [vmem:[#allocation2 + $0x80] sm:$0xff] %vm241_vm0, %v684_v56  ;;  %v1382_v62 = vpop.f32.mrb[2].mxu1  ;;  %v671_v63 = vadd.f32 %v1358_v61, %v277_v57  ;;  %v519_v1 = vpop.f32.mrb[3].mxu0 }
  0xf8   : > { %v687_v0 = vadd.f32 %v1382_v62, %v293_v58  ;;  %v599_v2 = vpop.f32.mrb[3].mxu1  ;;  %v670_v3 = vadd.f32 %v519_v1, %v276_v59  ;;  %v285_v62 = vld [vmem:[#allocation2 + $0x58] sm:$0xff] }
  0xf9   : > { %v686_v4 = vadd.f32 %v599_v2, %v292_v60  ;;  %703 = vst.msk [vmem:[#allocation2 + $0x18] sm:$0xff] %vm241_vm0, %v671_v63  ;;  %v301_v63 = vld [vmem:[#allocation2 + $0xd8] sm:$0xff] }
  0xfa   : > { %719 = vst.msk [vmem:[#allocation2 + $0x98] sm:$0xff] %vm241_vm0, %v687_v0  ;;  %702 = vst.msk [vmem:[#allocation2 + $0x10] sm:$0xff] %vm241_vm0, %v670_v3  ;;  %v1361_v10 = vpop.f32.mrb[4].mxu0 }
  0xfb   : > { %718 = vst.msk [vmem:[#allocation2 + $0x90] sm:$0xff] %vm241_vm0, %v686_v4  ;;  %v1385_v11 = vpop.f32.mrb[4].mxu1  ;;  %v673_v12 = vadd.f32 %v1361_v10, %v279_v5  ;;  %v529_v14 = vpop.f32.mrb[5].mxu0 }
  0xfc   : > { %v689_v13 = vadd.f32 %v1385_v11, %v295_v6  ;;  %v609_v15 = vpop.f32.mrb[5].mxu1  ;;  %v736_v18 = vld [vmem:[#allocation2 + $0x8] sm:$0xff]  ;;  %v672_v20 = vadd.f32 %v529_v14, %v278_v7  ;;  %v284_v6 = vld [vmem:[#allocation2 + $0x50] sm:$0xff] }
  0xfd   : > { %v752_v19 = vld [vmem:[#allocation2 + $0x88] sm:$0xff]  ;;  %v688_v21 = vadd.f32 %v609_v15, %v294_v8  ;;  %v775_v23 = vadd.f32 %v1840_v9, %v736_v18  ;;  %v735_v25 = vld [vmem:[#allocation2] sm:$0xff]  ;;  %705 = vst.msk [vmem:[#allocation2 + $0x28] sm:$0xff] %vm241_vm0, %v673_v12  ;;  %v300_v12 = vld [vmem:[#allocation2 + $0xd0] sm:$0xff] }
  0xfe   : > { %v791_v24 = vadd.f32 %v1840_v9, %v752_v19  ;;  %v751_v26 = vld [vmem:[#allocation2 + $0x80] sm:$0xff]  ;;  %721 = vst.msk [vmem:[#allocation2 + $0xa8] sm:$0xff] %vm241_vm0, %v689_v13  ;;  %v774_v28 = vadd.f32 %v1840_v9, %v735_v25  ;;  %704 = vst.msk [vmem:[#allocation2 + $0x20] sm:$0xff] %vm241_vm0, %v672_v20  ;;  %v1364_v30 = vpop.f32.mrb[6].mxu0 }
  0xff   : > { %v790_v29 = vadd.f32 %v1840_v9, %v751_v26  ;;  %720 = vst.msk [vmem:[#allocation2 + $0xa0] sm:$0xff] %vm241_vm0, %v688_v21  ;;  %v1388_v31 = vpop.f32.mrb[6].mxu1  ;;  %v807_v32 = vmax.f32 %v775_v23, 0.0  ;;  %v675_v34 = vadd.f32 %v1364_v30, %v281_v16  ;;  %v539_v36 = vpop.f32.mrb[7].mxu0  ;;  %v287_v23 = vld [vmem:[#allocation2 + $0x68] sm:$0xff] }
 0x100   : > { %v823_v33 = vmax.f32 %v791_v24, 0.0  ;;  %v691_v35 = vadd.f32 %v1388_v31, %v297_v17  ;;  %v619_v37 = vpop.f32.mrb[7].mxu1  ;;  %v806_v40 = vmax.f32 %v774_v28, 0.0  ;;  %v738_v42 = vld [vmem:[#allocation2 + $0x18] sm:$0xff]  ;;  %v674_v44 = vadd.f32 %v539_v36, %v280_v22  ;;  %v303_v24 = vld [vmem:[#allocation2 + $0xe8] sm:$0xff]  ;;  %v286_v31 = vld [vmem:[#allocation2 + $0x60] sm:$0xff] }
 0x101   : > { %v822_v41 = vmax.f32 %v790_v29, 0.0  ;;  %v754_v43 = vld [vmem:[#allocation2 + $0x98] sm:$0xff]  ;;  %v690_v45 = vadd.f32 %v619_v37, %v296_v27  ;;  %839 = vst.msk [vmem:[%s1855_s30 + $0x8] sm:$0xff] %vm241_vm0, %v807_v32  ;;  %v777_v47 = vadd.f32 %v1840_v9, %v738_v42  ;;  %v737_v49 = vld [vmem:[#allocation2 + $0x10] sm:$0xff]  ;;  %707 = vst.msk [vmem:[#allocation2 + $0x38] sm:$0xff] %vm241_vm0, %v675_v34 }
 0x102   : > { %855 = vst.msk [vmem:[%s1855_s30 + $0x88] sm:$0xff] %vm241_vm0, %v823_v33  ;;  %v793_v48 = vadd.f32 %v1840_v9, %v754_v43  ;;  %v753_v50 = vld [vmem:[#allocation2 + $0x90] sm:$0xff]  ;;  %723 = vst.msk [vmem:[#allocation2 + $0xb8] sm:$0xff] %vm241_vm0, %v691_v35  ;;  %v776_v52 = vadd.f32 %v1840_v9, %v737_v49  ;;  %v1367_v54 = vpop.f32.mrb[8].mxu0  ;;  %v302_v36 = vld [vmem:[#allocation2 + $0xe0] sm:$0xff] }
 0x103   : > { %838 = vst.msk [vmem:[%s1855_s30] sm:$0xff] %vm241_vm0, %v806_v40  ;;  %854 = vst.msk [vmem:[%s1855_s30 + $0x80] sm:$0xff] %vm241_vm0, %v822_v41  ;;  %v792_v53 = vadd.f32 %v1840_v9, %v753_v50  ;;  %v1391_v55 = vpop.f32.mrb[8].mxu1  ;;  %v809_v56 = vmax.f32 %v777_v47, 0.0  ;;  %v677_v58 = vadd.f32 %v1367_v54, %v283_v38  ;;  %v549_v60 = vpop.f32.mrb[9].mxu0  ;;  %v289_v47 = vld [vmem:[#allocation2 + $0x78] sm:$0xff] }
 0x104   : > { %706 = vst.msk [vmem:[#allocation2 + $0x30] sm:$0xff] %vm241_vm0, %v674_v44  ;;  %722 = vst.msk [vmem:[#allocation2 + $0xb0] sm:$0xff] %vm241_vm0, %v690_v45  ;;  %v825_v57 = vmax.f32 %v793_v48, 0.0  ;;  %v693_v59 = vadd.f32 %v1391_v55, %v299_v39  ;;  %v629_v61 = vpop.f32.mrb[9].mxu1  ;;  %v808_v0 = vmax.f32 %v776_v52, 0.0  ;;  %v740_v2 = vld [vmem:[#allocation2 + $0x28] sm:$0xff]  ;;  %v676_v4 = vadd.f32 %v549_v60, %v282_v46 }
 0x105   : > { %v824_v1 = vmax.f32 %v792_v53, 0.0  ;;  %v756_v3 = vld [vmem:[#allocation2 + $0xa8] sm:$0xff]  ;;  %v692_v5 = vadd.f32 %v629_v61, %v298_v51  ;;  %841 = vst.msk [vmem:[%s1855_s30 + $0x18] sm:$0xff] %vm241_vm0, %v809_v56  ;;  %v779_v7 = vadd.f32 %v1840_v9, %v740_v2  ;;  %v739_v10 = vld [vmem:[#allocation2 + $0x20] sm:$0xff]  ;;  %709 = vst.msk [vmem:[#allocation2 + $0x48] sm:$0xff] %vm241_vm0, %v677_v58 }
 0x106   : > { %857 = vst.msk [vmem:[%s1855_s30 + $0x98] sm:$0xff] %vm241_vm0, %v825_v57  ;;  %v795_v8 = vadd.f32 %v1840_v9, %v756_v3  ;;  %v755_v11 = vld [vmem:[#allocation2 + $0xa0] sm:$0xff]  ;;  %725 = vst.msk [vmem:[#allocation2 + $0xc8] sm:$0xff] %vm241_vm0, %v693_v59  ;;  %v778_v13 = vadd.f32 %v1840_v9, %v739_v10  ;;  %v1370_v15 = vpop.f32.mrb[10].mxu0  ;;  %v305_v48 = vld [vmem:[#allocation2 + $0xf8] sm:$0xff] }
 0x107   : > { %840 = vst.msk [vmem:[%s1855_s30 + $0x10] sm:$0xff] %vm241_vm0, %v808_v0  ;;  %856 = vst.msk [vmem:[%s1855_s30 + $0x90] sm:$0xff] %vm241_vm0, %v824_v1  ;;  %v794_v14 = vadd.f32 %v1840_v9, %v755_v11  ;;  %v1394_v16 = vpop.f32.mrb[10].mxu1  ;;  %v811_v17 = vmax.f32 %v779_v7, 0.0  ;;  %v679_v19 = vadd.f32 %v1370_v15, %v285_v62  ;;  %v559_v21 = vpop.f32.mrb[11].mxu0  ;;  %v288_v55 = vld [vmem:[#allocation2 + $0x70] sm:$0xff] }
 0x108   : > { %708 = vst.msk [vmem:[#allocation2 + $0x40] sm:$0xff] %vm241_vm0, %v676_v4  ;;  %724 = vst.msk [vmem:[#allocation2 + $0xc0] sm:$0xff] %vm241_vm0, %v692_v5  ;;  %v827_v18 = vmax.f32 %v795_v8, 0.0  ;;  %v695_v20 = vadd.f32 %v1394_v16, %v301_v63  ;;  %v639_v22 = vpop.f32.mrb[11].mxu1  ;;  %v810_v25 = vmax.f32 %v778_v13, 0.0  ;;  %v742_v27 = vld [vmem:[#allocation2 + $0x38] sm:$0xff]  ;;  %v678_v29 = vadd.f32 %v559_v21, %v284_v6 }
 0x109   : > { %v826_v26 = vmax.f32 %v794_v14, 0.0  ;;  %v758_v28 = vld [vmem:[#allocation2 + $0xb8] sm:$0xff]  ;;  %v694_v30 = vadd.f32 %v639_v22, %v300_v12  ;;  %843 = vst.msk [vmem:[%s1855_s30 + $0x28] sm:$0xff] %vm241_vm0, %v811_v17  ;;  %v781_v32 = vadd.f32 %v1840_v9, %v742_v27  ;;  %711 = vst.msk [vmem:[#allocation2 + $0x58] sm:$0xff] %vm241_vm0, %v679_v19  ;;  %v304_v60 = vld [vmem:[#allocation2 + $0xf0] sm:$0xff] }
 0x10a   : > { %859 = vst.msk [vmem:[%s1855_s30 + $0xa8] sm:$0xff] %vm241_vm0, %v827_v18  ;;  %v797_v33 = vadd.f32 %v1840_v9, %v758_v28  ;;  %727 = vst.msk [vmem:[#allocation2 + $0xd8] sm:$0xff] %vm241_vm0, %v695_v20  ;;  %v1373_v39 = vpop.f32.mrb[12].mxu0 }
 0x10b   : > { %v741_v34 = vld [vmem:[#allocation2 + $0x30] sm:$0xff]  ;;  %842 = vst.msk [vmem:[%s1855_s30 + $0x20] sm:$0xff] %vm241_vm0, %v810_v25  ;;  %858 = vst.msk [vmem:[%s1855_s30 + $0xa0] sm:$0xff] %vm241_vm0, %v826_v26  ;;  %v1397_v40 = vpop.f32.mrb[12].mxu1  ;;  %v813_v41 = vmax.f32 %v781_v32, 0.0  ;;  %v681_v43 = vadd.f32 %v1373_v39, %v287_v23  ;;  %v569_v45 = vpop.f32.mrb[13].mxu0 }
 0x10c   : > { %v757_v35 = vld [vmem:[#allocation2 + $0xb0] sm:$0xff]  ;;  %v780_v37 = vadd.f32 %v1840_v9, %v741_v34  ;;  %710 = vst.msk [vmem:[#allocation2 + $0x50] sm:$0xff] %vm241_vm0, %v678_v29  ;;  %726 = vst.msk [vmem:[#allocation2 + $0xd0] sm:$0xff] %vm241_vm0, %v694_v30  ;;  %v829_v42 = vmax.f32 %v797_v33, 0.0  ;;  %v697_v44 = vadd.f32 %v1397_v40, %v303_v24  ;;  %v649_v46 = vpop.f32.mrb[13].mxu1  ;;  %v744_v51 = vld [vmem:[#allocation2 + $0x48] sm:$0xff]  ;;  %v680_v53 = vadd.f32 %v569_v45, %v286_v31 }
 0x10d   : > { %v796_v38 = vadd.f32 %v1840_v9, %v757_v35  ;;  %v760_v52 = vld [vmem:[#allocation2 + $0xc8] sm:$0xff]  ;;  %v696_v54 = vadd.f32 %v649_v46, %v302_v36  ;;  %845 = vst.msk [vmem:[%s1855_s30 + $0x38] sm:$0xff] %vm241_vm0, %v813_v41  ;;  %v783_v56 = vadd.f32 %v1840_v9, %v744_v51  ;;  %713 = vst.msk [vmem:[#allocation2 + $0x68] sm:$0xff] %vm241_vm0, %v681_v43 }
 0x10e   : > { %v812_v49 = vmax.f32 %v780_v37, 0.0  ;;  %861 = vst.msk [vmem:[%s1855_s30 + $0xb8] sm:$0xff] %vm241_vm0, %v829_v42  ;;  %v799_v57 = vadd.f32 %v1840_v9, %v760_v52  ;;  %729 = vst.msk [vmem:[#allocation2 + $0xe8] sm:$0xff] %vm241_vm0, %v697_v44  ;;  %v1376_v63 = vpop.f32.mrb[14].mxu0 }
 0x10f   : > { %v828_v50 = vmax.f32 %v796_v38, 0.0  ;;  %v743_v58 = vld [vmem:[#allocation2 + $0x40] sm:$0xff]  ;;  %712 = vst.msk [vmem:[#allocation2 + $0x60] sm:$0xff] %vm241_vm0, %v680_v53  ;;  %728 = vst.msk [vmem:[#allocation2 + $0xe0] sm:$0xff] %vm241_vm0, %v696_v54  ;;  %v1400_v0 = vpop.f32.mrb[14].mxu1  ;;  %v815_v1 = vmax.f32 %v783_v56, 0.0  ;;  %v683_v3 = vadd.f32 %v1376_v63, %v289_v47 }
 0x110   : > { %v759_v59 = vld [vmem:[#allocation2 + $0xc0] sm:$0xff]  ;;  %844 = vst.msk [vmem:[%s1855_s30 + $0x30] sm:$0xff] %vm241_vm0, %v812_v49  ;;  %v782_v61 = vadd.f32 %v1840_v9, %v743_v58  ;;  %v831_v2 = vmax.f32 %v799_v57, 0.0  ;;  %v699_v4 = vadd.f32 %v1400_v0, %v305_v48  ;;  %v579_v5 = vpop.f32.mrb[15].mxu0  ;;  %v659_v6 = vpop.f32.mrb[15].mxu1  ;;  %v746_v10 = vld [vmem:[#allocation2 + $0x58] sm:$0xff] }
 0x111   : > { %860 = vst.msk [vmem:[%s1855_s30 + $0xb0] sm:$0xff] %vm241_vm0, %v828_v50  ;;  %v798_v62 = vadd.f32 %v1840_v9, %v759_v59  ;;  %v762_v11 = vld [vmem:[#allocation2 + $0xd8] sm:$0xff]  ;;  %v682_v12 = vadd.f32 %v579_v5, %v288_v55  ;;  %v698_v13 = vadd.f32 %v659_v6, %v304_v60  ;;  %847 = vst.msk [vmem:[%s1855_s30 + $0x48] sm:$0xff] %vm241_vm0, %v815_v1 }
 0x112   : > { %v814_v7 = vmax.f32 %v782_v61, 0.0  ;;  %863 = vst.msk [vmem:[%s1855_s30 + $0xc8] sm:$0xff] %vm241_vm0, %v831_v2  ;;  %v785_v14 = vadd.f32 %v1840_v9, %v746_v10  ;;  %v801_v15 = vadd.f32 %v1840_v9, %v762_v11  ;;  %715 = vst.msk [vmem:[#allocation2 + $0x78] sm:$0xff] %vm241_vm0, %v683_v3 }
 0x113   : > { %v830_v8 = vmax.f32 %v798_v62, 0.0  ;;  %v745_v16 = vld [vmem:[#allocation2 + $0x50] sm:$0xff]  ;;  %731 = vst.msk [vmem:[#allocation2 + $0xf8] sm:$0xff] %vm241_vm0, %v699_v4  ;;  %714 = vst.msk [vmem:[#allocation2 + $0x70] sm:$0xff] %vm241_vm0, %v682_v12 }
 0x114   : > { %v761_v17 = vld [vmem:[#allocation2 + $0xd0] sm:$0xff]  ;;  %846 = vst.msk [vmem:[%s1855_s30 + $0x40] sm:$0xff] %vm241_vm0, %v814_v7  ;;  %v784_v18 = vadd.f32 %v1840_v9, %v745_v16  ;;  %730 = vst.msk [vmem:[#allocation2 + $0xf0] sm:$0xff] %vm241_vm0, %v698_v13  ;;  %v817_v20 = vmax.f32 %v785_v14, 0.0  ;;  %v833_v21 = vmax.f32 %v801_v15, 0.0  ;;  %v748_v24 = vld [vmem:[#allocation2 + $0x68] sm:$0xff] }
 0x115   : > { %862 = vst.msk [vmem:[%s1855_s30 + $0xc0] sm:$0xff] %vm241_vm0, %v830_v8  ;;  %v800_v19 = vadd.f32 %v1840_v9, %v761_v17  ;;  %v764_v25 = vld [vmem:[#allocation2 + $0xe8] sm:$0xff]  ;;  %v787_v26 = vadd.f32 %v1840_v9, %v748_v24 }
 0x116   : > { %v816_v22 = vmax.f32 %v784_v18, 0.0  ;;  %849 = vst.msk [vmem:[%s1855_s30 + $0x58] sm:$0xff] %vm241_vm0, %v817_v20  ;;  %865 = vst.msk [vmem:[%s1855_s30 + $0xd8] sm:$0xff] %vm241_vm0, %v833_v21  ;;  %v803_v27 = vadd.f32 %v1840_v9, %v764_v25  ;;  %v747_v28 = vld [vmem:[#allocation2 + $0x60] sm:$0xff] }
 0x117   : > { %v832_v23 = vmax.f32 %v800_v19, 0.0  ;;  %v763_v29 = vld [vmem:[#allocation2 + $0xe0] sm:$0xff]  ;;  %v786_v30 = vadd.f32 %v1840_v9, %v747_v28  ;;  %v819_v32 = vmax.f32 %v787_v26, 0.0 }
 0x118   : > { %848 = vst.msk [vmem:[%s1855_s30 + $0x50] sm:$0xff] %vm241_vm0, %v816_v22  ;;  %v802_v31 = vadd.f32 %v1840_v9, %v763_v29  ;;  %v835_v33 = vmax.f32 %v803_v27, 0.0 }
 0x119   : > { %864 = vst.msk [vmem:[%s1855_s30 + $0xd0] sm:$0xff] %vm241_vm0, %v832_v23  ;;  %v818_v34 = vmax.f32 %v786_v30, 0.0  ;;  %v750_v36 = vld [vmem:[#allocation2 + $0x78] sm:$0xff]  ;;  %851 = vst.msk [vmem:[%s1855_s30 + $0x68] sm:$0xff] %vm241_vm0, %v819_v32 }
 0x11a   : > { %v834_v35 = vmax.f32 %v802_v31, 0.0  ;;  %v766_v37 = vld [vmem:[#allocation2 + $0xf8] sm:$0xff]  ;;  %867 = vst.msk [vmem:[%s1855_s30 + $0xe8] sm:$0xff] %vm241_vm0, %v835_v33  ;;  %v789_v38 = vadd.f32 %v1840_v9, %v750_v36  ;;  %v749_v40 = vld [vmem:[#allocation2 + $0x70] sm:$0xff]  ;;  %876 = sbr.rel (!%p1687_p3) target bundleno = 345 (0x159), region = 44 }
 0x11b   : > { %v805_v39 = vadd.f32 %v1840_v9, %v766_v37  ;;  %v765_v41 = vld [vmem:[#allocation2 + $0xf0] sm:$0xff]  ;;  %850 = vst.msk [vmem:[%s1855_s30 + $0x60] sm:$0xff] %vm241_vm0, %v818_v34  ;;  %v788_v42 = vadd.f32 %v1840_v9, %v749_v40 }
 0x11c   : > { %866 = vst.msk [vmem:[%s1855_s30 + $0xe0] sm:$0xff] %vm241_vm0, %v834_v35  ;;  %v804_v43 = vadd.f32 %v1840_v9, %v765_v41  ;;  %v821_v44 = vmax.f32 %v789_v38, 0.0 }
 0x11d   : > { %v837_v45 = vmax.f32 %v805_v39, 0.0  ;;  %v820_v46 = vmax.f32 %v788_v42, 0.0 }
 0x11e   : > { %v836_v47 = vmax.f32 %v804_v43, 0.0  ;;  %853 = vst.msk [vmem:[%s1855_s30 + $0x78] sm:$0xff] %vm241_vm0, %v821_v44 }
 0x11f   : > { %869 = vst.msk [vmem:[%s1855_s30 + $0xf8] sm:$0xff] %vm241_vm0, %v837_v45  ;;  %852 = vst.msk [vmem:[%s1855_s30 + $0x70] sm:$0xff] %vm241_vm0, %v820_v46 }
 0x120   : > { %868 = vst.msk [vmem:[%s1855_s30 + $0xf0] sm:$0xff] %vm241_vm0, %v836_v47 }
 0x121   : > { %s2130_s4 = smov (!%p879_p9, %s878_s4), 32 }
 0x122   : > { %s1279_s9 = sshll.u32 %s2130_s4, 7 }
 0x123   : > { %p1282_p10 = scmp.eq.s32.totalorder %s1279_s9, 0 }
 0x124   : > { %s1982_s10 = sshrl.u32 (!%p1282_p10), %s2130_s4, 5 }
 0x125   : > { %887 = sbr.rel (%p1282_p10) target bundleno = 345 (0x159), region = 48  ;;  %p1283_p11 = scmp.le.s32.totalorder (!%p1282_p10), %s1982_s10, 0 }
 0x12c   : > { %1174 = sbr.rel (%p1283_p11) target bundleno = 324 (0x144), region = 127  ;;  %s2118_s14 = smov (!%p1283_p11), %s1976_s8 }
 0x12d   : > { %s2119_s20 = smov (!%p1283_p11), %s1855_s30  ;;  %s1991_s29 = smov (!%p1283_p11), 0  }
 0x12e   : > { %s1993_s11 = smov (!%p1283_p11), 0  }
 0x133 LB: >> { %v1011_v9 = vld [vmem:[%s1608_s20] sm:$0xff]  ;;  %v1013_v48 = vld [vmem:[%s1608_s20 + $0x8] sm:$0xff]  ;;  %v1015_v49 = vld [vmem:[%s1608_s20 + $0x10] sm:$0xff]  ;;  %s1075_s17 = sadd.s32 1, %s1612_s29  ;;  %s1005_s11 = sadd.s32 1, %s1616_s11   ;;  %s1616_s11 = sphi %s1993_s11, %s1005_s11   ;;  %s1612_s29 = sphi %s1991_s29, %s2122_s29   ;;  %s1608_s20 = sphi %s2119_s20, %s2121_s20   ;;  %s1604_s14 = sphi %s2118_s14, %s2120_s14  }
 0x134   : >> { %1012 = vst [vmem:[%s1604_s14] sm:$0xff] %v1011_v9  ;;  %1014 = vst [vmem:[%s1604_s14 + $0x8] sm:$0xff] %v1013_v48  ;;  %v1017_v50 = vld [vmem:[%s1608_s20 + $0x18] sm:$0xff]  ;;  %v1019_v51 = vld [vmem:[%s1608_s20 + $0x20] sm:$0xff]  ;;  %p1076_p12 = scmp.ge.s32.totalorder %s1075_s17, %s1982_s10  ;;  %p1004_p13 = scmp.ge.s32.totalorder %s1005_s11, %s1982_s10 }
 0x135   : >> { %1016 = vst [vmem:[%s1604_s14 + $0x10] sm:$0xff] %v1015_v49  ;;  %v1021_v52 = vld [vmem:[%s1608_s20 + $0x28] sm:$0xff]  ;;  %1018 = vst [vmem:[%s1604_s14 + $0x18] sm:$0xff] %v1017_v50  ;;  %v1023_v53 = vld [vmem:[%s1608_s20 + $0x30] sm:$0xff] }
 0x136   : >> { %1020 = vst [vmem:[%s1604_s14 + $0x20] sm:$0xff] %v1019_v51  ;;  %1022 = vst [vmem:[%s1604_s14 + $0x28] sm:$0xff] %v1021_v52  ;;  %v1025_v54 = vld [vmem:[%s1608_s20 + $0x38] sm:$0xff]  ;;  %v1027_v55 = vld [vmem:[%s1608_s20 + $0x40] sm:$0xff]  ;;  %s2132_s17 = smov (%p1076_p12, %s1075_s17), 0 }
 0x137   : >> { %1024 = vst [vmem:[%s1604_s14 + $0x30] sm:$0xff] %v1023_v53  ;;  %1026 = vst [vmem:[%s1604_s14 + $0x38] sm:$0xff] %v1025_v54  ;;  %v1029_v56 = vld [vmem:[%s1608_s20 + $0x48] sm:$0xff]  ;;  %v1031_v57 = vld [vmem:[%s1608_s20 + $0x50] sm:$0xff]  ;;  %s1284_s19 = sshll.u32 %s2132_s17, 8  ;;  %s2122_s29 = smov %s2132_s17 }
 0x138   : >> { %1028 = vst [vmem:[%s1604_s14 + $0x40] sm:$0xff] %v1027_v55  ;;  %v1033_v58 = vld [vmem:[%s1608_s20 + $0x58] sm:$0xff]  ;;  %1030 = vst [vmem:[%s1604_s14 + $0x48] sm:$0xff] %v1029_v56  ;;  %v1035_v59 = vld [vmem:[%s1608_s20 + $0x60] sm:$0xff]  ;;  %s2049_s21 = scalar_lea.vmem %s1855_s30, %s1284_s19 [#allocation3]   ;;  %s1081_s23 = scalar_lea.vmem %s1976_s8, %s1284_s19  }
 0x139   : >> { %1032 = vst [vmem:[%s1604_s14 + $0x50] sm:$0xff] %v1031_v57  ;;  %1034 = vst [vmem:[%s1604_s14 + $0x58] sm:$0xff] %v1033_v58  ;;  %v1037_v60 = vld [vmem:[%s1608_s20 + $0x68] sm:$0xff]  ;;  %v1039_v61 = vld [vmem:[%s1608_s20 + $0x70] sm:$0xff] }
 0x13a   : >> { %1036 = vst [vmem:[%s1604_s14 + $0x60] sm:$0xff] %v1035_v59  ;;  %1038 = vst [vmem:[%s1604_s14 + $0x68] sm:$0xff] %v1037_v60  ;;  %v1041_v62 = vld [vmem:[%s1608_s20 + $0x78] sm:$0xff]  ;;  %v1043_v63 = vld [vmem:[%s1608_s20 + $0x80] sm:$0xff] }
 0x13b   : >> { %1040 = vst [vmem:[%s1604_s14 + $0x70] sm:$0xff] %v1039_v61  ;;  %v1045_v0 = vld [vmem:[%s1608_s20 + $0x88] sm:$0xff]  ;;  %1042 = vst [vmem:[%s1604_s14 + $0x78] sm:$0xff] %v1041_v62  ;;  %v1047_v1 = vld [vmem:[%s1608_s20 + $0x90] sm:$0xff] }
 0x13c   : >> { %1044 = vst [vmem:[%s1604_s14 + $0x80] sm:$0xff] %v1043_v63  ;;  %1046 = vst [vmem:[%s1604_s14 + $0x88] sm:$0xff] %v1045_v0  ;;  %v1049_v2 = vld [vmem:[%s1608_s20 + $0x98] sm:$0xff]  ;;  %v1051_v3 = vld [vmem:[%s1608_s20 + $0xa0] sm:$0xff] }
 0x13d   : >> { %1048 = vst [vmem:[%s1604_s14 + $0x90] sm:$0xff] %v1047_v1  ;;  %1050 = vst [vmem:[%s1604_s14 + $0x98] sm:$0xff] %v1049_v2  ;;  %v1053_v4 = vld [vmem:[%s1608_s20 + $0xa8] sm:$0xff]  ;;  %v1055_v5 = vld [vmem:[%s1608_s20 + $0xb0] sm:$0xff]  ;;  %1007 = sbr.rel (!%p1004_p13) target bundleno = 307 (0x133), region = 133 }
 0x13e   : >> { %1052 = vst [vmem:[%s1604_s14 + $0xa0] sm:$0xff] %v1051_v3  ;;  %v1057_v6 = vld [vmem:[%s1608_s20 + $0xb8] sm:$0xff]  ;;  %1054 = vst [vmem:[%s1604_s14 + $0xa8] sm:$0xff] %v1053_v4  ;;  %v1059_v7 = vld [vmem:[%s1608_s20 + $0xc0] sm:$0xff] }
 0x13f   : >> { %1056 = vst [vmem:[%s1604_s14 + $0xb0] sm:$0xff] %v1055_v5  ;;  %1058 = vst [vmem:[%s1604_s14 + $0xb8] sm:$0xff] %v1057_v6  ;;  %v1061_v8 = vld [vmem:[%s1608_s20 + $0xc8] sm:$0xff]  ;;  %v1063_v10 = vld [vmem:[%s1608_s20 + $0xd0] sm:$0xff] }
 0x140   : >> { %1060 = vst [vmem:[%s1604_s14 + $0xc0] sm:$0xff] %v1059_v7  ;;  %1062 = vst [vmem:[%s1604_s14 + $0xc8] sm:$0xff] %v1061_v8  ;;  %v1065_v11 = vld [vmem:[%s1608_s20 + $0xd8] sm:$0xff]  ;;  %v1067_v12 = vld [vmem:[%s1608_s20 + $0xe0] sm:$0xff] }
 0x141   : >> { %1064 = vst [vmem:[%s1604_s14 + $0xd0] sm:$0xff] %v1063_v10  ;;  %v1069_v13 = vld [vmem:[%s1608_s20 + $0xe8] sm:$0xff]  ;;  %1066 = vst [vmem:[%s1604_s14 + $0xd8] sm:$0xff] %v1065_v11  ;;  %v1071_v14 = vld [vmem:[%s1608_s20 + $0xf0] sm:$0xff] }
 0x142   : >> { %1068 = vst [vmem:[%s1604_s14 + $0xe0] sm:$0xff] %v1067_v12  ;;  %1070 = vst [vmem:[%s1604_s14 + $0xe8] sm:$0xff] %v1069_v13  ;;  %v1073_v15 = vld [vmem:[%s1608_s20 + $0xf8] sm:$0xff]  ;;  %s2121_s20 = smov %s2049_s21 }
 0x143   : >> { %1072 = vst [vmem:[%s1604_s14 + $0xf0] sm:$0xff] %v1071_v14  ;;  %1074 = vst [vmem:[%s1604_s14 + $0xf8] sm:$0xff] %v1073_v15  ;;  %s2120_s14 = smov %s1081_s23 }
 0x144 PF: > { %s2090_s24 = sand.u32 31, %s2130_s4   ;;  %s1295_s25 = sshll.u32 %s1982_s10, 8 }
 0x145   : > { %s1086_s26 = scalar_lea.vmem %s1855_s30, %s1295_s25 [#allocation3]   ;;  %s1088_s27 = scalar_lea.vmem %s1976_s8, %s1295_s25  }
 0x146   : > { %p1289_p0 = scmp.le.s32.totalorder %s2090_s24, 0 }
 0x147   : > { %s1618_s28 = smov (!%p1289_p0), %s1088_s27   ;;  %s1622_s12 = smov (!%p1289_p0), %s1086_s26  }
 0x148   : > { %1188 = sbr.rel (%p1289_p0) target bundleno = 345 (0x159), region = 138  ;;  %s1626_s5 = smov (!%p1289_p0), 0  }
 0x149   : > { %s1630_s6 = smov (!%p1289_p0), 0  }
 0x14f LB: >> { %v1098_v16 = vld [vmem:[%s1624_s12] sm:$0xff]  ;;  %s1100_s4 = sadd.s32 1, %s1628_s5  ;;  %s1092_s6 = sadd.s32 1, %s1632_s6   ;;  %s1632_s6 = sphi %s1630_s6, %s1092_s6   ;;  %s1628_s5 = sphi %s1626_s5, %s1627_s5   ;;  %s1624_s12 = sphi %s1622_s12, %s1105_s12   ;;  %s1620_s28 = sphi %s1618_s28, %s1106_s28  }
 0x150   : >> { %1099 = vst [vmem:[%s1620_s28] sm:$0xff] %v1098_v16  ;;  %p1101_p1 = scmp.ge.s32.totalorder %s1100_s4, %s2090_s24  ;;  %p1091_p2 = scmp.ge.s32.totalorder %s1092_s6, %s2090_s24 }
 0x152   : >> { %s2134_s4 = smov (%p1101_p1, %s1100_s4), 0  ;;  %1094 = sbr.rel (!%p1091_p2) target bundleno = 335 (0x14f), region = 144 }
 0x153   : >> { %s1290_s30 = sshll.u32 %s2134_s4, 3  ;;  %s1627_s5 = smov %s2134_s4  }
 0x154   : >> { %s1105_s12 = scalar_lea.vmem %s1086_s26, %s1290_s30 [#allocation3]   ;;  %s1106_s28 = scalar_lea.vmem %s1088_s27, %s1290_s30  }
 0x159 PF: > { %s13_s16 = sadd.s32 1, %s1600_s16   ;;  %s2123_s12 = smov %s1588_s13 }
 0x15a   : > { %p10_p3 = scmp.ge.s32.totalorder %s13_s16, 6   ;;  %s2124_s13 = smov %s1696_s22 }
 0x15b   : > { %s2125_s14 = smov %s1596_s15  ;;  %s2126_s15 = smov %s2128_s18 }
 0x15c   :  { %12 = sbr.rel (!%p10_p3) target bundleno = 3 (0x3), region = 155 }

// kernel: cnn_forward.5
= control target key start
LH: loop header
LB: loop body
LE: loop exit
PB: predicated region body
PF: predicated region fallthrough
CT: control target
= control target key end

     0   :  { %s1746_s12 = smov 0   ;;  %s1748_s13 = smov 0   ;;  %s2295_s0 = inlined_call_operand.vmem [shape: f32[128,2304], index: 0, kind: input, shape index: {}]   ;;  %s2296_s1 = inlined_call_operand.vmem [shape: f32[2304,128], index: 1, kind: input, shape index: {}]   ;;  %s2297_s2 = inlined_call_operand.vmem [shape: f32[1,128], index: 2, kind: input, shape index: {}]   ;;  %s2298_s3 = inlined_call_operand.vmem [shape: f32[128,128], index: 3, kind: output, shape index: {}]  }
   0x1   :  { %s1750_s14 = smov 0   ;;  %s1752_s15 = smov 0  }
   0x2   :  { %s1754_s16 = smov 0  }
   0x3 LB: > { %s22_s17 = sadd.s32 1, %s1719_s15  ;;  %p41_p1 = scmp.ne.s32.totalorder %s1711_s13, %s1707_s12  ;;  %s1723_s16 = sphi %s1754_s16, %s13_s16   ;;  %s1719_s15 = sphi %s1752_s15, %s2302_s15   ;;  %s1715_s14 = sphi %s1750_s14, %s2301_s14   ;;  %s1711_s13 = sphi %s1748_s13, %s2300_s13   ;;  %s1707_s12 = sphi %s1746_s12, %s2299_s12  }
   0x4   : > { %p23_p0 = scmp.ge.s32.totalorder %s22_s17, 3  ;;  %p42_p2 = scmp.eq.s32.totalorder %s1723_s16, 0 }
   0x5   : > { %s34_s19 = sadd.s32 1, %s1711_s13  ;;  %p1278_p5 = scmp.ge.s32.totalorder %s1723_s16, 3 }
   0x6   : > { %s2304_s17 = smov (%p23_p0, %s22_s17), 0  ;;  %p43_p3 = por %p42_p2, %p41_p1 }
   0x7   : > { %s30_s18 = ssub.s32 %s1719_s15, %s2304_s17  ;;  %143 = sbr.rel (%p1278_p5) target bundleno = 67 (0x43), region = 20 }
   0x8   : > { %p32_p4 = scmp.eq.s32.totalorder %s30_s18, 0 }
   0xa   : > { %s1781_s20 = scalar_select %p32_p4, %s1711_s13, %s34_s19  }
   0xe   : > { %146 = sbr.rel (!%p43_p3) target bundleno = 67 (0x43), region = 24  ;;  %s148_s21 = sand.u32 (%p43_p3), 1, %s1711_s13  }
   0xf   : > { %s1289_s22 = smul.u32 (%p43_p3), 48, %s1719_s15 }
  0x10   : > { %s1642_s23 = smul.u32 (%p43_p3), 768, %s148_s21 }
  0x11   : > { %s1789_s26 = scalar_lea.vmem (%p43_p3), %s2295_s0, %s1289_s22 }
  0x12   : > { %v169_v0 = vld [vmem:[%s1789_s26] sm:$0xff] (%p43_p3)  ;;  %v171_v1 = vld [vmem:[%s1789_s26 + $0x8] sm:$0xff] (%p43_p3)  ;;  %v173_v2 = vld [vmem:[%s1789_s26 + $0x10] sm:$0xff] (%p43_p3)  ;;  %s1794_s27 = scalar_lea.vmem (%p43_p3), [#allocation3], %s1642_s23 }
  0x13   : > { %170 = vst [vmem:[%s1794_s27] sm:$0xff] (%p43_p3), %v169_v0  ;;  %172 = vst [vmem:[%s1794_s27 + $0x8] sm:$0xff] (%p43_p3), %v171_v1  ;;  %v175_v3 = vld [vmem:[%s1789_s26 + $0x18] sm:$0xff] (%p43_p3)  ;;  %v177_v4 = vld [vmem:[%s1789_s26 + $0x20] sm:$0xff] (%p43_p3) }
  0x14   : > { %174 = vst [vmem:[%s1794_s27 + $0x10] sm:$0xff] (%p43_p3), %v173_v2  ;;  %v179_v5 = vld [vmem:[%s1789_s26 + $0x28] sm:$0xff] (%p43_p3)  ;;  %176 = vst [vmem:[%s1794_s27 + $0x18] sm:$0xff] (%p43_p3), %v175_v3  ;;  %v181_v6 = vld [vmem:[%s1789_s26 + $0x90] sm:$0xff] (%p43_p3) }
  0x15   : > { %178 = vst [vmem:[%s1794_s27 + $0x20] sm:$0xff] %v177_v4  ;;  %180 = vst [vmem:[%s1794_s27 + $0x28] sm:$0xff] %v179_v5  ;;  %v183_v7 = vld [vmem:[%s1789_s26 + $0x98] sm:$0xff]  ;;  %v185_v8 = vld [vmem:[%s1789_s26 + $0xa0] sm:$0xff] }
  0x16   : > { %182 = vst [vmem:[%s1794_s27 + $0x30] sm:$0xff] %v181_v6  ;;  %184 = vst [vmem:[%s1794_s27 + $0x38] sm:$0xff] %v183_v7  ;;  %v187_v9 = vld [vmem:[%s1789_s26 + $0xa8] sm:$0xff]  ;;  %v189_v10 = vld [vmem:[%s1789_s26 + $0xb0] sm:$0xff] }
  0x17   : > { %186 = vst [vmem:[%s1794_s27 + $0x40] sm:$0xff] %v185_v8  ;;  %v191_v11 = vld [vmem:[%s1789_s26 + $0xb8] sm:$0xff]  ;;  %188 = vst [vmem:[%s1794_s27 + $0x48] sm:$0xff] %v187_v9  ;;  %v193_v12 = vld [vmem:[%s1789_s26 + $0x120] sm:$0xff] }
  0x18   : > { %190 = vst [vmem:[%s1794_s27 + $0x50] sm:$0xff] %v189_v10  ;;  %192 = vst [vmem:[%s1794_s27 + $0x58] sm:$0xff] %v191_v11  ;;  %v195_v13 = vld [vmem:[%s1789_s26 + $0x128] sm:$0xff]  ;;  %v197_v14 = vld [vmem:[%s1789_s26 + $0x130] sm:$0xff] }
  0x19   : > { %194 = vst [vmem:[%s1794_s27 + $0x60] sm:$0xff] %v193_v12  ;;  %196 = vst [vmem:[%s1794_s27 + $0x68] sm:$0xff] %v195_v13  ;;  %v199_v15 = vld [vmem:[%s1789_s26 + $0x138] sm:$0xff]  ;;  %v201_v16 = vld [vmem:[%s1789_s26 + $0x140] sm:$0xff] }
  0x1a   : > { %198 = vst [vmem:[%s1794_s27 + $0x70] sm:$0xff] %v197_v14  ;;  %v203_v17 = vld [vmem:[%s1789_s26 + $0x148] sm:$0xff]  ;;  %200 = vst [vmem:[%s1794_s27 + $0x78] sm:$0xff] %v199_v15  ;;  %v205_v18 = vld [vmem:[%s1789_s26 + $0x1b0] sm:$0xff] }
  0x1b   : > { %202 = vst [vmem:[%s1794_s27 + $0x80] sm:$0xff] %v201_v16  ;;  %204 = vst [vmem:[%s1794_s27 + $0x88] sm:$0xff] %v203_v17  ;;  %v207_v19 = vld [vmem:[%s1789_s26 + $0x1b8] sm:$0xff]  ;;  %v209_v20 = vld [vmem:[%s1789_s26 + $0x1c0] sm:$0xff] }
  0x1c   : > { %206 = vst [vmem:[%s1794_s27 + $0x90] sm:$0xff] %v205_v18  ;;  %208 = vst [vmem:[%s1794_s27 + $0x98] sm:$0xff] %v207_v19  ;;  %v211_v21 = vld [vmem:[%s1789_s26 + $0x1c8] sm:$0xff]  ;;  %v213_v22 = vld [vmem:[%s1789_s26 + $0x1d0] sm:$0xff] }
  0x1d   : > { %210 = vst [vmem:[%s1794_s27 + $0xa0] sm:$0xff] %v209_v20  ;;  %v215_v23 = vld [vmem:[%s1789_s26 + $0x1d8] sm:$0xff]  ;;  %212 = vst [vmem:[%s1794_s27 + $0xa8] sm:$0xff] %v211_v21  ;;  %v217_v24 = vld [vmem:[%s1789_s26 + $0x240] sm:$0xff] }
  0x1e   : > { %214 = vst [vmem:[%s1794_s27 + $0xb0] sm:$0xff] %v213_v22  ;;  %216 = vst [vmem:[%s1794_s27 + $0xb8] sm:$0xff] %v215_v23  ;;  %v219_v25 = vld [vmem:[%s1789_s26 + $0x248] sm:$0xff]  ;;  %v221_v26 = vld [vmem:[%s1789_s26 + $0x250] sm:$0xff] }
  0x1f   : > { %218 = vst [vmem:[%s1794_s27 + $0xc0] sm:$0xff] %v217_v24  ;;  %220 = vst [vmem:[%s1794_s27 + $0xc8] sm:$0xff] %v219_v25  ;;  %v223_v27 = vld [vmem:[%s1789_s26 + $0x258] sm:$0xff]  ;;  %v225_v28 = vld [vmem:[%s1789_s26 + $0x260] sm:$0xff] }
  0x20   : > { %222 = vst [vmem:[%s1794_s27 + $0xd0] sm:$0xff] %v221_v26  ;;  %v227_v29 = vld [vmem:[%s1789_s26 + $0x268] sm:$0xff]  ;;  %224 = vst [vmem:[%s1794_s27 + $0xd8] sm:$0xff] %v223_v27  ;;  %v229_v30 = vld [vmem:[%s1789_s26 + $0x2d0] sm:$0xff] }
  0x21   : > { %226 = vst [vmem:[%s1794_s27 + $0xe0] sm:$0xff] %v225_v28  ;;  %228 = vst [vmem:[%s1794_s27 + $0xe8] sm:$0xff] %v227_v29  ;;  %v231_v31 = vld [vmem:[%s1789_s26 + $0x2d8] sm:$0xff]  ;;  %v233_v32 = vld [vmem:[%s1789_s26 + $0x2e0] sm:$0xff] }
  0x22   : > { %230 = vst [vmem:[%s1794_s27 + $0xf0] sm:$0xff] %v229_v30  ;;  %232 = vst [vmem:[%s1794_s27 + $0xf8] sm:$0xff] %v231_v31  ;;  %v235_v33 = vld [vmem:[%s1789_s26 + $0x2e8] sm:$0xff]  ;;  %v237_v34 = vld [vmem:[%s1789_s26 + $0x2f0] sm:$0xff] }
  0x23   : > { %234 = vst [vmem:[%s1794_s27 + $0x100] sm:$0xff] %v233_v32  ;;  %v239_v35 = vld [vmem:[%s1789_s26 + $0x2f8] sm:$0xff]  ;;  %236 = vst [vmem:[%s1794_s27 + $0x108] sm:$0xff] %v235_v33  ;;  %v241_v36 = vld [vmem:[%s1789_s26 + $0x360] sm:$0xff] }
  0x24   : > { %238 = vst [vmem:[%s1794_s27 + $0x110] sm:$0xff] %v237_v34  ;;  %240 = vst [vmem:[%s1794_s27 + $0x118] sm:$0xff] %v239_v35  ;;  %v243_v37 = vld [vmem:[%s1789_s26 + $0x368] sm:$0xff]  ;;  %v245_v38 = vld [vmem:[%s1789_s26 + $0x370] sm:$0xff] }
  0x25   : > { %242 = vst [vmem:[%s1794_s27 + $0x120] sm:$0xff] %v241_v36  ;;  %244 = vst [vmem:[%s1794_s27 + $0x128] sm:$0xff] %v243_v37  ;;  %v247_v39 = vld [vmem:[%s1789_s26 + $0x378] sm:$0xff]  ;;  %v249_v40 = vld [vmem:[%s1789_s26 + $0x380] sm:$0xff] }
  0x26   : > { %246 = vst [vmem:[%s1794_s27 + $0x130] sm:$0xff] %v245_v38  ;;  %v251_v41 = vld [vmem:[%s1789_s26 + $0x388] sm:$0xff]  ;;  %248 = vst [vmem:[%s1794_s27 + $0x138] sm:$0xff] %v247_v39  ;;  %v253_v42 = vld [vmem:[%s1789_s26 + $0x3f0] sm:$0xff] }
  0x27   : > { %250 = vst [vmem:[%s1794_s27 + $0x140] sm:$0xff] %v249_v40  ;;  %252 = vst [vmem:[%s1794_s27 + $0x148] sm:$0xff] %v251_v41  ;;  %v255_v43 = vld [vmem:[%s1789_s26 + $0x3f8] sm:$0xff]  ;;  %v257_v44 = vld [vmem:[%s1789_s26 + $0x400] sm:$0xff] }
  0x28   : > { %254 = vst [vmem:[%s1794_s27 + $0x150] sm:$0xff] %v253_v42  ;;  %256 = vst [vmem:[%s1794_s27 + $0x158] sm:$0xff] %v255_v43  ;;  %v259_v45 = vld [vmem:[%s1789_s26 + $0x408] sm:$0xff]  ;;  %v261_v46 = vld [vmem:[%s1789_s26 + $0x410] sm:$0xff] }
  0x29   : > { %258 = vst [vmem:[%s1794_s27 + $0x160] sm:$0xff] %v257_v44  ;;  %v263_v47 = vld [vmem:[%s1789_s26 + $0x418] sm:$0xff]  ;;  %260 = vst [vmem:[%s1794_s27 + $0x168] sm:$0xff] %v259_v45  ;;  %v265_v48 = vld [vmem:[%s1789_s26 + $0x480] sm:$0xff] }
  0x2a   : > { %262 = vst [vmem:[%s1794_s27 + $0x170] sm:$0xff] %v261_v46  ;;  %264 = vst [vmem:[%s1794_s27 + $0x178] sm:$0xff] %v263_v47  ;;  %v267_v49 = vld [vmem:[%s1789_s26 + $0x488] sm:$0xff]  ;;  %v269_v50 = vld [vmem:[%s1789_s26 + $0x490] sm:$0xff] }
  0x2b   : > { %266 = vst [vmem:[%s1794_s27 + $0x180] sm:$0xff] %v265_v48  ;;  %268 = vst [vmem:[%s1794_s27 + $0x188] sm:$0xff] %v267_v49  ;;  %v271_v51 = vld [vmem:[%s1789_s26 + $0x498] sm:$0xff]  ;;  %v273_v52 = vld [vmem:[%s1789_s26 + $0x4a0] sm:$0xff] }
  0x2c   : > { %270 = vst [vmem:[%s1794_s27 + $0x190] sm:$0xff] %v269_v50  ;;  %v275_v53 = vld [vmem:[%s1789_s26 + $0x4a8] sm:$0xff]  ;;  %272 = vst [vmem:[%s1794_s27 + $0x198] sm:$0xff] %v271_v51  ;;  %v277_v54 = vld [vmem:[%s1789_s26 + $0x510] sm:$0xff] }
  0x2d   : > { %274 = vst [vmem:[%s1794_s27 + $0x1a0] sm:$0xff] %v273_v52  ;;  %276 = vst [vmem:[%s1794_s27 + $0x1a8] sm:$0xff] %v275_v53  ;;  %v279_v55 = vld [vmem:[%s1789_s26 + $0x518] sm:$0xff]  ;;  %v281_v56 = vld [vmem:[%s1789_s26 + $0x520] sm:$0xff] }
  0x2e   : > { %278 = vst [vmem:[%s1794_s27 + $0x1b0] sm:$0xff] %v277_v54  ;;  %280 = vst [vmem:[%s1794_s27 + $0x1b8] sm:$0xff] %v279_v55  ;;  %v283_v57 = vld [vmem:[%s1789_s26 + $0x528] sm:$0xff]  ;;  %v285_v58 = vld [vmem:[%s1789_s26 + $0x530] sm:$0xff] }
  0x2f   : > { %282 = vst [vmem:[%s1794_s27 + $0x1c0] sm:$0xff] %v281_v56  ;;  %v287_v59 = vld [vmem:[%s1789_s26 + $0x538] sm:$0xff]  ;;  %284 = vst [vmem:[%s1794_s27 + $0x1c8] sm:$0xff] %v283_v57  ;;  %v289_v60 = vld [vmem:[%s1789_s26 + $0x5a0] sm:$0xff] }
  0x30   : > { %286 = vst [vmem:[%s1794_s27 + $0x1d0] sm:$0xff] %v285_v58  ;;  %288 = vst [vmem:[%s1794_s27 + $0x1d8] sm:$0xff] %v287_v59  ;;  %v291_v61 = vld [vmem:[%s1789_s26 + $0x5a8] sm:$0xff]  ;;  %v293_v62 = vld [vmem:[%s1789_s26 + $0x5b0] sm:$0xff] }
  0x31   : > { %290 = vst [vmem:[%s1794_s27 + $0x1e0] sm:$0xff] %v289_v60  ;;  %292 = vst [vmem:[%s1794_s27 + $0x1e8] sm:$0xff] %v291_v61  ;;  %v295_v63 = vld [vmem:[%s1789_s26 + $0x5b8] sm:$0xff]  ;;  %v297_v0 = vld [vmem:[%s1789_s26 + $0x5c0] sm:$0xff] }
  0x32   : > { %294 = vst [vmem:[%s1794_s27 + $0x1f0] sm:$0xff] %v293_v62  ;;  %v299_v1 = vld [vmem:[%s1789_s26 + $0x5c8] sm:$0xff]  ;;  %296 = vst [vmem:[%s1794_s27 + $0x1f8] sm:$0xff] %v295_v63  ;;  %v301_v2 = vld [vmem:[%s1789_s26 + $0x630] sm:$0xff] }
  0x33   : > { %298 = vst [vmem:[%s1794_s27 + $0x200] sm:$0xff] %v297_v0  ;;  %300 = vst [vmem:[%s1794_s27 + $0x208] sm:$0xff] %v299_v1  ;;  %v303_v3 = vld [vmem:[%s1789_s26 + $0x638] sm:$0xff]  ;;  %v305_v4 = vld [vmem:[%s1789_s26 + $0x640] sm:$0xff] }
  0x34   : > { %302 = vst [vmem:[%s1794_s27 + $0x210] sm:$0xff] %v301_v2  ;;  %304 = vst [vmem:[%s1794_s27 + $0x218] sm:$0xff] %v303_v3  ;;  %v307_v5 = vld [vmem:[%s1789_s26 + $0x648] sm:$0xff]  ;;  %v309_v6 = vld [vmem:[%s1789_s26 + $0x650] sm:$0xff] }
  0x35   : > { %306 = vst [vmem:[%s1794_s27 + $0x220] sm:$0xff] %v305_v4  ;;  %v311_v7 = vld [vmem:[%s1789_s26 + $0x658] sm:$0xff]  ;;  %308 = vst [vmem:[%s1794_s27 + $0x228] sm:$0xff] %v307_v5  ;;  %v313_v8 = vld [vmem:[%s1789_s26 + $0x6c0] sm:$0xff] }
  0x36   : > { %310 = vst [vmem:[%s1794_s27 + $0x230] sm:$0xff] %v309_v6  ;;  %312 = vst [vmem:[%s1794_s27 + $0x238] sm:$0xff] %v311_v7  ;;  %v315_v9 = vld [vmem:[%s1789_s26 + $0x6c8] sm:$0xff]  ;;  %v317_v10 = vld [vmem:[%s1789_s26 + $0x6d0] sm:$0xff] }
  0x37   : > { %314 = vst [vmem:[%s1794_s27 + $0x240] sm:$0xff] %v313_v8  ;;  %316 = vst [vmem:[%s1794_s27 + $0x248] sm:$0xff] %v315_v9  ;;  %v319_v11 = vld [vmem:[%s1789_s26 + $0x6d8] sm:$0xff]  ;;  %v321_v12 = vld [vmem:[%s1789_s26 + $0x6e0] sm:$0xff] }
  0x38   : > { %318 = vst [vmem:[%s1794_s27 + $0x250] sm:$0xff] %v317_v10  ;;  %v323_v13 = vld [vmem:[%s1789_s26 + $0x6e8] sm:$0xff]  ;;  %320 = vst [vmem:[%s1794_s27 + $0x258] sm:$0xff] %v319_v11  ;;  %v325_v14 = vld [vmem:[%s1789_s26 + $0x750] sm:$0xff] }
  0x39   : > { %322 = vst [vmem:[%s1794_s27 + $0x260] sm:$0xff] %v321_v12  ;;  %324 = vst [vmem:[%s1794_s27 + $0x268] sm:$0xff] %v323_v13  ;;  %v327_v15 = vld [vmem:[%s1789_s26 + $0x758] sm:$0xff]  ;;  %v329_v16 = vld [vmem:[%s1789_s26 + $0x760] sm:$0xff] }
  0x3a   : > { %326 = vst [vmem:[%s1794_s27 + $0x270] sm:$0xff] %v325_v14  ;;  %328 = vst [vmem:[%s1794_s27 + $0x278] sm:$0xff] %v327_v15  ;;  %v331_v17 = vld [vmem:[%s1789_s26 + $0x768] sm:$0xff]  ;;  %v333_v18 = vld [vmem:[%s1789_s26 + $0x770] sm:$0xff] }
  0x3b   : > { %330 = vst [vmem:[%s1794_s27 + $0x280] sm:$0xff] %v329_v16  ;;  %v335_v19 = vld [vmem:[%s1789_s26 + $0x778] sm:$0xff]  ;;  %332 = vst [vmem:[%s1794_s27 + $0x288] sm:$0xff] %v331_v17  ;;  %v337_v20 = vld [vmem:[%s1789_s26 + $0x7e0] sm:$0xff] }
  0x3c   : > { %334 = vst [vmem:[%s1794_s27 + $0x290] sm:$0xff] %v333_v18  ;;  %336 = vst [vmem:[%s1794_s27 + $0x298] sm:$0xff] %v335_v19  ;;  %v339_v21 = vld [vmem:[%s1789_s26 + $0x7e8] sm:$0xff]  ;;  %v341_v22 = vld [vmem:[%s1789_s26 + $0x7f0] sm:$0xff] }
  0x3d   : > { %338 = vst [vmem:[%s1794_s27 + $0x2a0] sm:$0xff] %v337_v20  ;;  %340 = vst [vmem:[%s1794_s27 + $0x2a8] sm:$0xff] %v339_v21  ;;  %v343_v23 = vld [vmem:[%s1789_s26 + $0x7f8] sm:$0xff]  ;;  %v345_v24 = vld [vmem:[%s1789_s26 + $0x800] sm:$0xff] }
  0x3e   : > { %342 = vst [vmem:[%s1794_s27 + $0x2b0] sm:$0xff] %v341_v22  ;;  %v347_v25 = vld [vmem:[%s1789_s26 + $0x808] sm:$0xff]  ;;  %344 = vst [vmem:[%s1794_s27 + $0x2b8] sm:$0xff] %v343_v23  ;;  %v349_v26 = vld [vmem:[%s1789_s26 + $0x870] sm:$0xff] }
  0x3f   : > { %346 = vst [vmem:[%s1794_s27 + $0x2c0] sm:$0xff] %v345_v24  ;;  %348 = vst [vmem:[%s1794_s27 + $0x2c8] sm:$0xff] %v347_v25  ;;  %v351_v27 = vld [vmem:[%s1789_s26 + $0x878] sm:$0xff]  ;;  %v353_v28 = vld [vmem:[%s1789_s26 + $0x880] sm:$0xff] }
  0x40   : > { %350 = vst [vmem:[%s1794_s27 + $0x2d0] sm:$0xff] %v349_v26  ;;  %352 = vst [vmem:[%s1794_s27 + $0x2d8] sm:$0xff] %v351_v27  ;;  %v355_v29 = vld [vmem:[%s1789_s26 + $0x888] sm:$0xff]  ;;  %v357_v30 = vld [vmem:[%s1789_s26 + $0x890] sm:$0xff] }
  0x41   : > { %354 = vst [vmem:[%s1794_s27 + $0x2e0] sm:$0xff] %v353_v28  ;;  %v359_v31 = vld [vmem:[%s1789_s26 + $0x898] sm:$0xff]  ;;  %356 = vst [vmem:[%s1794_s27 + $0x2e8] sm:$0xff] %v355_v29 }
  0x42   : > { %358 = vst [vmem:[%s1794_s27 + $0x2f0] sm:$0xff] %v357_v30  ;;  %360 = vst [vmem:[%s1794_s27 + $0x2f8] sm:$0xff] %v359_v31 }
  0x43 PF: > { %p1280_p6 = scmp.ge.s32.totalorder %s1723_s16, 1  ;;  %p374_p7 = scmp.lt.s32.totalorder %s1723_s16, 4 }
  0x45   : > { %p375_p8 = pnand %p1280_p6, %p374_p7 }
  0x46   : > { %s381_s28 = sand.u32 (!%p375_p8), 1, %s1707_s12   ;;  %s411_s29 = smul.u32 (!%p375_p8), 96, %s1715_s14 }
  0x47   : > { %378 = sbr.rel (%p375_p8) target bundleno = 449 (0x1c1), region = 51  ;;  %p1282_p10 = scmp.ne.s32.totalorder (!%p375_p8), %s1715_s14, 0 }
  0x48   : > { %s1643_s30 = smul.u32 (!%p375_p8), 768, %s381_s28  ;;  %p412_p9 = scmp.lt.s32.totalorder (!%p375_p8), %s411_s29, 287 }
  0x4a   : > { %s1994_s8 = scalar_lea.vmem (!%p375_p8), [#allocation3], %s1643_s30 }
  0x4e   : > { %s2306_s29 = smov (!%p412_p9, %s411_s29), 287  ;;  %426 = sbr.rel (%p1282_p10) target bundleno = 88 (0x58), region = 59 }
  0x4f   : > { %s1281_s4 = sshll.u32 %s2306_s29, 3  ;;  %v1725_v32 = vmov (!%p1282_p10), 0.0  }
  0x50   : > { %s1992_s7 = scalar_lea.vmem %s2296_s1, %s1281_s4  ;;  %427 = vst [vmem:[#allocation2] sm:$0xff] (!%p1282_p10), %v1725_v32  ;;  %428 = vst [vmem:[#allocation2 + $0x8] sm:$0xff] (!%p1282_p10), %v1725_v32 }
  0x51   : > { %429 = vst [vmem:[#allocation2 + $0x10] sm:$0xff] (!%p1282_p10), %v1725_v32  ;;  %430 = vst [vmem:[#allocation2 + $0x18] sm:$0xff] (!%p1282_p10), %v1725_v32 }
  0x52   : > { %431 = vst [vmem:[#allocation2 + $0x20] sm:$0xff] (!%p1282_p10), %v1725_v32  ;;  %432 = vst [vmem:[#allocation2 + $0x28] sm:$0xff] (!%p1282_p10), %v1725_v32 }
  0x53   : > { %433 = vst [vmem:[#allocation2 + $0x30] sm:$0xff] (!%p1282_p10), %v1725_v32  ;;  %434 = vst [vmem:[#allocation2 + $0x38] sm:$0xff] (!%p1282_p10), %v1725_v32 }
  0x54   : > { %435 = vst [vmem:[#allocation2 + $0x40] sm:$0xff] (!%p1282_p10), %v1725_v32  ;;  %436 = vst [vmem:[#allocation2 + $0x48] sm:$0xff] (!%p1282_p10), %v1725_v32 }
  0x55   : > { %437 = vst [vmem:[#allocation2 + $0x50] sm:$0xff] %v1725_v32  ;;  %438 = vst [vmem:[#allocation2 + $0x58] sm:$0xff] %v1725_v32 }
  0x56   : > { %439 = vst [vmem:[#allocation2 + $0x60] sm:$0xff] %v1725_v32  ;;  %440 = vst [vmem:[#allocation2 + $0x68] sm:$0xff] %v1725_v32 }
  0x57   : > { %441 = vst [vmem:[#allocation2 + $0x70] sm:$0xff] %v1725_v32  ;;  %442 = vst [vmem:[#allocation2 + $0x78] sm:$0xff] %v1725_v32 }
  0x58 PF: > { %v571_v33 = vld [vmem:[%s1992_s7 + $0x80] sm:$0xff]  ;;  %v572_v34 = vld [vmem:[%s1992_s7 + $0x88] sm:$0xff]  ;;  %v573_v38 = vld [vmem:[%s1992_s7 + $0x90] sm:$0xff]  ;;  %p1283_p11 = scmp.ne.s32.totalorder %s1715_s14, 2 }
  0x59   : > { %v555_v35 = vld [vmem:[%s1992_s7] sm:$0xff]  ;;  %v1530_v36 = vpack.c.bf16 %v572_v34, %v571_v33  ;;  %v556_v37 = vld [vmem:[%s1992_s7 + $0x8] sm:$0xff]  ;;  %v574_v39 = vld [vmem:[%s1992_s7 + $0x98] sm:$0xff] }
  0x5a   : > { %v1532_v40 = vpack.c.bf16 %v556_v37, %v555_v35  ;;  %v1534_v41 = vpack.c.bf16 %v574_v39, %v573_v38  ;;  %v557_v42 = vld [vmem:[%s1992_s7 + $0x10] sm:$0xff]  ;;  %v558_v43 = vld [vmem:[%s1992_s7 + $0x18] sm:$0xff]  ;;  %v575_v44 = vld [vmem:[%s1992_s7 + $0xa0] sm:$0xff] }
  0x5b   : > { %1626 = vmatprep.subr.bf16.mxu1 %v1530_v36  ;;  %1531 = vmatprep.subr.bf16.mxu0 %v1530_v36  ;;  %v576_v45 = vld [vmem:[%s1992_s7 + $0xa8] sm:$0xff]  ;;  %v1536_v46 = vpack.c.bf16 %v558_v43, %v557_v42  ;;  %v559_v48 = vld [vmem:[%s1992_s7 + $0x20] sm:$0xff]  ;;  %v577_v50 = vld [vmem:[%s1992_s7 + $0xb0] sm:$0xff] }
  0x5c   : > { %1634 = vmatpush3.bf16.msra.mxu1 %v1532_v40  ;;  %1533 = vmatpush3.bf16.msra.mxu0 %v1532_v40  ;;  %v1538_v47 = vpack.c.bf16 %v576_v45, %v575_v44  ;;  %v560_v49 = vld [vmem:[%s1992_s7 + $0x28] sm:$0xff]  ;;  %v578_v51 = vld [vmem:[%s1992_s7 + $0xb8] sm:$0xff]  ;;  %v561_v54 = vld [vmem:[%s1992_s7 + $0x30] sm:$0xff] }
  0x5d   : > { %1627 = vmatprep.subr.bf16.mxu1 %v1534_v41  ;;  %1535 = vmatprep.subr.bf16.mxu0 %v1534_v41  ;;  %v1540_v52 = vpack.c.bf16 %v560_v49, %v559_v48  ;;  %v1542_v53 = vpack.c.bf16 %v578_v51, %v577_v50  ;;  %v562_v55 = vld [vmem:[%s1992_s7 + $0x38] sm:$0xff]  ;;  %v579_v56 = vld [vmem:[%s1992_s7 + $0xc0] sm:$0xff]  ;;  %v580_v57 = vld [vmem:[%s1992_s7 + $0xc8] sm:$0xff] }
  0x5e   : > { %v508_v58 = vld [vmem:[%s1994_s8 + $0x188] sm:$0xff]  ;;  %v1544_v59 = vpack.c.bf16 %v562_v55, %v561_v54  ;;  %v1546_v61 = vpack.c.bf16 %v580_v57, %v579_v56  ;;  %v563_v62 = vld [vmem:[%s1992_s7 + $0x40] sm:$0xff]  ;;  %v581_v0 = vld [vmem:[%s1992_s7 + $0xd0] sm:$0xff] }
  0x5f   : > { %755 = vmatprep.mubr.f32.mxu1 %v508_v58  ;;  %v460_v60 = vld [vmem:[%s1994_s8 + $0x8] sm:$0xff]  ;;  %v582_v1 = vld [vmem:[%s1992_s7 + $0xd8] sm:$0xff]  ;;  %v565_v4 = vld [vmem:[%s1992_s7 + $0x50] sm:$0xff] }
  0x60   : > { %1635 = vmatpush3.bf16.msra.mxu1 %v1536_v46  ;;  %1537 = vmatpush3.bf16.msra.mxu0 %v1536_v46  ;;  %v564_v63 = vld [vmem:[%s1992_s7 + $0x48] sm:$0xff]  ;;  %v1550_v3 = vpack.c.bf16 %v582_v1, %v581_v0  ;;  %v566_v5 = vld [vmem:[%s1992_s7 + $0x58] sm:$0xff]  ;;  %v583_v6 = vld [vmem:[%s1992_s7 + $0xe0] sm:$0xff] }
  0x61   : > { %1628 = vmatprep.subr.bf16.mxu1 %v1538_v47  ;;  %1539 = vmatprep.subr.bf16.mxu0 %v1538_v47  ;;  %v1548_v2 = vpack.c.bf16 %v564_v63, %v563_v62  ;;  %v584_v7 = vld [vmem:[%s1992_s7 + $0xe8] sm:$0xff]  ;;  %v1552_v8 = vpack.c.bf16 %v566_v5, %v565_v4  ;;  %v567_v10 = vld [vmem:[%s1992_s7 + $0x60] sm:$0xff]  ;;  %v585_v12 = vld [vmem:[%s1992_s7 + $0xf0] sm:$0xff] }
  0x62   : > { %715 = vmatprep.mubr.f32.mxu0 %v460_v60  ;;  %v1554_v9 = vpack.c.bf16 %v584_v7, %v583_v6  ;;  %v568_v11 = vld [vmem:[%s1992_s7 + $0x68] sm:$0xff]  ;;  %v586_v13 = vld [vmem:[%s1992_s7 + $0xf8] sm:$0xff]  ;;  %v569_v16 = vld [vmem:[%s1992_s7 + $0x70] sm:$0xff] }
  0x63   : > { %v1556_v14 = vpack.c.bf16 %v568_v11, %v567_v10  ;;  %v1558_v15 = vpack.c.bf16 %v586_v13, %v585_v12  ;;  %v570_v17 = vld [vmem:[%s1992_s7 + $0x78] sm:$0xff]  ;;  %v603_v18 = vld [vmem:[%s1992_s7 + $0x180] sm:$0xff]  ;;  %v604_v19 = vld [vmem:[%s1992_s7 + $0x188] sm:$0xff] }
  0x64   : > { %1636 = vmatpush3.bf16.msra.mxu1 %v1540_v52  ;;  %1541 = vmatpush3.bf16.msra.mxu0 %v1540_v52  ;;  %v635_v20 = vld [vmem:[%s1992_s7 + $0x280] sm:$0xff]  ;;  %v636_v21 = vld [vmem:[%s1992_s7 + $0x288] sm:$0xff]  ;;  %v1560_v22 = vpack.c.bf16 %v570_v17, %v569_v16  ;;  %v1562_v23 = vpack.c.bf16 %v604_v19, %v603_v18  ;;  %v605_v29 = vld [vmem:[%s1992_s7 + $0x190] sm:$0xff] }
  0x65   : > { %1629 = vmatprep.subr.bf16.mxu1 %v1542_v53  ;;  %1543 = vmatprep.subr.bf16.mxu0 %v1542_v53  ;;  %v587_v24 = vld [vmem:[%s1992_s7 + $0x100] sm:$0xff]  ;;  %v588_v25 = vld [vmem:[%s1992_s7 + $0x108] sm:$0xff]  ;;  %v1594_v26 = vpack.c.bf16 %v636_v21, %v635_v20  ;;  %v606_v30 = vld [vmem:[%s1992_s7 + $0x198] sm:$0xff] }
  0x66   : > { %v619_v27 = vld [vmem:[%s1992_s7 + $0x200] sm:$0xff]  ;;  %v620_v28 = vld [vmem:[%s1992_s7 + $0x208] sm:$0xff]  ;;  %v637_v31 = vld [vmem:[%s1992_s7 + $0x290] sm:$0xff]  ;;  %v1564_v34 = vpack.c.bf16 %v588_v25, %v587_v24  ;;  %v1566_v38 = vpack.c.bf16 %v606_v30, %v605_v29 }
  0x67   : > { %v638_v32 = vld [vmem:[%s1992_s7 + $0x298] sm:$0xff]  ;;  %v507_v33 = vld [vmem:[%s1994_s8 + $0x180] sm:$0xff]  ;;  %v1596_v37 = vpack.c.bf16 %v620_v28, %v619_v27  ;;  %v589_v39 = vld [vmem:[%s1992_s7 + $0x110] sm:$0xff] }
  0x68   : > { %1637 = vmatpush3.bf16.msra.mxu1 %v1544_v59  ;;  %1545 = vmatpush3.bf16.msra.mxu0 %v1544_v59  ;;  %v459_v35 = vld [vmem:[%s1994_s8] sm:$0xff]  ;;  %v514_v36 = vld [vmem:[%s1994_s8 + $0x1b8] sm:$0xff]  ;;  %v621_v41 = vld [vmem:[%s1992_s7 + $0x210] sm:$0xff]  ;;  %v1598_v42 = vpack.c.bf16 %v638_v32, %v637_v31 }
  0x69   : > { %1630 = vmatprep.subr.bf16.mxu1 %v1546_v61  ;;  %1547 = vmatprep.subr.bf16.mxu0 %v1546_v61  ;;  %v590_v40 = vld [vmem:[%s1992_s7 + $0x118] sm:$0xff]  ;;  %v607_v44 = vld [vmem:[%s1992_s7 + $0x1a0] sm:$0xff]  ;;  %v608_v45 = vld [vmem:[%s1992_s7 + $0x1a8] sm:$0xff] }
  0x6a   : > { %v622_v43 = vld [vmem:[%s1992_s7 + $0x218] sm:$0xff]  ;;  %v639_v47 = vld [vmem:[%s1992_s7 + $0x2a0] sm:$0xff]  ;;  %v640_v48 = vld [vmem:[%s1992_s7 + $0x2a8] sm:$0xff]  ;;  %v1568_v50 = vpack.c.bf16 %v590_v40, %v589_v39  ;;  %v1570_v54 = vpack.c.bf16 %v608_v45, %v607_v44 }
  0x6b   : > { %v466_v46 = vld [vmem:[%s1994_s8 + $0x38] sm:$0xff]  ;;  %v513_v49 = vld [vmem:[%s1994_s8 + $0x1b0] sm:$0xff]  ;;  %v520_v52 = vld [vmem:[%s1994_s8 + $0x1e8] sm:$0xff]  ;;  %v1600_v53 = vpack.c.bf16 %v622_v43, %v621_v41  ;;  %v1602_v58 = vpack.c.bf16 %v640_v48, %v639_v47 }
  0x6c   : > { %1638 = vmatpush3.bf16.msra.mxu1 %v1548_v2  ;;  %1549 = vmatpush3.bf16.msra.mxu0 %v1548_v2  ;;  %v465_v51 = vld [vmem:[%s1994_s8 + $0x30] sm:$0xff]  ;;  %v591_v55 = vld [vmem:[%s1992_s7 + $0x120] sm:$0xff]  ;;  %v592_v56 = vld [vmem:[%s1992_s7 + $0x128] sm:$0xff] }
  0x6d   : > { %1631 = vmatprep.subr.bf16.mxu1 %v1550_v3  ;;  %1551 = vmatprep.subr.bf16.mxu0 %v1550_v3  ;;  %v623_v57 = vld [vmem:[%s1992_s7 + $0x220] sm:$0xff]  ;;  %v624_v59 = vld [vmem:[%s1992_s7 + $0x228] sm:$0xff]  ;;  %v609_v60 = vld [vmem:[%s1992_s7 + $0x1b0] sm:$0xff]  ;;  %v1572_v2 = vpack.c.bf16 %v592_v56, %v591_v55 }
  0x6e   : > { %v610_v61 = vld [vmem:[%s1992_s7 + $0x1b8] sm:$0xff]  ;;  %v472_v62 = vld [vmem:[%s1994_s8 + $0x68] sm:$0xff]  ;;  %v641_v63 = vld [vmem:[%s1992_s7 + $0x2b0] sm:$0xff]  ;;  %v1604_v5 = vpack.c.bf16 %v624_v59, %v623_v57 }
  0x6f   : > { %v642_v0 = vld [vmem:[%s1992_s7 + $0x2b8] sm:$0xff]  ;;  %v519_v1 = vld [vmem:[%s1994_s8 + $0x1e0] sm:$0xff]  ;;  %v1574_v6 = vpack.c.bf16 %v610_v61, %v609_v60  ;;  %v593_v7 = vld [vmem:[%s1992_s7 + $0x130] sm:$0xff] }
  0x70   : > { %1639 = vmatpush3.bf16.msra.mxu1 %v1552_v8  ;;  %1553 = vmatpush3.bf16.msra.mxu0 %v1552_v8  ;;  %v471_v3 = vld [vmem:[%s1994_s8 + $0x60] sm:$0xff]  ;;  %v526_v4 = vld [vmem:[%s1994_s8 + $0x218] sm:$0xff]  ;;  %v1606_v10 = vpack.c.bf16 %v642_v0, %v641_v63  ;;  %v612_v13 = vld [vmem:[%s1992_s7 + $0x1c8] sm:$0xff] }
  0x71   : > { %1632 = vmatprep.subr.bf16.mxu1 %v1554_v9  ;;  %1555 = vmatprep.subr.bf16.mxu0 %v1554_v9  ;;  %v594_v8 = vld [vmem:[%s1992_s7 + $0x138] sm:$0xff]  ;;  %v625_v9 = vld [vmem:[%s1992_s7 + $0x230] sm:$0xff]  ;;  %v611_v12 = vld [vmem:[%s1992_s7 + $0x1c0] sm:$0xff] }
  0x72   : > { %v626_v11 = vld [vmem:[%s1992_s7 + $0x238] sm:$0xff]  ;;  %v644_v16 = vld [vmem:[%s1992_s7 + $0x2c8] sm:$0xff]  ;;  %v525_v17 = vld [vmem:[%s1994_s8 + $0x210] sm:$0xff]  ;;  %v1576_v18 = vpack.c.bf16 %v594_v8, %v593_v7 }
  0x73   : > { %v477_v19 = vld [vmem:[%s1994_s8 + $0x90] sm:$0xff]  ;;  %v532_v20 = vld [vmem:[%s1994_s8 + $0x248] sm:$0xff]  ;;  %v1608_v21 = vpack.c.bf16 %v626_v11, %v625_v9  ;;  %v627_v25 = vld [vmem:[%s1992_s7 + $0x240] sm:$0xff] }
  0x74   : > { %1640 = vmatpush3.bf16.msra.mxu1 %v1556_v14  ;;  %1557 = vmatpush3.bf16.msra.mxu0 %v1556_v14  ;;  %v478_v14 = vld [vmem:[%s1994_s8 + $0x98] sm:$0xff]  ;;  %v596_v24 = vld [vmem:[%s1992_s7 + $0x148] sm:$0xff]  ;;  %v613_v28 = vld [vmem:[%s1992_s7 + $0x1d0] sm:$0xff] }
  0x75   : > { %1633 = vmatprep.subr.bf16.mxu1 %v1558_v15  ;;  %1559 = vmatprep.subr.bf16.mxu0 %v1558_v15  ;;  %v643_v15 = vld [vmem:[%s1992_s7 + $0x2c0] sm:$0xff]  ;;  %v628_v27 = vld [vmem:[%s1992_s7 + $0x248] sm:$0xff]  ;;  %v614_v29 = vld [vmem:[%s1992_s7 + $0x1d8] sm:$0xff] }
  0x76   : > { %v484_v30 = vld [vmem:[%s1994_s8 + $0xc8] sm:$0xff]  ;;  %v645_v31 = vld [vmem:[%s1992_s7 + $0x2d0] sm:$0xff]  ;;  %v646_v32 = vld [vmem:[%s1992_s7 + $0x2d8] sm:$0xff] }
  0x77   : > { %v597_v39 = vld [vmem:[%s1992_s7 + $0x150] sm:$0xff]  ;;  %v598_v40 = vld [vmem:[%s1992_s7 + $0x158] sm:$0xff]  ;;  %v615_v44 = vld [vmem:[%s1992_s7 + $0x1e0] sm:$0xff] }
  0x78   : > { %1641 = vmatpush3.bf16.msra.mxu1 %v1560_v22  ;;  %1561 = vmatpush3.bf16.msra.mxu0 %v1560_v22  ;;  %v1578_v22 = vpack.c.bf16 %v612_v13, %v611_v12  ;;  %v629_v41 = vld [vmem:[%s1992_s7 + $0x250] sm:$0xff]  ;;  %v630_v43 = vld [vmem:[%s1992_s7 + $0x258] sm:$0xff]  ;;  %v616_v45 = vld [vmem:[%s1992_s7 + $0x1e8] sm:$0xff] }
  0x79   : > { %1563 = vmatprep.subr.bf16.mxu1 %v1562_v23  ;;  %1595 = vmatprep.subr.bf16.mxu0 %v1594_v26  ;;  %v595_v23 = vld [vmem:[%s1992_s7 + $0x140] sm:$0xff]  ;;  %v1610_v26 = vpack.c.bf16 %v644_v16, %v643_v15  ;;  %v648_v48 = vld [vmem:[%s1992_s7 + $0x2e8] sm:$0xff]  ;;  %v617_v60 = vld [vmem:[%s1992_s7 + $0x1f0] sm:$0xff] }
  0x7a   : > { %v647_v47 = vld [vmem:[%s1992_s7 + $0x2e0] sm:$0xff]  ;;  %v600_v56 = vld [vmem:[%s1992_s7 + $0x168] sm:$0xff]  ;;  %v618_v61 = vld [vmem:[%s1992_s7 + $0x1f8] sm:$0xff] }
  0x7b   : > { %756 = vmatmul.mubr.f32.vlgmr.msra.gmra.mrb[0].mxu1 %v507_v33  ;;  %716 = vmatmul.mubr.f32.vlgmr.msra.gmra.mrb[0].mxu0 %v459_v35  ;;  %v531_v33 = vld [vmem:[%s1994_s8 + $0x240] sm:$0xff]  ;;  %v632_v59 = vld [vmem:[%s1992_s7 + $0x268] sm:$0xff]  ;;  %v649_v63 = vld [vmem:[%s1992_s7 + $0x2f0] sm:$0xff] }
  0x7c   : > { %1565 = vmatpush3.bf16.msra.mxu1 %v1564_v34  ;;  %760 = vmatprep.mubr.f32.mxu1 %v514_v36  ;;  %v1580_v34 = vpack.c.bf16 %v596_v24, %v595_v23  ;;  %v483_v35 = vld [vmem:[%s1994_s8 + $0xc0] sm:$0xff]  ;;  %v538_v36 = vld [vmem:[%s1994_s8 + $0x278] sm:$0xff]  ;;  %v601_v7 = vld [vmem:[%s1992_s7 + $0x170] sm:$0xff] }
  0x7d   : > { %1597 = vmatpush3.bf16.msra.mxu0 %v1596_v37  ;;  %1567 = vmatprep.subr.bf16.mxu1 %v1566_v38  ;;  %v1612_v37 = vpack.c.bf16 %v628_v27, %v627_v25  ;;  %v1582_v38 = vpack.c.bf16 %v614_v29, %v613_v28  ;;  %v599_v55 = vld [vmem:[%s1992_s7 + $0x160] sm:$0xff]  ;;  %v650_v0 = vld [vmem:[%s1992_s7 + $0x2f8] sm:$0xff]  ;;  %v549_v13 = vld [vmem:[%s1994_s8 + $0x2d0] sm:$0xff] }
  0x7e   : > { %720 = vmatprep.mubr.f32.mxu0 %v466_v46  ;;  %1599 = vmatprep.subr.bf16.mxu0 %v1598_v42  ;;  %v1614_v42 = vpack.c.bf16 %v646_v32, %v645_v31  ;;  %v490_v46 = vld [vmem:[%s1994_s8 + $0xf8] sm:$0xff]  ;;  %v631_v57 = vld [vmem:[%s1992_s7 + $0x260] sm:$0xff]  ;;  %v1622_v9 = vpack.c.bf16 %v650_v0, %v649_v63  ;;  %v501_v15 = vld [vmem:[%s1994_s8 + $0x150] sm:$0xff] }
  0x7f   : > { %761 = vmatmul.mubr.f32.gmra.mrb[2].mxu1 %v513_v49  ;;  %721 = vmatmul.mubr.f32.gmra.mrb[2].mxu0 %v465_v51  ;;  %v537_v49 = vld [vmem:[%s1994_s8 + $0x270] sm:$0xff]  ;;  %v602_v8 = vld [vmem:[%s1992_s7 + $0x178] sm:$0xff]  ;;  %v467_v23 = vld [vmem:[%s1994_s8 + $0x40] sm:$0xff] }
  0x80   : > { %1569 = vmatpush3.bf16.msra.mxu1 %v1568_v50  ;;  %765 = vmatprep.mubr.f32.mxu1 %v520_v52  ;;  %v1584_v50 = vpack.c.bf16 %v598_v40, %v597_v39  ;;  %v489_v51 = vld [vmem:[%s1994_s8 + $0xf0] sm:$0xff]  ;;  %v544_v52 = vld [vmem:[%s1994_s8 + $0x2a8] sm:$0xff]  ;;  %v634_v11 = vld [vmem:[%s1992_s7 + $0x278] sm:$0xff] }
  0x81   : > { %1601 = vmatpush3.bf16.msra.mxu0 %v1600_v53  ;;  %1571 = vmatprep.subr.bf16.mxu1 %v1570_v54  ;;  %v1616_v53 = vpack.c.bf16 %v630_v43, %v629_v41  ;;  %v1586_v54 = vpack.c.bf16 %v616_v45, %v615_v44  ;;  %v502_v12 = vld [vmem:[%s1994_s8 + $0x158] sm:$0xff]  ;;  %v469_v24 = vld [vmem:[%s1994_s8 + $0x50] sm:$0xff]  ;;  %v475_v28 = vld [vmem:[%s1994_s8 + $0x80] sm:$0xff] }
  0x82   : > { %725 = vmatprep.mubr.f32.mxu0 %v472_v62  ;;  %1603 = vmatprep.subr.bf16.mxu0 %v1602_v58  ;;  %v1618_v58 = vpack.c.bf16 %v648_v48, %v647_v47  ;;  %v496_v62 = vld [vmem:[%s1994_s8 + $0x128] sm:$0xff]  ;;  %v462_v16 = vld [vmem:[%s1994_s8 + $0x18] sm:$0xff]  ;;  %v473_v27 = vld [vmem:[%s1994_s8 + $0x70] sm:$0xff] }
  0x83   : > { %766 = vmatmul.mubr.f32.gmra.mrb[4].mxu1 %v519_v1  ;;  %726 = vmatmul.mubr.f32.gmra.mrb[4].mxu0 %v471_v3  ;;  %v543_v1 = vld [vmem:[%s1994_s8 + $0x2a0] sm:$0xff]  ;;  %v474_v25 = vld [vmem:[%s1994_s8 + $0x78] sm:$0xff]  ;;  %v480_v29 = vld [vmem:[%s1994_s8 + $0xa8] sm:$0xff] }
  0x84   : > { %1573 = vmatpush3.bf16.msra.mxu1 %v1572_v2  ;;  %770 = vmatprep.mubr.f32.mxu1 %v526_v4  ;;  %v1588_v2 = vpack.c.bf16 %v600_v56, %v599_v55  ;;  %v495_v3 = vld [vmem:[%s1994_s8 + $0x120] sm:$0xff]  ;;  %v550_v4 = vld [vmem:[%s1994_s8 + $0x2d8] sm:$0xff]  ;;  %v481_v32 = vld [vmem:[%s1994_s8 + $0xb0] sm:$0xff] }
  0x85   : > { %1605 = vmatpush3.bf16.msra.mxu0 %v1604_v5  ;;  %1575 = vmatprep.subr.bf16.mxu1 %v1574_v6  ;;  %v1620_v5 = vpack.c.bf16 %v632_v59, %v631_v57  ;;  %v1590_v6 = vpack.c.bf16 %v618_v61, %v617_v60  ;;  %v479_v31 = vld [vmem:[%s1994_s8 + $0xa0] sm:$0xff]  ;;  %v493_v40 = vld [vmem:[%s1994_s8 + $0x110] sm:$0xff]  ;;  %v498_v41 = vld [vmem:[%s1994_s8 + $0x138] sm:$0xff] }
  0x86   : > { %730 = vmatprep.mubr.f32.mxu0 %v478_v14  ;;  %1607 = vmatprep.subr.bf16.mxu0 %v1606_v10  ;;  %v633_v10 = vld [vmem:[%s1992_s7 + $0x270] sm:$0xff]  ;;  %v1592_v14 = vpack.c.bf16 %v602_v8, %v601_v7  ;;  %v491_v39 = vld [vmem:[%s1994_s8 + $0x100] sm:$0xff]  ;;  %v504_v45 = vld [vmem:[%s1994_s8 + $0x168] sm:$0xff] }
  0x87   : > { %771 = vmatmul.mubr.f32.gmra.mrb[6].mxu1 %v525_v17  ;;  %731 = vmatmul.mubr.f32.gmra.mrb[6].mxu0 %v477_v19  ;;  %v1624_v17 = vpack.c.bf16 %v634_v11, %v633_v10  ;;  %v461_v19 = vld [vmem:[%s1994_s8 + $0x10] sm:$0xff]  ;;  %v499_v44 = vld [vmem:[%s1994_s8 + $0x140] sm:$0xff]  ;;  %v522_v57 = vld [vmem:[%s1994_s8 + $0x1f8] sm:$0xff] }
  0x88   : > { %1577 = vmatpush3.bf16.msra.mxu1 %v1576_v18  ;;  %775 = vmatprep.mubr.f32.mxu1 %v532_v20  ;;  %v464_v18 = vld [vmem:[%s1994_s8 + $0x28] sm:$0xff]  ;;  %v463_v20 = vld [vmem:[%s1994_s8 + $0x20] sm:$0xff]  ;;  %v497_v43 = vld [vmem:[%s1994_s8 + $0x130] sm:$0xff] }
  0x89   : > { %1609 = vmatpush3.bf16.msra.mxu0 %v1608_v21  ;;  %1579 = vmatprep.subr.bf16.mxu1 %v1578_v22  ;;  %v468_v21 = vld [vmem:[%s1994_s8 + $0x48] sm:$0xff]  ;;  %v470_v22 = vld [vmem:[%s1994_s8 + $0x58] sm:$0xff]  ;;  %v503_v47 = vld [vmem:[%s1994_s8 + $0x160] sm:$0xff] }
  0x8a   : > { %735 = vmatprep.mubr.f32.mxu0 %v484_v30  ;;  %1611 = vmatprep.subr.bf16.mxu0 %v1610_v26  ;;  %v476_v26 = vld [vmem:[%s1994_s8 + $0x88] sm:$0xff]  ;;  %v482_v30 = vld [vmem:[%s1994_s8 + $0xb8] sm:$0xff]  ;;  %v505_v48 = vld [vmem:[%s1994_s8 + $0x170] sm:$0xff] }
  0x8b   : > { %776 = vmatmul.mubr.f32.gmra.mrb[8].mxu1 %v531_v33  ;;  %736 = vmatmul.mubr.f32.gmra.mrb[8].mxu0 %v483_v35  ;;  %v486_v33 = vld [vmem:[%s1994_s8 + $0xd8] sm:$0xff]  ;;  %v485_v35 = vld [vmem:[%s1994_s8 + $0xd0] sm:$0xff]  ;;  %v515_v55 = vld [vmem:[%s1994_s8 + $0x1c0] sm:$0xff] }
  0x8c   : > { %1581 = vmatpush3.bf16.msra.mxu1 %v1580_v34  ;;  %780 = vmatprep.mubr.f32.mxu1 %v538_v36  ;;  %v488_v34 = vld [vmem:[%s1994_s8 + $0xe8] sm:$0xff]  ;;  %v487_v36 = vld [vmem:[%s1994_s8 + $0xe0] sm:$0xff]  ;;  %v517_v56 = vld [vmem:[%s1994_s8 + $0x1d0] sm:$0xff] }
  0x8d   : > { %1613 = vmatpush3.bf16.msra.mxu0 %v1612_v37  ;;  %1583 = vmatprep.subr.bf16.mxu1 %v1582_v38  ;;  %v492_v37 = vld [vmem:[%s1994_s8 + $0x108] sm:$0xff]  ;;  %v494_v38 = vld [vmem:[%s1994_s8 + $0x118] sm:$0xff]  ;;  %v521_v59 = vld [vmem:[%s1994_s8 + $0x1f0] sm:$0xff] }
  0x8e   : > { %740 = vmatprep.mubr.f32.mxu0 %v490_v46  ;;  %1615 = vmatprep.subr.bf16.mxu0 %v1614_v42  ;;  %v500_v42 = vld [vmem:[%s1994_s8 + $0x148] sm:$0xff]  ;;  %v506_v46 = vld [vmem:[%s1994_s8 + $0x178] sm:$0xff]  ;;  %v523_v60 = vld [vmem:[%s1994_s8 + $0x200] sm:$0xff] }
  0x8f   : > { %781 = vmatmul.mubr.f32.gmra.mrb[10].mxu1 %v537_v49  ;;  %741 = vmatmul.mubr.f32.gmra.mrb[10].mxu0 %v489_v51  ;;  %v510_v49 = vld [vmem:[%s1994_s8 + $0x198] sm:$0xff]  ;;  %v509_v51 = vld [vmem:[%s1994_s8 + $0x190] sm:$0xff]  ;;  %v528_v61 = vld [vmem:[%s1994_s8 + $0x228] sm:$0xff] }
  0x90   : > { %1585 = vmatpush3.bf16.msra.mxu1 %v1584_v50  ;;  %785 = vmatprep.mubr.f32.mxu1 %v544_v52  ;;  %v512_v50 = vld [vmem:[%s1994_s8 + $0x1a8] sm:$0xff]  ;;  %v511_v52 = vld [vmem:[%s1994_s8 + $0x1a0] sm:$0xff]  ;;  %v529_v0 = vld [vmem:[%s1994_s8 + $0x230] sm:$0xff] }
  0x91   : > { %1617 = vmatpush3.bf16.msra.mxu0 %v1616_v53  ;;  %1587 = vmatprep.subr.bf16.mxu1 %v1586_v54  ;;  %v516_v53 = vld [vmem:[%s1994_s8 + $0x1c8] sm:$0xff]  ;;  %v518_v54 = vld [vmem:[%s1994_s8 + $0x1d8] sm:$0xff]  ;;  %v527_v63 = vld [vmem:[%s1994_s8 + $0x220] sm:$0xff] }
  0x92   : > { %745 = vmatprep.mubr.f32.mxu0 %v496_v62  ;;  %1619 = vmatprep.subr.bf16.mxu0 %v1618_v58  ;;  %v524_v58 = vld [vmem:[%s1994_s8 + $0x208] sm:$0xff]  ;;  %v530_v62 = vld [vmem:[%s1994_s8 + $0x238] sm:$0xff]  ;;  %v539_v7 = vld [vmem:[%s1994_s8 + $0x280] sm:$0xff] }
  0x93   : > { %786 = vmatmul.mubr.f32.gmra.mrb[12].mxu1 %v543_v1  ;;  %746 = vmatmul.mubr.f32.gmra.mrb[12].mxu0 %v495_v3  ;;  %v534_v1 = vld [vmem:[%s1994_s8 + $0x258] sm:$0xff]  ;;  %v533_v3 = vld [vmem:[%s1994_s8 + $0x250] sm:$0xff]  ;;  %v548_v10 = vld [vmem:[%s1994_s8 + $0x2c8] sm:$0xff] }
  0x94   : > { %1589 = vmatpush3.bf16.msra.mxu1 %v1588_v2  ;;  %790 = vmatprep.mubr.f32.mxu1 %v550_v4  ;;  %v536_v2 = vld [vmem:[%s1994_s8 + $0x268] sm:$0xff]  ;;  %v535_v4 = vld [vmem:[%s1994_s8 + $0x260] sm:$0xff]  ;;  %v541_v8 = vld [vmem:[%s1994_s8 + $0x290] sm:$0xff] }
  0x95   : > { %1621 = vmatpush3.bf16.msra.mxu0 %v1620_v5  ;;  %1591 = vmatprep.subr.bf16.mxu1 %v1590_v6  ;;  %v540_v5 = vld [vmem:[%s1994_s8 + $0x288] sm:$0xff]  ;;  %v542_v6 = vld [vmem:[%s1994_s8 + $0x298] sm:$0xff]  ;;  %v545_v11 = vld [vmem:[%s1994_s8 + $0x2b0] sm:$0xff] }
  0x96   : > { %750 = vmatprep.mubr.f32.mxu0 %v502_v12  ;;  %1623 = vmatprep.subr.bf16.mxu0 %v1622_v9  ;;  %v546_v9 = vld [vmem:[%s1994_s8 + $0x2b8] sm:$0xff]  ;;  %v547_v12 = vld [vmem:[%s1994_s8 + $0x2c0] sm:$0xff] }
  0x97   : > { %791 = vmatmul.mubr.f32.gmra.mrb[14].mxu1 %v549_v13  ;;  %751 = vmatmul.mubr.f32.gmra.mrb[14].mxu0 %v501_v15  ;;  %v552_v13 = vld [vmem:[%s1994_s8 + $0x2e8] sm:$0xff]  ;;  %v551_v15 = vld [vmem:[%s1994_s8 + $0x2e0] sm:$0xff] }
  0x98   : > { %1593 = vmatpush3.bf16.msra.mxu1 %v1592_v14  ;;  %860 = vmatprep.mubr.f32.mxu1 %v462_v16  ;;  %v554_v14 = vld [vmem:[%s1994_s8 + $0x2f8] sm:$0xff]  ;;  %v553_v16 = vld [vmem:[%s1994_s8 + $0x2f0] sm:$0xff] }
  0x99   : > { %1625 = vmatpush3.bf16.msra.mxu0 %v1624_v17  ;;  %1005 = vmatprep.mubr.f32.mxu0 %v464_v18 }
  0x9b   : > { %861 = vmatmul.mubr.f32.vlgmr.msra.gmra.mrb[16].mxu1 %v461_v19 }
  0x9c   : > { %1006 = vmatmul.mubr.f32.vlgmr.msra.gmra.mrb[16].mxu0 %v463_v20  ;;  %865 = vmatprep.mubr.f32.mxu1 %v468_v21 }
  0x9d   : > { %1010 = vmatprep.mubr.f32.mxu0 %v470_v22 }
  0x9f   : > { %866 = vmatmul.mubr.f32.gmra.mrb[18].mxu1 %v467_v23 }
  0xa0   : > { %1011 = vmatmul.mubr.f32.gmra.mrb[18].mxu0 %v469_v24  ;;  %870 = vmatprep.mubr.f32.mxu1 %v474_v25 }
  0xa1   : > { %1015 = vmatprep.mubr.f32.mxu0 %v476_v26 }
  0xa3   : > { %871 = vmatmul.mubr.f32.gmra.mrb[20].mxu1 %v473_v27 }
  0xa4   : > { %1016 = vmatmul.mubr.f32.gmra.mrb[20].mxu0 %v475_v28  ;;  %875 = vmatprep.mubr.f32.mxu1 %v480_v29 }
  0xa5   : > { %1020 = vmatprep.mubr.f32.mxu0 %v482_v30 }
  0xa7   : > { %876 = vmatmul.mubr.f32.gmra.mrb[22].mxu1 %v479_v31 }
  0xa8   : > { %1021 = vmatmul.mubr.f32.gmra.mrb[22].mxu0 %v481_v32  ;;  %880 = vmatprep.mubr.f32.mxu1 %v486_v33 }
  0xa9   : > { %1025 = vmatprep.mubr.f32.mxu0 %v488_v34 }
  0xab   : > { %881 = vmatmul.mubr.f32.gmra.mrb[24].mxu1 %v485_v35 }
  0xac   : > { %1026 = vmatmul.mubr.f32.gmra.mrb[24].mxu0 %v487_v36  ;;  %885 = vmatprep.mubr.f32.mxu1 %v492_v37 }
  0xad   : > { %1030 = vmatprep.mubr.f32.mxu0 %v494_v38 }
  0xaf   : > { %886 = vmatmul.mubr.f32.gmra.mrb[26].mxu1 %v491_v39 }
  0xb0   : > { %1031 = vmatmul.mubr.f32.gmra.mrb[26].mxu0 %v493_v40  ;;  %890 = vmatprep.mubr.f32.mxu1 %v498_v41 }
  0xb1   : > { %1035 = vmatprep.mubr.f32.mxu0 %v500_v42 }
  0xb3   : > { %891 = vmatmul.mubr.f32.gmra.mrb[28].mxu1 %v497_v43 }
  0xb4   : > { %1036 = vmatmul.mubr.f32.gmra.mrb[28].mxu0 %v499_v44  ;;  %895 = vmatprep.mubr.f32.mxu1 %v504_v45 }
  0xb5   : > { %1040 = vmatprep.mubr.f32.mxu0 %v506_v46 }
  0xb7   : > { %896 = vmatmul.mubr.f32.gmra.mrb[30].mxu1 %v503_v47 }
  0xb8   : > { %1041 = vmatmul.mubr.f32.gmra.mrb[30].mxu0 %v505_v48  ;;  %900 = vmatprep.mubr.f32.mxu1 %v510_v49 }
  0xb9   : > { %1045 = vmatprep.mubr.f32.mxu0 %v512_v50 }
  0xbb   : > { %901 = vmatmul.mubr.f32.gmra.mrb[32].mxu1 %v509_v51 }
  0xbc   : > { %1046 = vmatmul.mubr.f32.gmra.mrb[32].mxu0 %v511_v52  ;;  %905 = vmatprep.mubr.f32.mxu1 %v516_v53 }
  0xbd   : > { %1050 = vmatprep.mubr.f32.mxu0 %v518_v54 }
  0xbf   : > { %906 = vmatmul.mubr.f32.gmra.mrb[34].mxu1 %v515_v55 }
  0xc0   : > { %1051 = vmatmul.mubr.f32.gmra.mrb[34].mxu0 %v517_v56  ;;  %910 = vmatprep.mubr.f32.mxu1 %v522_v57 }
  0xc1   : > { %1055 = vmatprep.mubr.f32.mxu0 %v524_v58 }
  0xc3   : > { %911 = vmatmul.mubr.f32.gmra.mrb[36].mxu1 %v521_v59 }
  0xc4   : > { %1056 = vmatmul.mubr.f32.gmra.mrb[36].mxu0 %v523_v60  ;;  %915 = vmatprep.mubr.f32.mxu1 %v528_v61 }
  0xc5   : > { %1060 = vmatprep.mubr.f32.mxu0 %v530_v62 }
  0xc7   : > { %916 = vmatmul.mubr.f32.gmra.mrb[38].mxu1 %v527_v63 }
  0xc8   : > { %1061 = vmatmul.mubr.f32.gmra.mrb[38].mxu0 %v529_v0  ;;  %920 = vmatprep.mubr.f32.mxu1 %v534_v1 }
  0xc9   : > { %1065 = vmatprep.mubr.f32.mxu0 %v536_v2 }
  0xcb   : > { %921 = vmatmul.mubr.f32.gmra.mrb[40].mxu1 %v533_v3 }
  0xcc   : > { %1066 = vmatmul.mubr.f32.gmra.mrb[40].mxu0 %v535_v4  ;;  %925 = vmatprep.mubr.f32.mxu1 %v540_v5 }
  0xcd   : > { %1070 = vmatprep.mubr.f32.mxu0 %v542_v6 }
  0xcf   : > { %926 = vmatmul.mubr.f32.gmra.mrb[42].mxu1 %v539_v7 }
  0xd0   : > { %1071 = vmatmul.mubr.f32.gmra.mrb[42].mxu0 %v541_v8  ;;  %930 = vmatprep.mubr.f32.mxu1 %v546_v9  ;;  %v443_v9 = vld [vmem:[#allocation2] sm:$0xff] }
  0xd1   : > { %1075 = vmatprep.mubr.f32.mxu0 %v548_v10 }
  0xd3   : > { %931 = vmatmul.mubr.f32.gmra.mrb[44].mxu1 %v545_v11 }
  0xd4   : > { %1076 = vmatmul.mubr.f32.gmra.mrb[44].mxu0 %v547_v12  ;;  %935 = vmatprep.mubr.f32.mxu1 %v552_v13 }
  0xd5   : > { %1080 = vmatprep.mubr.f32.mxu0 %v554_v14 }
  0xd7   : > { %936 = vmatmul.mubr.f32.gmra.mrb[46].mxu1 %v551_v15 }
  0xd8   : > { %1081 = vmatmul.mubr.f32.gmra.mrb[46].mxu0 %v553_v16 }
 0x14e   : > { %v1346_v17 = vpop.f32.mrb[0].mxu1  ;;  %v1322_v18 = vpop.f32.mrb[0].mxu0 }
 0x14f   : > { %v1347_v19 = vpop.f32.mrb[1].mxu1  ;;  %v1323_v20 = vpop.f32.mrb[1].mxu0 }
 0x150   : > { %v2189_v21 = vadd.f32 %v1347_v19, %v1346_v17  ;;  %v1324_v22 = vadd.f32 %v1323_v20, %v1322_v18  ;;  %v444_v19 = vld [vmem:[#allocation2 + $0x8] sm:$0xff] }
 0x152   : > { %v1349_v23 = vpop.f32.mrb[2].mxu1  ;;  %v1325_v24 = vpop.f32.mrb[2].mxu0 }
 0x153   : > { %v1350_v25 = vpop.f32.mrb[3].mxu1  ;;  %v1326_v26 = vpop.f32.mrb[3].mxu0 }
 0x154   : > { %v2191_v27 = vadd.f32 %v1350_v25, %v1349_v23  ;;  %v1327_v28 = vadd.f32 %v1326_v26, %v1325_v24 }
 0x156   : > { %v1352_v29 = vpop.f32.mrb[4].mxu1  ;;  %v1328_v30 = vpop.f32.mrb[4].mxu0 }
 0x157   : > { %v1353_v31 = vpop.f32.mrb[5].mxu1  ;;  %v1329_v32 = vpop.f32.mrb[5].mxu0 }
 0x158   : > { %v2193_v33 = vadd.f32 %v1353_v31, %v1352_v29  ;;  %v1330_v34 = vadd.f32 %v1329_v32, %v1328_v30  ;;  %v445_v32 = vld [vmem:[#allocation2 + $0x10] sm:$0xff] }
 0x15a   : > { %v1355_v35 = vpop.f32.mrb[6].mxu1  ;;  %v1331_v36 = vpop.f32.mrb[6].mxu0 }
 0x15b   : > { %v1356_v37 = vpop.f32.mrb[7].mxu1  ;;  %v1332_v38 = vpop.f32.mrb[7].mxu0 }
 0x15c   : > { %v2195_v39 = vadd.f32 %v1356_v37, %v1355_v35  ;;  %v2197_v40 = vadd.f32 %v1332_v38, %v1331_v36 }
 0x15e   : > { %v1358_v41 = vpop.f32.mrb[8].mxu1  ;;  %v1334_v42 = vpop.f32.mrb[8].mxu0 }
 0x15f   : > { %v1359_v43 = vpop.f32.mrb[9].mxu1  ;;  %v1335_v44 = vpop.f32.mrb[9].mxu0 }
 0x160   : > { %v2199_v45 = vadd.f32 %v1359_v43, %v1358_v41  ;;  %v2201_v46 = vadd.f32 %v1335_v44, %v1334_v42 }
 0x162   : > { %v1361_v47 = vpop.f32.mrb[10].mxu1  ;;  %v1337_v48 = vpop.f32.mrb[10].mxu0 }
 0x163   : > { %v1362_v49 = vpop.f32.mrb[11].mxu1  ;;  %v1338_v50 = vpop.f32.mrb[11].mxu0 }
 0x164   : > { %v2203_v51 = vadd.f32 %v1362_v49, %v1361_v47  ;;  %v2205_v52 = vadd.f32 %v1338_v50, %v1337_v48  ;;  %v446_v47 = vld [vmem:[#allocation2 + $0x18] sm:$0xff] }
 0x166   : > { %v1364_v53 = vpop.f32.mrb[12].mxu1  ;;  %v1340_v54 = vpop.f32.mrb[12].mxu0 }
 0x167   : > { %v1365_v55 = vpop.f32.mrb[13].mxu1  ;;  %v1341_v56 = vpop.f32.mrb[13].mxu0 }
 0x168   : > { %v2207_v57 = vadd.f32 %v1365_v55, %v1364_v53  ;;  %v2209_v58 = vadd.f32 %v1341_v56, %v1340_v54 }
 0x16a   : > { %v1367_v59 = vpop.f32.mrb[14].mxu1  ;;  %v1343_v60 = vpop.f32.mrb[14].mxu0 }
 0x16b   : > { %v1368_v61 = vpop.f32.mrb[15].mxu1  ;;  %v1344_v62 = vpop.f32.mrb[15].mxu0 }
 0x16c   : > { %v2211_v63 = vadd.f32 %v1368_v61, %v1367_v59  ;;  %v2213_v0 = vadd.f32 %v1344_v62, %v1343_v60  ;;  %v447_v60 = vld [vmem:[#allocation2 + $0x20] sm:$0xff] }
 0x16e   : > { %v1402_v1 = vpop.f32.mrb[16].mxu1 }
 0x16f   : > { %v1403_v2 = vpop.f32.mrb[17].mxu1  ;;  %v1482_v3 = vpop.f32.mrb[16].mxu0 }
 0x170   : > { %v1404_v4 = vadd.f32 %v1403_v2, %v1402_v1  ;;  %v1483_v5 = vpop.f32.mrb[17].mxu0 }
 0x171   : > { %v1484_v6 = vadd.f32 %v1483_v5, %v1482_v3 }
 0x172   : > { %v863_v7 = vadd.f32 %v1404_v4, %v1324_v22  ;;  %v1405_v8 = vpop.f32.mrb[18].mxu1 }
 0x173   : > { %v1406_v10 = vpop.f32.mrb[19].mxu1  ;;  %v1485_v11 = vpop.f32.mrb[18].mxu0 }
 0x174   : > { %v1008_v12 = vadd.f32 %v1484_v6, %v863_v7  ;;  %v1407_v13 = vadd.f32 %v1406_v10, %v1405_v8  ;;  %v1486_v14 = vpop.f32.mrb[19].mxu0  ;;  %v448_v7 = vld [vmem:[#allocation2 + $0x28] sm:$0xff] }
 0x175   : > { %v1487_v15 = vadd.f32 %v1486_v14, %v1485_v11 }
 0x176   : > { %v1086_v16 = vadd.f32 %v1008_v12, %v443_v9  ;;  %v868_v17 = vadd.f32 %v1407_v13, %v1327_v28  ;;  %v1408_v18 = vpop.f32.mrb[20].mxu1 }
 0x177   : > { %v1409_v20 = vpop.f32.mrb[21].mxu1  ;;  %v1488_v23 = vpop.f32.mrb[20].mxu0 }
 0x178   : > { %1102 = vst [vmem:[#allocation2] sm:$0xff] %v1086_v16  ;;  %v1013_v24 = vadd.f32 %v1487_v15, %v868_v17  ;;  %v1410_v25 = vadd.f32 %v1409_v20, %v1408_v18  ;;  %v1489_v26 = vpop.f32.mrb[21].mxu0  ;;  %v449_v16 = vld [vmem:[#allocation2 + $0x30] sm:$0xff] }
 0x179   : > { %v1490_v29 = vadd.f32 %v1489_v26, %v1488_v23 }
 0x17a   : > { %v1087_v22 = vadd.f32 %v1013_v24, %v444_v19  ;;  %v873_v30 = vadd.f32 %v1410_v25, %v1330_v34  ;;  %v1411_v31 = vpop.f32.mrb[22].mxu1 }
 0x17b   : > { %v1412_v35 = vpop.f32.mrb[23].mxu1  ;;  %v1491_v36 = vpop.f32.mrb[22].mxu0 }
 0x17c   : > { %1103 = vst [vmem:[#allocation2 + $0x8] sm:$0xff] %v1087_v22  ;;  %v1018_v37 = vadd.f32 %v1490_v29, %v873_v30  ;;  %v1413_v38 = vadd.f32 %v1412_v35, %v1411_v31  ;;  %v1492_v41 = vpop.f32.mrb[23].mxu0  ;;  %v450_v29 = vld [vmem:[#allocation2 + $0x38] sm:$0xff] }
 0x17d   : > { %v1493_v28 = vadd.f32 %v1492_v41, %v1491_v36  ;;  %v451_v41 = vld [vmem:[#allocation2 + $0x40] sm:$0xff] }
 0x17e   : > { %v1088_v42 = vadd.f32 %v1018_v37, %v445_v32  ;;  %v878_v43 = vadd.f32 %v1413_v38, %v2197_v40  ;;  %v1414_v44 = vpop.f32.mrb[24].mxu1 }
 0x17f   : > { %v1415_v48 = vpop.f32.mrb[25].mxu1  ;;  %v1494_v49 = vpop.f32.mrb[24].mxu0 }
 0x180   : > { %1104 = vst [vmem:[#allocation2 + $0x10] sm:$0xff] %v1088_v42  ;;  %v1023_v50 = vadd.f32 %v1493_v28, %v878_v43  ;;  %v1416_v53 = vadd.f32 %v1415_v48, %v1414_v44  ;;  %v1495_v34 = vpop.f32.mrb[25].mxu0 }
 0x181   : > { %v1496_v54 = vadd.f32 %v1495_v34, %v1494_v49 }
 0x182   : > { %v1089_v55 = vadd.f32 %v1023_v50, %v446_v47  ;;  %v883_v56 = vadd.f32 %v1416_v53, %v2201_v46  ;;  %v1417_v59 = vpop.f32.mrb[26].mxu1  ;;  %v452_v53 = vld [vmem:[#allocation2 + $0x48] sm:$0xff] }
 0x183   : > { %v1418_v61 = vpop.f32.mrb[27].mxu1  ;;  %v1497_v62 = vpop.f32.mrb[26].mxu0 }
 0x184   : > { %1105 = vst [vmem:[#allocation2 + $0x18] sm:$0xff] %v1089_v55  ;;  %v1028_v1 = vadd.f32 %v1496_v54, %v883_v56  ;;  %v1419_v2 = vadd.f32 %v1418_v61, %v1417_v59  ;;  %v1498_v40 = vpop.f32.mrb[27].mxu0 }
 0x185   : > { %v1499_v3 = vadd.f32 %v1498_v40, %v1497_v62 }
 0x186   : > { %v1090_v4 = vadd.f32 %v1028_v1, %v447_v60  ;;  %v888_v5 = vadd.f32 %v1419_v2, %v2205_v52  ;;  %v1420_v6 = vpop.f32.mrb[28].mxu1  ;;  %v453_v1 = vld [vmem:[#allocation2 + $0x50] sm:$0xff] }
 0x187   : > { %v1421_v8 = vpop.f32.mrb[29].mxu1  ;;  %v1500_v9 = vpop.f32.mrb[28].mxu0 }
 0x188   : > { %1106 = vst [vmem:[#allocation2 + $0x20] sm:$0xff] %v1090_v4  ;;  %v1033_v10 = vadd.f32 %v1499_v3, %v888_v5  ;;  %v1422_v11 = vadd.f32 %v1421_v8, %v1420_v6  ;;  %v1501_v46 = vpop.f32.mrb[29].mxu0 }
 0x189   : > { %v1502_v12 = vadd.f32 %v1501_v46, %v1500_v9  ;;  %v454_v9 = vld [vmem:[#allocation2 + $0x58] sm:$0xff] }
 0x18a   : > { %v1091_v13 = vadd.f32 %v1033_v10, %v448_v7  ;;  %v893_v14 = vadd.f32 %v1422_v11, %v2209_v58  ;;  %v1423_v15 = vpop.f32.mrb[30].mxu1 }
 0x18b   : > { %v1424_v17 = vpop.f32.mrb[31].mxu1  ;;  %v1503_v18 = vpop.f32.mrb[30].mxu0 }
 0x18c   : > { %1107 = vst [vmem:[#allocation2 + $0x28] sm:$0xff] %v1091_v13  ;;  %v1038_v19 = vadd.f32 %v1502_v12, %v893_v14  ;;  %v1425_v20 = vadd.f32 %v1424_v17, %v1423_v15  ;;  %v1504_v52 = vpop.f32.mrb[31].mxu0  ;;  %v455_v17 = vld [vmem:[#allocation2 + $0x60] sm:$0xff] }
 0x18d   : > { %v1505_v23 = vadd.f32 %v1504_v52, %v1503_v18 }
 0x18e   : > { %v1092_v24 = vadd.f32 %v1038_v19, %v449_v16  ;;  %v898_v25 = vadd.f32 %v1425_v20, %v2213_v0  ;;  %v1426_v26 = vpop.f32.mrb[32].mxu1 }
 0x18f   : > { %v1427_v22 = vpop.f32.mrb[33].mxu1  ;;  %v1506_v30 = vpop.f32.mrb[32].mxu0 }
 0x190   : > { %1108 = vst [vmem:[#allocation2 + $0x30] sm:$0xff] %v1092_v24  ;;  %v1043_v31 = vadd.f32 %v1505_v23, %v898_v25  ;;  %v1428_v32 = vadd.f32 %v1427_v22, %v1426_v26  ;;  %v1507_v58 = vpop.f32.mrb[33].mxu0 }
 0x191   : > { %v1508_v35 = vadd.f32 %v1507_v58, %v1506_v30 }
 0x192   : > { %v1093_v36 = vadd.f32 %v1043_v31, %v450_v29  ;;  %v903_v37 = vadd.f32 %v1428_v32, %v2189_v21  ;;  %v1429_v38 = vpop.f32.mrb[34].mxu1  ;;  %v456_v29 = vld [vmem:[#allocation2 + $0x68] sm:$0xff] }
 0x193   : > { %v1430_v28 = vpop.f32.mrb[35].mxu1  ;;  %v1509_v42 = vpop.f32.mrb[34].mxu0 }
 0x194   : > { %1109 = vst [vmem:[#allocation2 + $0x38] sm:$0xff] %v1093_v36  ;;  %v1048_v43 = vadd.f32 %v1508_v35, %v903_v37  ;;  %v1431_v44 = vadd.f32 %v1430_v28, %v1429_v38  ;;  %v1510_v0 = vpop.f32.mrb[35].mxu0  ;;  %v457_v38 = vld [vmem:[#allocation2 + $0x70] sm:$0xff] }
 0x195   : > { %v1511_v47 = vadd.f32 %v1510_v0, %v1509_v42 }
 0x196   : > { %v1094_v48 = vadd.f32 %v1048_v43, %v451_v41  ;;  %v908_v49 = vadd.f32 %v1431_v44, %v2191_v27  ;;  %v1432_v50 = vpop.f32.mrb[36].mxu1 }
 0x197   : > { %v1433_v34 = vpop.f32.mrb[37].mxu1  ;;  %v1512_v54 = vpop.f32.mrb[36].mxu0 }
 0x198   : > { %1110 = vst [vmem:[#allocation2 + $0x40] sm:$0xff] %v1094_v48  ;;  %v1053_v55 = vadd.f32 %v1511_v47, %v908_v49  ;;  %v1434_v56 = vadd.f32 %v1433_v34, %v1432_v50  ;;  %v1513_v21 = vpop.f32.mrb[37].mxu0  ;;  %v458_v48 = vld [vmem:[#allocation2 + $0x78] sm:$0xff]  ;;  %v1123_v34 = vld [vmem:[#allocation2 + $0x8] sm:$0xff] (!%p1283_p11) }
 0x199   : > { %v1514_v59 = vadd.f32 %v1513_v21, %v1512_v54  ;;  %v1125_v21 = vld [vmem:[#allocation2 + $0x18] sm:$0xff] (!%p1283_p11) }
 0x19a   : > { %v1095_v60 = vadd.f32 %v1053_v55, %v452_v53  ;;  %v913_v61 = vadd.f32 %v1434_v56, %v2193_v33  ;;  %v1435_v62 = vpop.f32.mrb[38].mxu1  ;;  %v1284_v53 = vld [vmem:[%s2297_s2] ss:$0 sm:$0xff] (!%p1283_p11)  ;;  %v1124_v56 = vld [vmem:[#allocation2 + $0x10] sm:$0xff] (!%p1283_p11) }
 0x19b   : > { %v1436_v2 = vpop.f32.mrb[39].mxu1  ;;  %v1515_v40 = vpop.f32.mrb[38].mxu0  ;;  %v1146_v55 = vadd.f32 (!%p1283_p11), %v1284_v53, %v1123_v34 }
 0x19c   : > { %1111 = vst [vmem:[#allocation2 + $0x48] sm:$0xff] %v1095_v60  ;;  %v1058_v3 = vadd.f32 %v1514_v59, %v913_v61  ;;  %v1437_v4 = vadd.f32 %v1436_v2, %v1435_v62  ;;  %v1516_v27 = vpop.f32.mrb[39].mxu0  ;;  %v1126_v59 = vld [vmem:[#allocation2 + $0x20] sm:$0xff] (!%p1283_p11)  ;;  %v1148_v60 = vadd.f32 (!%p1283_p11), %v1284_v53, %v1125_v21  ;;  %v1127_v62 = vld [vmem:[#allocation2 + $0x28] sm:$0xff] (!%p1283_p11)  ;;  %v1129_v2 = vld [vmem:[#allocation2 + $0x38] sm:$0xff] (!%p1283_p11) }
 0x19d   : > { %v1517_v5 = vadd.f32 %v1516_v27, %v1515_v40  ;;  %v1149_v61 = vadd.f32 (!%p1283_p11), %v1284_v53, %v1126_v59 }
 0x19e   : > { %v1096_v6 = vadd.f32 %v1058_v3, %v453_v1  ;;  %v918_v7 = vadd.f32 %v1437_v4, %v2195_v39  ;;  %v1438_v8 = vpop.f32.mrb[40].mxu1  ;;  %v1128_v1 = vld [vmem:[#allocation2 + $0x30] sm:$0xff] (!%p1283_p11)  ;;  %v1162_v3 = vmax.f32 (!%p1283_p11), %v1146_v55, 0.0  ;;  %v1150_v4 = vadd.f32 (!%p1283_p11), %v1284_v53, %v1127_v62 }
 0x19f   : > { %v1439_v10 = vpop.f32.mrb[41].mxu1  ;;  %v1518_v11 = vpop.f32.mrb[40].mxu0  ;;  %v1151_v27 = vadd.f32 (!%p1283_p11), %v1284_v53, %v1128_v1 }
 0x1a0   : > { %1112 = vst [vmem:[#allocation2 + $0x50] sm:$0xff] %v1096_v6  ;;  %v1063_v46 = vadd.f32 %v1517_v5, %v918_v7  ;;  %v1440_v12 = vadd.f32 %v1439_v10, %v1438_v8  ;;  %v1519_v33 = vpop.f32.mrb[41].mxu0  ;;  %v1130_v5 = vld [vmem:[#allocation2 + $0x40] sm:$0xff] (!%p1283_p11)  ;;  %v1165_v10 = vmax.f32 (!%p1283_p11), %v1149_v61, 0.0  ;;  %1178 = vst [vmem:[%s2298_s3 + $0x8] sm:$0xff] (!%p1283_p11), %v1162_v3 }
 0x1a1   : > { %v1520_v13 = vadd.f32 %v1519_v33, %v1518_v11  ;;  %v1152_v11 = vadd.f32 (!%p1283_p11), %v1284_v53, %v1129_v2 }
 0x1a2   : > { %v1097_v14 = vadd.f32 %v1063_v46, %v454_v9  ;;  %v923_v15 = vadd.f32 %v1440_v12, %v2199_v45  ;;  %v1441_v16 = vpop.f32.mrb[42].mxu1  ;;  %v1164_v9 = vmax.f32 (!%p1283_p11), %v1148_v60, 0.0  ;;  %1181 = vst [vmem:[%s2298_s3 + $0x20] sm:$0xff] (!%p1283_p11), %v1165_v10 }
 0x1a3   : > { %v1442_v18 = vpop.f32.mrb[43].mxu1  ;;  %v1521_v19 = vpop.f32.mrb[42].mxu0  ;;  %v1131_v6 = vld [vmem:[#allocation2 + $0x48] sm:$0xff] (!%p1283_p11) }
 0x1a4   : > { %1113 = vst [vmem:[#allocation2 + $0x58] sm:$0xff] %v1097_v14  ;;  %v1068_v20 = vadd.f32 %v1520_v13, %v923_v15  ;;  %v1443_v52 = vadd.f32 %v1442_v18, %v1441_v16  ;;  %v1522_v39 = vpop.f32.mrb[43].mxu0  ;;  %v1166_v13 = vmax.f32 (!%p1283_p11), %v1150_v4, 0.0  ;;  %v1167_v14 = vmax.f32 (!%p1283_p11), %v1151_v27, 0.0  ;;  %1180 = vst [vmem:[%s2298_s3 + $0x18] sm:$0xff] (!%p1283_p11), %v1164_v9 }
 0x1a5   : > { %v1523_v23 = vadd.f32 %v1522_v39, %v1521_v19  ;;  %v1153_v15 = vadd.f32 (!%p1283_p11), %v1284_v53, %v1130_v5  ;;  %v1154_v16 = vadd.f32 (!%p1283_p11), %v1284_v53, %v1131_v6  ;;  %v1168_v19 = vmax.f32 (!%p1283_p11), %v1152_v11, 0.0 }
 0x1a6   : > { %v1098_v24 = vadd.f32 %v1068_v20, %v455_v17  ;;  %v928_v25 = vadd.f32 %v1443_v52, %v2203_v51  ;;  %v1444_v26 = vpop.f32.mrb[44].mxu1  ;;  %1182 = vst [vmem:[%s2298_s3 + $0x28] sm:$0xff] (!%p1283_p11), %v1166_v13  ;;  %1183 = vst [vmem:[%s2298_s3 + $0x30] sm:$0xff] (!%p1283_p11), %v1167_v14 }
 0x1a7   : > { %v1445_v22 = vpop.f32.mrb[45].mxu1  ;;  %v1524_v30 = vpop.f32.mrb[44].mxu0  ;;  %v1132_v7 = vld [vmem:[#allocation2 + $0x50] sm:$0xff] (!%p1283_p11)  ;;  %1184 = vst [vmem:[%s2298_s3 + $0x38] sm:$0xff] (!%p1283_p11), %v1168_v19 }
 0x1a8   : > { %1114 = vst [vmem:[#allocation2 + $0x60] sm:$0xff] %v1098_v24  ;;  %v1073_v31 = vadd.f32 %v1523_v23, %v928_v25  ;;  %v1446_v32 = vadd.f32 %v1445_v22, %v1444_v26  ;;  %v1525_v45 = vpop.f32.mrb[45].mxu0  ;;  %v1155_v20 = vadd.f32 (!%p1283_p11), %v1284_v53, %v1132_v7  ;;  %v1169_v23 = vmax.f32 (!%p1283_p11), %v1153_v15, 0.0 }
 0x1a9   : > { %v1526_v58 = vadd.f32 %v1525_v45, %v1524_v30  ;;  %v1170_v24 = vmax.f32 (!%p1283_p11), %v1154_v16, 0.0 }
 0x1aa   : > { %v1099_v35 = vadd.f32 %v1073_v31, %v456_v29  ;;  %v933_v36 = vadd.f32 %v1446_v32, %v2207_v57  ;;  %v1447_v37 = vpop.f32.mrb[46].mxu1  ;;  %v1122_v57 = vld [vmem:[#allocation2] sm:$0xff] (!%p1283_p11)  ;;  %v1171_v29 = vmax.f32 (!%p1283_p11), %v1155_v20, 0.0  ;;  %1185 = vst [vmem:[%s2298_s3 + $0x40] sm:$0xff] (!%p1283_p11), %v1169_v23 }
 0x1ab   : > { %v1448_v41 = vpop.f32.mrb[47].mxu1  ;;  %v1527_v28 = vpop.f32.mrb[46].mxu0  ;;  %v1145_v54 = vadd.f32 (!%p1283_p11), %v1284_v53, %v1122_v57  ;;  %v1133_v46 = vld [vmem:[#allocation2 + $0x58] sm:$0xff] (!%p1283_p11)  ;;  %1186 = vst [vmem:[%s2298_s3 + $0x48] sm:$0xff] (!%p1283_p11), %v1170_v24 }
 0x1ac   : > { %1115 = vst [vmem:[#allocation2 + $0x68] sm:$0xff] %v1099_v35  ;;  %v1078_v42 = vadd.f32 %v1526_v58, %v933_v36  ;;  %v1449_v43 = vadd.f32 %v1448_v41, %v1447_v37  ;;  %v1528_v51 = vpop.f32.mrb[47].mxu0  ;;  %v1156_v52 = vadd.f32 (!%p1283_p11), %v1284_v53, %v1133_v46  ;;  %1187 = vst [vmem:[%s2298_s3 + $0x50] sm:$0xff] (!%p1283_p11), %v1171_v29 }
 0x1ad   : > { %v1529_v44 = vadd.f32 %v1528_v51, %v1527_v28  ;;  %v1161_v40 = vmax.f32 (!%p1283_p11), %v1145_v54, 0.0 }
 0x1ae   : > { %v1100_v0 = vadd.f32 %v1078_v42, %v457_v38  ;;  %v938_v47 = vadd.f32 %v1449_v43, %v2211_v63  ;;  %1121 = sbr.rel (%p1283_p11) target bundleno = 449 (0x1c1), region = 63  ;;  %v1147_v63 = vadd.f32 (!%p1283_p11), %v1284_v53, %v1124_v56  ;;  %v1172_v22 = vmax.f32 (!%p1283_p11), %v1156_v52, 0.0 }
 0x1af   : > { %v1134_v12 = vld [vmem:[#allocation2 + $0x60] sm:$0xff] (!%p1283_p11)  ;;  %1177 = vst [vmem:[%s2298_s3] sm:$0xff] (!%p1283_p11), %v1161_v40 }
 0x1b0   : > { %1116 = vst [vmem:[#allocation2 + $0x70] sm:$0xff] %v1100_v0  ;;  %v1083_v49 = vadd.f32 %v1529_v44, %v938_v47  ;;  %v1163_v8 = vmax.f32 (!%p1283_p11), %v1147_v63, 0.0  ;;  %v1157_v39 = vadd.f32 (!%p1283_p11), %v1284_v53, %v1134_v12  ;;  %1188 = vst [vmem:[%s2298_s3 + $0x58] sm:$0xff] (!%p1283_p11), %v1172_v22 }
 0x1b2   : > { %v1101_v50 = vadd.f32 %v1083_v49, %v458_v48  ;;  %1179 = vst [vmem:[%s2298_s3 + $0x10] sm:$0xff] (!%p1283_p11), %v1163_v8  ;;  %v1173_v30 = vmax.f32 (!%p1283_p11), %v1157_v39, 0.0 }
 0x1b3   : > { %v1135_v33 = vld [vmem:[#allocation2 + $0x68] sm:$0xff] (!%p1283_p11) }
 0x1b4   : > { %1117 = vst [vmem:[#allocation2 + $0x78] sm:$0xff] %v1101_v50  ;;  %v1158_v25 = vadd.f32 (!%p1283_p11), %v1284_v53, %v1135_v33  ;;  %1189 = vst [vmem:[%s2298_s3 + $0x60] sm:$0xff] (!%p1283_p11), %v1173_v30 }
 0x1b6   : > { %v1174_v32 = vmax.f32 %v1158_v25, 0.0 }
 0x1b7   : > { %v1136_v17 = vld [vmem:[#allocation2 + $0x70] sm:$0xff] }
 0x1b8   : > { %v1159_v26 = vadd.f32 %v1284_v53, %v1136_v17  ;;  %1190 = vst [vmem:[%s2298_s3 + $0x68] sm:$0xff] %v1174_v32 }
 0x1ba   : > { %v1175_v45 = vmax.f32 %v1159_v26, 0.0 }
 0x1bb   : > { %v1137_v18 = vld [vmem:[#allocation2 + $0x78] sm:$0xff] }
 0x1bc   : > { %v1160_v31 = vadd.f32 %v1284_v53, %v1137_v18  ;;  %1191 = vst [vmem:[%s2298_s3 + $0x70] sm:$0xff] %v1175_v45 }
 0x1be   : > { %v1176_v58 = vmax.f32 %v1160_v31, 0.0 }
 0x1c0   : > { %1192 = vst [vmem:[%s2298_s3 + $0x78] sm:$0xff] %v1176_v58 }
 0x1c1 PF: > { %s13_s16 = sadd.s32 1, %s1723_s16   ;;  %s2299_s12 = smov %s1711_s13 }
 0x1c2   : > { %p10_p12 = scmp.ge.s32.totalorder %s13_s16, 5   ;;  %s2300_s13 = smov %s1781_s20 }
 0x1c3   : > { %s2301_s14 = smov %s1719_s15  ;;  %s2302_s15 = smov %s2304_s17 }
 0x1c4   :  { %12 = sbr.rel (!%p10_p12) target bundleno = 3 (0x3), region = 101 }

// kernel: cnn_forward.6
= control target key start
LH: loop header
LB: loop body
LE: loop exit
PB: predicated region body
PF: predicated region fallthrough
CT: control target
= control target key end

     0   :  { %s1132_s12 = smov 0   ;;  %s1134_s13 = smov 0   ;;  %s1362_s0 = inlined_call_operand.vmem [shape: f32[32,3200], index: 0, kind: input, shape index: {}]   ;;  %s1363_s1 = inlined_call_operand.vmem [shape: f32[3200,128], index: 1, kind: input, shape index: {}]   ;;  %s1364_s2 = inlined_call_operand.vmem [shape: f32[1,128], index: 2, kind: input, shape index: {}]   ;;  %s1365_s3 = inlined_call_operand.vmem [shape: f32[32,128], index: 3, kind: output, shape index: {}]  }
   0x1   :  { %s1136_s14 = smov 0   ;;  %s1138_s15 = smov 0  }
   0x2   :  { %s1140_s16 = smov 0  }
   0x3 LB: > { %s22_s17 = sadd.s32 1, %s1105_s15  ;;  %p41_p1 = scmp.ne.s32.totalorder %s1097_s13, %s1093_s12  ;;  %s1109_s16 = sphi %s1140_s16, %s13_s16   ;;  %s1105_s15 = sphi %s1138_s15, %s1369_s15   ;;  %s1101_s14 = sphi %s1136_s14, %s1368_s14   ;;  %s1097_s13 = sphi %s1134_s13, %s1367_s13   ;;  %s1093_s12 = sphi %s1132_s12, %s1366_s12  }
   0x4   : > { %p23_p0 = scmp.ge.s32.totalorder %s22_s17, 5  ;;  %p42_p2 = scmp.eq.s32.totalorder %s1109_s16, 0 }
   0x5   : > { %s34_s19 = sadd.s32 1, %s1097_s13  ;;  %p758_p5 = scmp.ge.s32.totalorder %s1109_s16, 5 }
   0x6   : > { %s1371_s17 = smov (%p23_p0, %s22_s17), 0  ;;  %p43_p3 = por %p42_p2, %p41_p1 }
   0x7   : > { %s30_s18 = ssub.s32 %s1105_s15, %s1371_s17  ;;  %143 = sbr.rel (%p758_p5) target bundleno = 29 (0x1d), region = 20 }
   0x8   : > { %p32_p4 = scmp.eq.s32.totalorder %s30_s18, 0 }
   0xa   : > { %s1167_s20 = scalar_select %p32_p4, %s1097_s13, %s34_s19  }
   0xe   : > { %146 = sbr.rel (!%p43_p3) target bundleno = 29 (0x1d), region = 24  ;;  %s148_s21 = sand.u32 (%p43_p3), 1, %s1097_s13  }
   0xf   : > { %s769_s22 = smul.u32 (%p43_p3), 40, %s1105_s15 }
  0x10   : > { %s1028_s23 = smul.u32 (%p43_p3), 160, %s148_s21 }
  0x11   : > { %s1175_s26 = scalar_lea.vmem (%p43_p3), %s1362_s0, %s769_s22 }
  0x12   : > { %v169_v0 = vld [vmem:[%s1175_s26] sm:$0xff] (%p43_p3)  ;;  %v171_v1 = vld [vmem:[%s1175_s26 + $0x8] sm:$0xff] (%p43_p3)  ;;  %v173_v2 = vld [vmem:[%s1175_s26 + $0x10] sm:$0xff] (%p43_p3)  ;;  %s1180_s27 = scalar_lea.vmem (%p43_p3), [#allocation3], %s1028_s23 }
  0x13   : > { %170 = vst [vmem:[%s1180_s27] sm:$0xff] (%p43_p3), %v169_v0  ;;  %172 = vst [vmem:[%s1180_s27 + $0x8] sm:$0xff] (%p43_p3), %v171_v1  ;;  %v175_v3 = vld [vmem:[%s1175_s26 + $0x18] sm:$0xff] (%p43_p3)  ;;  %v177_v4 = vld [vmem:[%s1175_s26 + $0x20] sm:$0xff] (%p43_p3) }
  0x14   : > { %174 = vst [vmem:[%s1180_s27 + $0x10] sm:$0xff] (%p43_p3), %v173_v2  ;;  %v179_v5 = vld [vmem:[%s1175_s26 + $0xc8] sm:$0xff] (%p43_p3)  ;;  %176 = vst [vmem:[%s1180_s27 + $0x18] sm:$0xff] (%p43_p3), %v175_v3  ;;  %v181_v6 = vld [vmem:[%s1175_s26 + $0xd0] sm:$0xff] (%p43_p3) }
  0x15   : > { %178 = vst [vmem:[%s1180_s27 + $0x20] sm:$0xff] %v177_v4  ;;  %180 = vst [vmem:[%s1180_s27 + $0x28] sm:$0xff] %v179_v5  ;;  %v183_v7 = vld [vmem:[%s1175_s26 + $0xd8] sm:$0xff]  ;;  %v185_v8 = vld [vmem:[%s1175_s26 + $0xe0] sm:$0xff] }
  0x16   : > { %182 = vst [vmem:[%s1180_s27 + $0x30] sm:$0xff] %v181_v6  ;;  %184 = vst [vmem:[%s1180_s27 + $0x38] sm:$0xff] %v183_v7  ;;  %v187_v9 = vld [vmem:[%s1175_s26 + $0xe8] sm:$0xff]  ;;  %v189_v10 = vld [vmem:[%s1175_s26 + $0x190] sm:$0xff] }
  0x17   : > { %186 = vst [vmem:[%s1180_s27 + $0x40] sm:$0xff] %v185_v8  ;;  %v191_v11 = vld [vmem:[%s1175_s26 + $0x198] sm:$0xff]  ;;  %188 = vst [vmem:[%s1180_s27 + $0x48] sm:$0xff] %v187_v9  ;;  %v193_v12 = vld [vmem:[%s1175_s26 + $0x1a0] sm:$0xff] }
  0x18   : > { %190 = vst [vmem:[%s1180_s27 + $0x50] sm:$0xff] %v189_v10  ;;  %192 = vst [vmem:[%s1180_s27 + $0x58] sm:$0xff] %v191_v11  ;;  %v195_v13 = vld [vmem:[%s1175_s26 + $0x1a8] sm:$0xff]  ;;  %v197_v14 = vld [vmem:[%s1175_s26 + $0x1b0] sm:$0xff] }
  0x19   : > { %194 = vst [vmem:[%s1180_s27 + $0x60] sm:$0xff] %v193_v12  ;;  %196 = vst [vmem:[%s1180_s27 + $0x68] sm:$0xff] %v195_v13  ;;  %v199_v15 = vld [vmem:[%s1175_s26 + $0x258] sm:$0xff]  ;;  %v201_v16 = vld [vmem:[%s1175_s26 + $0x260] sm:$0xff] }
  0x1a   : > { %198 = vst [vmem:[%s1180_s27 + $0x70] sm:$0xff] %v197_v14  ;;  %v203_v17 = vld [vmem:[%s1175_s26 + $0x268] sm:$0xff]  ;;  %200 = vst [vmem:[%s1180_s27 + $0x78] sm:$0xff] %v199_v15  ;;  %v205_v18 = vld [vmem:[%s1175_s26 + $0x270] sm:$0xff] }
  0x1b   : > { %202 = vst [vmem:[%s1180_s27 + $0x80] sm:$0xff] %v201_v16  ;;  %204 = vst [vmem:[%s1180_s27 + $0x88] sm:$0xff] %v203_v17  ;;  %v207_v19 = vld [vmem:[%s1175_s26 + $0x278] sm:$0xff] }
  0x1c   : > { %206 = vst [vmem:[%s1180_s27 + $0x90] sm:$0xff] %v205_v18  ;;  %208 = vst [vmem:[%s1180_s27 + $0x98] sm:$0xff] %v207_v19 }
  0x1d PF: > { %p760_p6 = scmp.ge.s32.totalorder %s1109_s16, 1  ;;  %p222_p7 = scmp.lt.s32.totalorder %s1109_s16, 6 }
  0x1f   : > { %p223_p8 = pnand %p760_p6, %p222_p7 }
  0x20   : > { %s229_s28 = sand.u32 (!%p223_p8), 1, %s1093_s12   ;;  %s259_s29 = smul.u32 (!%p223_p8), 80, %s1101_s14 }
  0x21   : > { %226 = sbr.rel (%p223_p8) target bundleno = 346 (0x15a), region = 51  ;;  %p762_p10 = scmp.ne.s32.totalorder (!%p223_p8), %s1101_s14, 0 }
  0x22   : > { %s1029_s30 = smul.u32 (!%p223_p8), 160, %s229_s28  ;;  %p260_p9 = scmp.lt.s32.totalorder (!%p223_p8), %s259_s29, 399 }
  0x24   : > { %s1228_s8 = scalar_lea.vmem (!%p223_p8), [#allocation3], %s1029_s30 }
  0x28   : > { %s1373_s29 = smov (!%p260_p9, %s259_s29), 399  ;;  %274 = sbr.rel (%p762_p10) target bundleno = 47 (0x2f), region = 59 }
  0x29   : > { %s761_s4 = sshll.u32 %s1373_s29, 3  ;;  %v1111_v20 = vmov (!%p762_p10), 0.0  }
  0x2a   : > { %s1226_s7 = scalar_lea.vmem %s1363_s1, %s761_s4  ;;  %275 = vst [vmem:[#allocation2] sm:$0xff] (!%p762_p10), %v1111_v20  ;;  %276 = vst [vmem:[#allocation2 + $0x8] sm:$0xff] (!%p762_p10), %v1111_v20 }
  0x2b   : > { %277 = vst [vmem:[#allocation2 + $0x10] sm:$0xff] (!%p762_p10), %v1111_v20  ;;  %278 = vst [vmem:[#allocation2 + $0x18] sm:$0xff] (!%p762_p10), %v1111_v20 }
  0x2f PF: > { %v319_v21 = vld [vmem:[%s1226_s7 + $0x80] sm:$0xff]  ;;  %v320_v22 = vld [vmem:[%s1226_s7 + $0x88] sm:$0xff]  ;;  %v321_v32 = vld [vmem:[%s1226_s7 + $0x90] sm:$0xff]  ;;  %p763_p11 = scmp.ne.s32.totalorder %s1101_s14, 4 }
  0x30   : > { %v351_v23 = vld [vmem:[%s1226_s7 + $0x180] sm:$0xff]  ;;  %v916_v24 = vpack.c.bf16 %v320_v22, %v319_v21  ;;  %v352_v25 = vld [vmem:[%s1226_s7 + $0x188] sm:$0xff]  ;;  %v322_v34 = vld [vmem:[%s1226_s7 + $0x98] sm:$0xff] }
  0x31   : > { %v303_v26 = vld [vmem:[%s1226_s7] sm:$0xff]  ;;  %v304_v27 = vld [vmem:[%s1226_s7 + $0x8] sm:$0xff]  ;;  %v948_v28 = vpack.c.bf16 %v352_v25, %v351_v23  ;;  %v353_v35 = vld [vmem:[%s1226_s7 + $0x190] sm:$0xff]  ;;  %v920_v37 = vpack.c.bf16 %v322_v34, %v321_v32 }
  0x32   : > { %v918_v29 = vpack.c.bf16 %v304_v27, %v303_v26  ;;  %v335_v30 = vld [vmem:[%s1226_s7 + $0x100] sm:$0xff]  ;;  %v336_v31 = vld [vmem:[%s1226_s7 + $0x108] sm:$0xff]  ;;  %917 = vmatprep.subr.bf16.mxu0 %v916_v24  ;;  %v354_v36 = vld [vmem:[%s1226_s7 + $0x198] sm:$0xff] }
  0x33   : > { %v950_v33 = vpack.c.bf16 %v336_v31, %v335_v30  ;;  %949 = vmatprep.subr.bf16.mxu1 %v948_v28  ;;  %v952_v38 = vpack.c.bf16 %v354_v36, %v353_v35  ;;  %v305_v39 = vld [vmem:[%s1226_s7 + $0x10] sm:$0xff]  ;;  %v306_v40 = vld [vmem:[%s1226_s7 + $0x18] sm:$0xff]  ;;  %v323_v44 = vld [vmem:[%s1226_s7 + $0xa0] sm:$0xff] }
  0x34   : > { %919 = vmatpush3.bf16.msra.mxu0 %v918_v29  ;;  %v337_v41 = vld [vmem:[%s1226_s7 + $0x110] sm:$0xff]  ;;  %v922_v42 = vpack.c.bf16 %v306_v40, %v305_v39  ;;  %v338_v43 = vld [vmem:[%s1226_s7 + $0x118] sm:$0xff]  ;;  %v324_v45 = vld [vmem:[%s1226_s7 + $0xa8] sm:$0xff] }
  0x35   : > { %951 = vmatpush3.bf16.msra.mxu1 %v950_v33  ;;  %921 = vmatprep.subr.bf16.mxu0 %v920_v37  ;;  %v954_v46 = vpack.c.bf16 %v338_v43, %v337_v41  ;;  %v924_v47 = vpack.c.bf16 %v324_v45, %v323_v44  ;;  %v355_v48 = vld [vmem:[%s1226_s7 + $0x1a0] sm:$0xff]  ;;  %v356_v49 = vld [vmem:[%s1226_s7 + $0x1a8] sm:$0xff]  ;;  %v325_v56 = vld [vmem:[%s1226_s7 + $0xb0] sm:$0xff] }
  0x36   : > { %953 = vmatprep.subr.bf16.mxu1 %v952_v38  ;;  %v307_v50 = vld [vmem:[%s1226_s7 + $0x20] sm:$0xff]  ;;  %v956_v51 = vpack.c.bf16 %v356_v49, %v355_v48  ;;  %v308_v52 = vld [vmem:[%s1226_s7 + $0x28] sm:$0xff]  ;;  %v326_v57 = vld [vmem:[%s1226_s7 + $0xb8] sm:$0xff] }
  0x37   : > { %v339_v53 = vld [vmem:[%s1226_s7 + $0x120] sm:$0xff]  ;;  %v340_v54 = vld [vmem:[%s1226_s7 + $0x128] sm:$0xff]  ;;  %v926_v55 = vpack.c.bf16 %v308_v52, %v307_v50  ;;  %v357_v58 = vld [vmem:[%s1226_s7 + $0x1b0] sm:$0xff]  ;;  %v928_v60 = vpack.c.bf16 %v326_v57, %v325_v56 }
  0x38   : > { %923 = vmatpush3.bf16.msra.mxu0 %v922_v42  ;;  %v958_v59 = vpack.c.bf16 %v340_v54, %v339_v53  ;;  %v358_v61 = vld [vmem:[%s1226_s7 + $0x1b8] sm:$0xff]  ;;  %v309_v62 = vld [vmem:[%s1226_s7 + $0x30] sm:$0xff]  ;;  %v327_v3 = vld [vmem:[%s1226_s7 + $0xc0] sm:$0xff] }
  0x39   : > { %955 = vmatpush3.bf16.msra.mxu1 %v954_v46  ;;  %925 = vmatprep.subr.bf16.mxu0 %v924_v47  ;;  %v310_v63 = vld [vmem:[%s1226_s7 + $0x38] sm:$0xff]  ;;  %v960_v0 = vpack.c.bf16 %v358_v61, %v357_v58  ;;  %v341_v1 = vld [vmem:[%s1226_s7 + $0x130] sm:$0xff]  ;;  %v328_v4 = vld [vmem:[%s1226_s7 + $0xc8] sm:$0xff] }
  0x3a   : > { %957 = vmatprep.subr.bf16.mxu1 %v956_v51  ;;  %v342_v2 = vld [vmem:[%s1226_s7 + $0x138] sm:$0xff]  ;;  %v359_v5 = vld [vmem:[%s1226_s7 + $0x1c0] sm:$0xff]  ;;  %v360_v6 = vld [vmem:[%s1226_s7 + $0x1c8] sm:$0xff]  ;;  %v930_v7 = vpack.c.bf16 %v310_v63, %v309_v62  ;;  %v932_v9 = vpack.c.bf16 %v328_v4, %v327_v3 }
  0x3b   : > { %v962_v8 = vpack.c.bf16 %v342_v2, %v341_v1  ;;  %v311_v10 = vld [vmem:[%s1226_s7 + $0x40] sm:$0xff]  ;;  %v312_v11 = vld [vmem:[%s1226_s7 + $0x48] sm:$0xff]  ;;  %v964_v13 = vpack.c.bf16 %v360_v6, %v359_v5  ;;  %v329_v15 = vld [vmem:[%s1226_s7 + $0xd0] sm:$0xff] }
  0x3c   : > { %927 = vmatpush3.bf16.msra.mxu0 %v926_v55  ;;  %v343_v12 = vld [vmem:[%s1226_s7 + $0x140] sm:$0xff]  ;;  %v344_v14 = vld [vmem:[%s1226_s7 + $0x148] sm:$0xff]  ;;  %v330_v16 = vld [vmem:[%s1226_s7 + $0xd8] sm:$0xff]  ;;  %v934_v19 = vpack.c.bf16 %v312_v11, %v311_v10 }
  0x3d   : > { %959 = vmatpush3.bf16.msra.mxu1 %v958_v59  ;;  %929 = vmatprep.subr.bf16.mxu0 %v928_v60  ;;  %v361_v17 = vld [vmem:[%s1226_s7 + $0x1d0] sm:$0xff]  ;;  %v362_v18 = vld [vmem:[%s1226_s7 + $0x1d8] sm:$0xff]  ;;  %v966_v20 = vpack.c.bf16 %v344_v14, %v343_v12  ;;  %v936_v21 = vpack.c.bf16 %v330_v16, %v329_v15  ;;  %v331_v27 = vld [vmem:[%s1226_s7 + $0xe0] sm:$0xff] }
  0x3e   : > { %961 = vmatprep.subr.bf16.mxu1 %v960_v0  ;;  %v313_v22 = vld [vmem:[%s1226_s7 + $0x50] sm:$0xff]  ;;  %v314_v23 = vld [vmem:[%s1226_s7 + $0x58] sm:$0xff]  ;;  %v968_v25 = vpack.c.bf16 %v362_v18, %v361_v17  ;;  %v332_v28 = vld [vmem:[%s1226_s7 + $0xe8] sm:$0xff] }
  0x3f   : > { %v345_v24 = vld [vmem:[%s1226_s7 + $0x150] sm:$0xff]  ;;  %v346_v26 = vld [vmem:[%s1226_s7 + $0x158] sm:$0xff]  ;;  %v363_v29 = vld [vmem:[%s1226_s7 + $0x1e0] sm:$0xff]  ;;  %v938_v31 = vpack.c.bf16 %v314_v23, %v313_v22  ;;  %v940_v35 = vpack.c.bf16 %v332_v28, %v331_v27 }
  0x40   : > { %931 = vmatpush3.bf16.msra.mxu0 %v930_v7  ;;  %v364_v30 = vld [vmem:[%s1226_s7 + $0x1e8] sm:$0xff]  ;;  %v315_v32 = vld [vmem:[%s1226_s7 + $0x60] sm:$0xff]  ;;  %v970_v34 = vpack.c.bf16 %v346_v26, %v345_v24  ;;  %v286_v38 = vld [vmem:[%s1228_s8 + $0x18] sm:$0xff] }
  0x41   : > { %963 = vmatpush3.bf16.msra.mxu1 %v962_v8  ;;  %933 = vmatprep.subr.bf16.mxu0 %v932_v9  ;;  %v316_v33 = vld [vmem:[%s1226_s7 + $0x68] sm:$0xff]  ;;  %v347_v36 = vld [vmem:[%s1226_s7 + $0x160] sm:$0xff]  ;;  %v972_v39 = vpack.c.bf16 %v364_v30, %v363_v29  ;;  %v333_v41 = vld [vmem:[%s1226_s7 + $0xf0] sm:$0xff] }
  0x42   : > { %965 = vmatprep.subr.bf16.mxu1 %v964_v13  ;;  %v284_v37 = vld [vmem:[%s1228_s8 + $0x8] sm:$0xff]  ;;  %v334_v42 = vld [vmem:[%s1226_s7 + $0xf8] sm:$0xff]  ;;  %v365_v43 = vld [vmem:[%s1226_s7 + $0x1f0] sm:$0xff]  ;;  %532 = vmatprep.mubr.f32.mxu1 %v286_v38  ;;  %v942_v45 = vpack.c.bf16 %v316_v33, %v315_v32 }
  0x43   : > { %v348_v40 = vld [vmem:[%s1226_s7 + $0x168] sm:$0xff]  ;;  %447 = vmatprep.mubr.f32.mxu0 %v284_v37  ;;  %v366_v44 = vld [vmem:[%s1226_s7 + $0x1f8] sm:$0xff]  ;;  %v944_v47 = vpack.c.bf16 %v334_v42, %v333_v41  ;;  %v317_v48 = vld [vmem:[%s1226_s7 + $0x70] sm:$0xff] }
  0x44   : > { %935 = vmatpush3.bf16.msra.mxu0 %v934_v19  ;;  %v974_v46 = vpack.c.bf16 %v348_v40, %v347_v36  ;;  %v318_v49 = vld [vmem:[%s1226_s7 + $0x78] sm:$0xff]  ;;  %v349_v50 = vld [vmem:[%s1226_s7 + $0x170] sm:$0xff]  ;;  %v976_v51 = vpack.c.bf16 %v366_v44, %v365_v43  ;;  %v367_v53 = vld [vmem:[%s1226_s7 + $0x200] sm:$0xff] }
  0x45   : > { %967 = vmatpush3.bf16.msra.mxu1 %v966_v20  ;;  %937 = vmatprep.subr.bf16.mxu0 %v936_v21  ;;  %v350_v52 = vld [vmem:[%s1226_s7 + $0x178] sm:$0xff]  ;;  %v368_v54 = vld [vmem:[%s1226_s7 + $0x208] sm:$0xff]  ;;  %v946_v55 = vpack.c.bf16 %v318_v49, %v317_v48  ;;  %v369_v58 = vld [vmem:[%s1226_s7 + $0x210] sm:$0xff] }
  0x46   : > { %969 = vmatprep.subr.bf16.mxu1 %v968_v25  ;;  %v978_v56 = vpack.c.bf16 %v350_v52, %v349_v50  ;;  %v980_v57 = vpack.c.bf16 %v368_v54, %v367_v53  ;;  %v370_v59 = vld [vmem:[%s1226_s7 + $0x218] sm:$0xff]  ;;  %v283_v60 = vld [vmem:[%s1228_s8] sm:$0xff]  ;;  %v285_v61 = vld [vmem:[%s1228_s8 + $0x10] sm:$0xff] }
  0x47   : > { %v984_v62 = vpack.c.bf16 %v370_v59, %v369_v58  ;;  %v371_v63 = vld [vmem:[%s1226_s7 + $0x220] sm:$0xff]  ;;  %v372_v0 = vld [vmem:[%s1226_s7 + $0x228] sm:$0xff]  ;;  %v289_v1 = vld [vmem:[%s1228_s8 + $0x30] sm:$0xff] }
  0x48   : > { %939 = vmatpush3.bf16.msra.mxu0 %v938_v31  ;;  %v291_v2 = vld [vmem:[%s1228_s8 + $0x40] sm:$0xff]  ;;  %v288_v3 = vld [vmem:[%s1228_s8 + $0x28] sm:$0xff]  ;;  %v988_v4 = vpack.c.bf16 %v372_v0, %v371_v63  ;;  %v290_v5 = vld [vmem:[%s1228_s8 + $0x38] sm:$0xff] }
  0x49   : > { %971 = vmatpush3.bf16.msra.mxu1 %v970_v34  ;;  %941 = vmatprep.subr.bf16.mxu0 %v940_v35  ;;  %v373_v6 = vld [vmem:[%s1226_s7 + $0x230] sm:$0xff]  ;;  %v374_v7 = vld [vmem:[%s1226_s7 + $0x238] sm:$0xff]  ;;  %v296_v9 = vld [vmem:[%s1228_s8 + $0x68] sm:$0xff] }
  0x4a   : > { %973 = vmatprep.subr.bf16.mxu1 %v972_v39  ;;  %v294_v8 = vld [vmem:[%s1228_s8 + $0x58] sm:$0xff]  ;;  %v293_v10 = vld [vmem:[%s1228_s8 + $0x50] sm:$0xff]  ;;  %v992_v11 = vpack.c.bf16 %v374_v7, %v373_v6  ;;  %v295_v12 = vld [vmem:[%s1228_s8 + $0x60] sm:$0xff] }
  0x4b   : > { %v375_v13 = vld [vmem:[%s1226_s7 + $0x240] sm:$0xff]  ;;  %v376_v14 = vld [vmem:[%s1226_s7 + $0x248] sm:$0xff]  ;;  %v301_v16 = vld [vmem:[%s1228_s8 + $0x90] sm:$0xff] }
  0x4c   : > { %943 = vmatpush3.bf16.msra.mxu0 %v942_v45  ;;  %v299_v15 = vld [vmem:[%s1228_s8 + $0x80] sm:$0xff]  ;;  %v298_v17 = vld [vmem:[%s1228_s8 + $0x78] sm:$0xff]  ;;  %v996_v18 = vpack.c.bf16 %v376_v14, %v375_v13  ;;  %v300_v19 = vld [vmem:[%s1228_s8 + $0x88] sm:$0xff] }
  0x4d   : > { %975 = vmatpush3.bf16.msra.mxu1 %v974_v46  ;;  %945 = vmatprep.subr.bf16.mxu0 %v944_v47  ;;  %v377_v20 = vld [vmem:[%s1226_s7 + $0x250] sm:$0xff]  ;;  %v378_v21 = vld [vmem:[%s1226_s7 + $0x258] sm:$0xff]  ;;  %v287_v22 = vld [vmem:[%s1228_s8 + $0x20] sm:$0xff] }
  0x4e   : > { %977 = vmatprep.subr.bf16.mxu1 %v976_v51  ;;  %v297_v23 = vld [vmem:[%s1228_s8 + $0x70] sm:$0xff]  ;;  %v1000_v24 = vpack.c.bf16 %v378_v21, %v377_v20  ;;  %v379_v25 = vld [vmem:[%s1226_s7 + $0x260] sm:$0xff]  ;;  %v380_v26 = vld [vmem:[%s1226_s7 + $0x268] sm:$0xff] }
  0x4f   : > { %v1004_v27 = vpack.c.bf16 %v380_v26, %v379_v25  ;;  %v381_v28 = vld [vmem:[%s1226_s7 + $0x270] sm:$0xff]  ;;  %v382_v29 = vld [vmem:[%s1226_s7 + $0x278] sm:$0xff]  ;;  %v292_v31 = vld [vmem:[%s1228_s8 + $0x48] sm:$0xff] }
  0x50   : > { %947 = vmatpush3.bf16.msra.mxu0 %v946_v55  ;;  %v1008_v30 = vpack.c.bf16 %v382_v29, %v381_v28  ;;  %v302_v32 = vld [vmem:[%s1228_s8 + $0x98] sm:$0xff]  ;;  %v281_v6 = vld [vmem:[#allocation2 + $0x10] sm:$0xff]  ;;  %v764_v14 = vld [vmem:[%s1364_s2] ss:$0 sm:$0xff] (!%p763_p11) }
  0x51   : > { %979 = vmatpush3.bf16.msra.mxu1 %v978_v56  ;;  %981 = vmatprep.subr.bf16.mxu0 %v980_v57  ;;  %v282_v0 = vld [vmem:[#allocation2 + $0x18] sm:$0xff] }
  0x52   : > { %1012 = vmatprep.subr.bf16.mxu1 %v980_v57 }
  0x53   : > { %448 = vmatmul.mubr.f32.vlgmr.msra.gmra.mrb[0].mxu0 %v283_v60 }
  0x54   : > { %533 = vmatmul.mubr.f32.vlgmr.msra.gmra.mrb[0].mxu1 %v285_v61  ;;  %983 = vmatpush3.bf16.msra.mxu0 %v980_v57  ;;  %v280_v61 = vld [vmem:[#allocation2 + $0x8] sm:$0xff] }
  0x55   : > { %1020 = vmatpush3.bf16.msra.mxu1 %v980_v57  ;;  %985 = vmatprep.subr.bf16.mxu0 %v984_v62 }
  0x56   : > { %1013 = vmatprep.subr.bf16.mxu1 %v984_v62  ;;  %452 = vmatprep.mubr.f32.mxu0 %v289_v1 }
  0x57   : > { %537 = vmatprep.mubr.f32.mxu1 %v291_v2  ;;  %453 = vmatmul.mubr.f32.gmra.mrb[2].mxu0 %v288_v3  ;;  %v279_v2 = vld [vmem:[#allocation2] sm:$0xff] }
  0x58   : > { %987 = vmatpush3.bf16.msra.mxu0 %v984_v62  ;;  %538 = vmatmul.mubr.f32.gmra.mrb[2].mxu1 %v290_v5 }
  0x59   : > { %1021 = vmatpush3.bf16.msra.mxu1 %v984_v62  ;;  %989 = vmatprep.subr.bf16.mxu0 %v988_v4 }
  0x5a   : > { %1014 = vmatprep.subr.bf16.mxu1 %v988_v4  ;;  %457 = vmatprep.mubr.f32.mxu0 %v294_v8 }
  0x5b   : > { %542 = vmatprep.mubr.f32.mxu1 %v296_v9  ;;  %458 = vmatmul.mubr.f32.gmra.mrb[4].mxu0 %v293_v10 }
  0x5c   : > { %991 = vmatpush3.bf16.msra.mxu0 %v988_v4  ;;  %543 = vmatmul.mubr.f32.gmra.mrb[4].mxu1 %v295_v12 }
  0x5d   : > { %1022 = vmatpush3.bf16.msra.mxu1 %v988_v4  ;;  %993 = vmatprep.subr.bf16.mxu0 %v992_v11 }
  0x5e   : > { %1015 = vmatprep.subr.bf16.mxu1 %v992_v11  ;;  %462 = vmatprep.mubr.f32.mxu0 %v299_v15 }
  0x5f   : > { %547 = vmatprep.mubr.f32.mxu1 %v301_v16  ;;  %463 = vmatmul.mubr.f32.gmra.mrb[6].mxu0 %v298_v17 }
  0x60   : > { %995 = vmatpush3.bf16.msra.mxu0 %v992_v11  ;;  %548 = vmatmul.mubr.f32.gmra.mrb[6].mxu1 %v300_v19 }
  0x61   : > { %1023 = vmatpush3.bf16.msra.mxu1 %v992_v11  ;;  %997 = vmatprep.subr.bf16.mxu0 %v996_v18 }
  0x62   : > { %1016 = vmatprep.subr.bf16.mxu1 %v996_v18  ;;  %910 = vmatprep.mubr.f32.mxu0 %v287_v22 }
  0x63   : > { %913 = vmatprep.mubr.f32.mxu1 %v297_v23 }
  0x64   : > { %999 = vmatpush3.bf16.msra.mxu0 %v996_v18 }
  0x65   : > { %1024 = vmatpush3.bf16.msra.mxu1 %v996_v18  ;;  %1001 = vmatprep.subr.bf16.mxu0 %v1000_v24 }
  0x66   : > { %1017 = vmatprep.subr.bf16.mxu1 %v1000_v24 }
  0x68   : > { %1003 = vmatpush3.bf16.msra.mxu0 %v1000_v24 }
  0x69   : > { %1025 = vmatpush3.bf16.msra.mxu1 %v1000_v24  ;;  %1005 = vmatprep.subr.bf16.mxu0 %v1004_v27 }
  0x6a   : > { %1018 = vmatprep.subr.bf16.mxu1 %v1004_v27 }
  0x6c   : > { %1007 = vmatpush3.bf16.msra.mxu0 %v1004_v27 }
  0x6d   : > { %1026 = vmatpush3.bf16.msra.mxu1 %v1004_v27  ;;  %1009 = vmatprep.subr.bf16.mxu0 %v1008_v30 }
  0x6e   : > { %1019 = vmatprep.subr.bf16.mxu1 %v1008_v30 }
  0x70   : > { %1011 = vmatpush3.bf16.msra.mxu0 %v1008_v30 }
  0x71   : > { %1027 = vmatpush3.bf16.msra.mxu1 %v1008_v30 }
  0x73   : > { %911 = vmatmul.mubr.f32.vlgmr.msra.gmra.mrb[8].mxu0 %v292_v31 }
  0x74   : > { %914 = vmatmul.mubr.f32.vlgmr.msra.gmra.mrb[8].mxu1 %v302_v32 }
 0x126   : > { %v802_v33 = vpop.f32.mrb[0].mxu0 }
 0x127   : > { %v846_v34 = vpop.f32.mrb[0].mxu1  ;;  %v803_v35 = vpop.f32.mrb[1].mxu0 }
 0x128   : > { %v804_v36 = vadd.f32 %v803_v35, %v802_v33  ;;  %v847_v37 = vpop.f32.mrb[1].mxu1 }
 0x129   : > { %v848_v38 = vadd.f32 %v847_v37, %v846_v34 }
 0x12a   : > { %v805_v39 = vpop.f32.mrb[2].mxu0 }
 0x12b   : > { %v849_v40 = vpop.f32.mrb[2].mxu1  ;;  %v806_v41 = vpop.f32.mrb[3].mxu0  ;;  %v535_v42 = vadd.f32 %v848_v38, %v804_v36 }
 0x12c   : > { %v807_v43 = vadd.f32 %v806_v41, %v805_v39  ;;  %v850_v44 = vpop.f32.mrb[3].mxu1 }
 0x12d   : > { %v851_v45 = vadd.f32 %v850_v44, %v849_v40 }
 0x12e   : > { %v808_v46 = vpop.f32.mrb[4].mxu0 }
 0x12f   : > { %v852_v47 = vpop.f32.mrb[4].mxu1  ;;  %v809_v48 = vpop.f32.mrb[5].mxu0  ;;  %v540_v49 = vadd.f32 %v851_v45, %v807_v43 }
 0x130   : > { %v810_v50 = vadd.f32 %v809_v48, %v808_v46  ;;  %v853_v51 = vpop.f32.mrb[5].mxu1 }
 0x131   : > { %v854_v52 = vadd.f32 %v853_v51, %v852_v47 }
 0x132   : > { %v811_v53 = vpop.f32.mrb[6].mxu0 }
 0x133   : > { %v855_v54 = vpop.f32.mrb[6].mxu1  ;;  %v812_v55 = vpop.f32.mrb[7].mxu0  ;;  %v545_v56 = vadd.f32 %v854_v52, %v810_v50 }
 0x134   : > { %v813_v57 = vadd.f32 %v812_v55, %v811_v53  ;;  %v856_v58 = vpop.f32.mrb[7].mxu1 }
 0x135   : > { %v857_v59 = vadd.f32 %v856_v58, %v855_v54 }
 0x137   : > { %v550_v60 = vadd.f32 %v857_v59, %v813_v57 }
 0x146   : > { %v912_v62 = vpop.f32.mrb[8].mxu0 }
 0x147   : > { %v625_v63 = vadd.f32 %v912_v62, %v540_v49  ;;  %v915_v1 = vpop.f32.mrb[8].mxu1  ;;  %v619_v3 = vpop.f32.mrb[9].mxu0  ;;  %649 = sbr.rel (%p763_p11) target bundleno = 346 (0x15a), region = 63 }
 0x148   : > { %v635_v4 = vadd.f32 %v915_v1, %v550_v60  ;;  %v620_v5 = vadd.f32 %v619_v3, %v535_v42  ;;  %v629_v7 = vpop.f32.mrb[9].mxu1 }
 0x149   : > { %v639_v8 = vadd.f32 %v625_v63, %v280_v61  ;;  %v630_v9 = vadd.f32 %v629_v7, %v545_v56 }
 0x14a   : > { %v641_v10 = vadd.f32 %v635_v4, %v282_v0  ;;  %v638_v11 = vadd.f32 %v620_v5, %v279_v2 }
 0x14b   : > { %643 = vst [vmem:[#allocation2 + $0x8] sm:$0xff] %v639_v8  ;;  %v640_v12 = vadd.f32 %v630_v9, %v281_v6 }
 0x14c   : > { %645 = vst [vmem:[#allocation2 + $0x18] sm:$0xff] %v641_v10  ;;  %642 = vst [vmem:[#allocation2] sm:$0xff] %v638_v11 }
 0x14d   : > { %644 = vst [vmem:[#allocation2 + $0x10] sm:$0xff] %v640_v12 }
 0x152   : > { %v651_v15 = vld [vmem:[#allocation2 + $0x8] sm:$0xff] }
 0x153   : > { %v650_v13 = vld [vmem:[#allocation2] sm:$0xff]  ;;  %v662_v17 = vadd.f32 %v764_v14, %v651_v15  ;;  %v653_v19 = vld [vmem:[#allocation2 + $0x18] sm:$0xff] }
 0x154   : > { %v661_v16 = vadd.f32 %v764_v14, %v650_v13  ;;  %v652_v18 = vld [vmem:[#allocation2 + $0x10] sm:$0xff]  ;;  %v664_v21 = vadd.f32 %v764_v14, %v653_v19 }
 0x155   : > { %v663_v20 = vadd.f32 %v764_v14, %v652_v18  ;;  %v666_v23 = vmax.f32 %v662_v17, 0.0 }
 0x156   : > { %v665_v22 = vmax.f32 %v661_v16, 0.0  ;;  %v668_v25 = vmax.f32 %v664_v21, 0.0 }
 0x157   : > { %v667_v24 = vmax.f32 %v663_v20, 0.0  ;;  %670 = vst [vmem:[%s1365_s3 + $0x8] sm:$0xff] %v666_v23 }
 0x158   : > { %669 = vst [vmem:[%s1365_s3] sm:$0xff] %v665_v22  ;;  %672 = vst [vmem:[%s1365_s3 + $0x18] sm:$0xff] %v668_v25 }
 0x159   : > { %671 = vst [vmem:[%s1365_s3 + $0x10] sm:$0xff] %v667_v24 }
 0x15a PF: > { %s13_s16 = sadd.s32 1, %s1109_s16   ;;  %s1366_s12 = smov %s1097_s13 }
 0x15b   : > { %p10_p12 = scmp.ge.s32.totalorder %s13_s16, 7   ;;  %s1367_s13 = smov %s1167_s20 }
 0x15c   : > { %s1368_s14 = smov %s1105_s15  ;;  %s1369_s15 = smov %s1371_s17 }
 0x15d   :  { %12 = sbr.rel (!%p10_p12) target bundleno = 3 (0x3), region = 101 }

// kernel: cnn_forward.7
= control target key start
LH: loop header
LB: loop body
LE: loop exit
PB: predicated region body
PF: predicated region fallthrough
CT: control target
= control target key end

     0   :  { %vm1575_vm0 = vmmov 0   ;;  %s2480_s1 = inlined_call_operand.vmem [shape: f32[2048,128], index: 1, kind: input, shape index: {}]   ;;  %s2481_s0 = inlined_call_operand.vmem [shape: f32[8,2048], index: 0, kind: input, shape index: {}]   ;;  %s2482_s3 = inlined_call_operand.vmem [shape: f32[128,128], index: 3, kind: input, shape index: {}]   ;;  %s2483_s2 = inlined_call_operand.vmem [shape: f32[1,128], index: 2, kind: input, shape index: {}]   ;;  %s2484_s4 = inlined_call_operand.vmem [shape: f32[1,128], index: 4, kind: input, shape index: {}]   ;;  %s2485_s5 = inlined_call_operand.vmem [shape: f32[8,128], index: 5, kind: output, shape index: {}]  }
   0x1   :  { %v52_v0 = vld [vmem:[%s2480_s1 + $0x80] sm:$0xff]  ;;  %v53_v1 = vld [vmem:[%s2480_s1 + $0x88] sm:$0xff]  ;;  %v54_v11 = vld [vmem:[%s2480_s1 + $0x90] sm:$0xff] }
   0x2   :  { %v36_v2 = vld [vmem:[%s2480_s1] sm:$0xff]  ;;  %v1291_v3 = vpack.c.bf16 %v53_v1, %v52_v0  ;;  %v37_v4 = vld [vmem:[%s2480_s1 + $0x8] sm:$0xff]  ;;  %v55_v13 = vld [vmem:[%s2480_s1 + $0x98] sm:$0xff] }
   0x3   :  { %v84_v5 = vld [vmem:[%s2480_s1 + $0x180] sm:$0xff]  ;;  %v85_v6 = vld [vmem:[%s2480_s1 + $0x188] sm:$0xff]  ;;  %v1293_v7 = vpack.c.bf16 %v37_v4, %v36_v2  ;;  %v38_v14 = vld [vmem:[%s2480_s1 + $0x10] sm:$0xff]  ;;  %v1295_v16 = vpack.c.bf16 %v55_v13, %v54_v11 }
   0x4   :  { %v1323_v8 = vpack.c.bf16 %v85_v6, %v84_v5  ;;  %v68_v9 = vld [vmem:[%s2480_s1 + $0x100] sm:$0xff]  ;;  %v69_v10 = vld [vmem:[%s2480_s1 + $0x108] sm:$0xff]  ;;  %1292 = vmatprep.subr.bf16.mxu0 %v1291_v3  ;;  %v39_v15 = vld [vmem:[%s2480_s1 + $0x18] sm:$0xff] }
   0x5   :  { %v1325_v12 = vpack.c.bf16 %v69_v10, %v68_v9  ;;  %1294 = vmatpush3.bf16.msra.mxu0 %v1293_v7  ;;  %v1297_v17 = vpack.c.bf16 %v39_v15, %v38_v14  ;;  %v86_v18 = vld [vmem:[%s2480_s1 + $0x190] sm:$0xff]  ;;  %v87_v19 = vld [vmem:[%s2480_s1 + $0x198] sm:$0xff]  ;;  %v56_v23 = vld [vmem:[%s2480_s1 + $0xa0] sm:$0xff] }
   0x6   :  { %1324 = vmatprep.subr.bf16.mxu1 %v1323_v8  ;;  %v70_v20 = vld [vmem:[%s2480_s1 + $0x110] sm:$0xff]  ;;  %v1327_v21 = vpack.c.bf16 %v87_v19, %v86_v18  ;;  %v71_v22 = vld [vmem:[%s2480_s1 + $0x118] sm:$0xff]  ;;  %v57_v24 = vld [vmem:[%s2480_s1 + $0xa8] sm:$0xff]  ;;  %1296 = vmatprep.subr.bf16.mxu0 %v1295_v16 }
   0x7   :  { %1326 = vmatpush3.bf16.msra.mxu1 %v1325_v12  ;;  %v1329_v25 = vpack.c.bf16 %v71_v22, %v70_v20  ;;  %v1299_v26 = vpack.c.bf16 %v57_v24, %v56_v23  ;;  %v40_v27 = vld [vmem:[%s2480_s1 + $0x20] sm:$0xff]  ;;  %v41_v28 = vld [vmem:[%s2480_s1 + $0x28] sm:$0xff]  ;;  %v58_v35 = vld [vmem:[%s2480_s1 + $0xb0] sm:$0xff] }
   0x8   :  { %v88_v29 = vld [vmem:[%s2480_s1 + $0x1a0] sm:$0xff]  ;;  %1328 = vmatprep.subr.bf16.mxu1 %v1327_v21  ;;  %v89_v30 = vld [vmem:[%s2480_s1 + $0x1a8] sm:$0xff]  ;;  %v1301_v33 = vpack.c.bf16 %v41_v28, %v40_v27  ;;  %v59_v36 = vld [vmem:[%s2480_s1 + $0xb8] sm:$0xff] }
   0x9   :  { %v72_v31 = vld [vmem:[%s2480_s1 + $0x120] sm:$0xff]  ;;  %v73_v32 = vld [vmem:[%s2480_s1 + $0x128] sm:$0xff]  ;;  %1298 = vmatpush3.bf16.msra.mxu0 %v1297_v17  ;;  %v1331_v34 = vpack.c.bf16 %v89_v30, %v88_v29  ;;  %v42_v37 = vld [vmem:[%s2480_s1 + $0x30] sm:$0xff]  ;;  %v1303_v39 = vpack.c.bf16 %v59_v36, %v58_v35 }
   0xa   :  { %1300 = vmatprep.subr.bf16.mxu0 %v1299_v26  ;;  %v1333_v38 = vpack.c.bf16 %v73_v32, %v72_v31  ;;  %v43_v40 = vld [vmem:[%s2480_s1 + $0x38] sm:$0xff]  ;;  %v90_v41 = vld [vmem:[%s2480_s1 + $0x1b0] sm:$0xff]  ;;  %v60_v46 = vld [vmem:[%s2480_s1 + $0xc0] sm:$0xff] }
   0xb   :  { %1330 = vmatpush3.bf16.msra.mxu1 %v1329_v25  ;;  %v91_v42 = vld [vmem:[%s2480_s1 + $0x1b8] sm:$0xff]  ;;  %v74_v44 = vld [vmem:[%s2480_s1 + $0x130] sm:$0xff]  ;;  %v61_v47 = vld [vmem:[%s2480_s1 + $0xc8] sm:$0xff]  ;;  %v1305_v48 = vpack.c.bf16 %v43_v40, %v42_v37 }
   0xc   :  { %1332 = vmatprep.subr.bf16.mxu1 %v1331_v34  ;;  %v1335_v43 = vpack.c.bf16 %v91_v42, %v90_v41  ;;  %v75_v45 = vld [vmem:[%s2480_s1 + $0x138] sm:$0xff]  ;;  %v92_v49 = vld [vmem:[%s2480_s1 + $0x1c0] sm:$0xff]  ;;  %v93_v50 = vld [vmem:[%s2480_s1 + $0x1c8] sm:$0xff]  ;;  %v1307_v52 = vpack.c.bf16 %v61_v47, %v60_v46 }
   0xd   :  { %1302 = vmatpush3.bf16.msra.mxu0 %v1301_v33  ;;  %v1337_v51 = vpack.c.bf16 %v75_v45, %v74_v44  ;;  %v44_v53 = vld [vmem:[%s2480_s1 + $0x40] sm:$0xff]  ;;  %v45_v54 = vld [vmem:[%s2480_s1 + $0x48] sm:$0xff]  ;;  %v1339_v56 = vpack.c.bf16 %v93_v50, %v92_v49  ;;  %v62_v58 = vld [vmem:[%s2480_s1 + $0xd0] sm:$0xff] }
   0xe   :  { %1304 = vmatprep.subr.bf16.mxu0 %v1303_v39  ;;  %v76_v55 = vld [vmem:[%s2480_s1 + $0x140] sm:$0xff]  ;;  %v77_v57 = vld [vmem:[%s2480_s1 + $0x148] sm:$0xff]  ;;  %v63_v59 = vld [vmem:[%s2480_s1 + $0xd8] sm:$0xff]  ;;  %v1309_v62 = vpack.c.bf16 %v45_v54, %v44_v53 }
   0xf   :  { %1334 = vmatpush3.bf16.msra.mxu1 %v1333_v38  ;;  %v94_v60 = vld [vmem:[%s2480_s1 + $0x1d0] sm:$0xff]  ;;  %v95_v61 = vld [vmem:[%s2480_s1 + $0x1d8] sm:$0xff]  ;;  %v1341_v63 = vpack.c.bf16 %v77_v57, %v76_v55  ;;  %v1311_v0 = vpack.c.bf16 %v63_v59, %v62_v58  ;;  %v64_v6 = vld [vmem:[%s2480_s1 + $0xe0] sm:$0xff] }
  0x10   :  { %1336 = vmatprep.subr.bf16.mxu1 %v1335_v43  ;;  %v46_v1 = vld [vmem:[%s2480_s1 + $0x50] sm:$0xff]  ;;  %v47_v2 = vld [vmem:[%s2480_s1 + $0x58] sm:$0xff]  ;;  %v1343_v4 = vpack.c.bf16 %v95_v61, %v94_v60  ;;  %v65_v7 = vld [vmem:[%s2480_s1 + $0xe8] sm:$0xff] }
  0x11   :  { %1306 = vmatpush3.bf16.msra.mxu0 %v1305_v48  ;;  %v78_v3 = vld [vmem:[%s2480_s1 + $0x150] sm:$0xff]  ;;  %v79_v5 = vld [vmem:[%s2480_s1 + $0x158] sm:$0xff]  ;;  %v96_v8 = vld [vmem:[%s2480_s1 + $0x1e0] sm:$0xff]  ;;  %v1313_v10 = vpack.c.bf16 %v47_v2, %v46_v1  ;;  %v1315_v14 = vpack.c.bf16 %v65_v7, %v64_v6 }
  0x12   :  { %1308 = vmatprep.subr.bf16.mxu0 %v1307_v52  ;;  %v97_v9 = vld [vmem:[%s2480_s1 + $0x1e8] sm:$0xff]  ;;  %v48_v11 = vld [vmem:[%s2480_s1 + $0x60] sm:$0xff]  ;;  %v1345_v13 = vpack.c.bf16 %v79_v5, %v78_v3  ;;  %v66_v19 = vld [vmem:[%s2480_s1 + $0xf0] sm:$0xff] }
  0x13   :  { %1338 = vmatpush3.bf16.msra.mxu1 %v1337_v51  ;;  %v49_v12 = vld [vmem:[%s2480_s1 + $0x68] sm:$0xff]  ;;  %v80_v15 = vld [vmem:[%s2480_s1 + $0x160] sm:$0xff]  ;;  %v1347_v18 = vpack.c.bf16 %v97_v9, %v96_v8  ;;  %v67_v20 = vld [vmem:[%s2480_s1 + $0xf8] sm:$0xff] }
  0x14   :  { %1340 = vmatprep.subr.bf16.mxu1 %v1339_v56  ;;  %v81_v16 = vld [vmem:[%s2480_s1 + $0x168] sm:$0xff]  ;;  %v23_v21 = vld [vmem:[%s2481_s0 + $0x18] sm:$0xff]  ;;  %v98_v22 = vld [vmem:[%s2480_s1 + $0x1f0] sm:$0xff]  ;;  %v1317_v24 = vpack.c.bf16 %v49_v12, %v48_v11  ;;  %v1319_v26 = vpack.c.bf16 %v67_v20, %v66_v19 }
  0x15   :  { %1310 = vmatpush3.bf16.msra.mxu0 %v1309_v62  ;;  %v21_v17 = vld [vmem:[%s2481_s0 + $0x8] sm:$0xff]  ;;  %v99_v23 = vld [vmem:[%s2480_s1 + $0x1f8] sm:$0xff]  ;;  %433 = vmatprep.mubr.f32.mxu1 %v23_v21  ;;  %v1349_v25 = vpack.c.bf16 %v81_v16, %v80_v15  ;;  %v50_v27 = vld [vmem:[%s2480_s1 + $0x70] sm:$0xff] }
  0x16   :  { %1312 = vmatprep.subr.bf16.mxu0 %v1311_v0  ;;  %363 = vmatprep.mubr.f32.mxu0 %v21_v17  ;;  %v51_v28 = vld [vmem:[%s2480_s1 + $0x78] sm:$0xff]  ;;  %v82_v29 = vld [vmem:[%s2480_s1 + $0x170] sm:$0xff]  ;;  %v1351_v30 = vpack.c.bf16 %v99_v23, %v98_v22  ;;  %v116_v32 = vld [vmem:[%s2480_s1 + $0x280] sm:$0xff] }
  0x17   :  { %1342 = vmatpush3.bf16.msra.mxu1 %v1341_v63  ;;  %v83_v31 = vld [vmem:[%s2480_s1 + $0x178] sm:$0xff]  ;;  %v117_v33 = vld [vmem:[%s2480_s1 + $0x288] sm:$0xff]  ;;  %v148_v34 = vld [vmem:[%s2480_s1 + $0x380] sm:$0xff]  ;;  %v1321_v36 = vpack.c.bf16 %v51_v28, %v50_v27 }
  0x18   :  { %1344 = vmatprep.subr.bf16.mxu1 %v1343_v4  ;;  %v149_v35 = vld [vmem:[%s2480_s1 + $0x388] sm:$0xff]  ;;  %v1353_v37 = vpack.c.bf16 %v83_v31, %v82_v29  ;;  %v1355_v38 = vpack.c.bf16 %v117_v33, %v116_v32  ;;  %v100_v39 = vld [vmem:[%s2480_s1 + $0x200] sm:$0xff]  ;;  %v118_v44 = vld [vmem:[%s2480_s1 + $0x290] sm:$0xff] }
  0x19   :  { %1314 = vmatpush3.bf16.msra.mxu0 %v1313_v10  ;;  %v101_v40 = vld [vmem:[%s2480_s1 + $0x208] sm:$0xff]  ;;  %v132_v41 = vld [vmem:[%s2480_s1 + $0x300] sm:$0xff]  ;;  %v1387_v42 = vpack.c.bf16 %v149_v35, %v148_v34  ;;  %v119_v45 = vld [vmem:[%s2480_s1 + $0x298] sm:$0xff] }
  0x1a   :  { %1316 = vmatprep.subr.bf16.mxu0 %v1315_v14  ;;  %v133_v43 = vld [vmem:[%s2480_s1 + $0x308] sm:$0xff]  ;;  %v150_v46 = vld [vmem:[%s2480_s1 + $0x390] sm:$0xff]  ;;  %v151_v47 = vld [vmem:[%s2480_s1 + $0x398] sm:$0xff]  ;;  %v1357_v49 = vpack.c.bf16 %v101_v40, %v100_v39  ;;  %v1359_v52 = vpack.c.bf16 %v119_v45, %v118_v44 }
  0x1b   :  { %1346 = vmatpush3.bf16.msra.mxu1 %v1345_v13  ;;  %v20_v48 = vld [vmem:[%s2481_s0] sm:$0xff]  ;;  %v22_v50 = vld [vmem:[%s2481_s0 + $0x10] sm:$0xff]  ;;  %v1389_v51 = vpack.c.bf16 %v133_v43, %v132_v41  ;;  %v103_v54 = vld [vmem:[%s2480_s1 + $0x218] sm:$0xff]  ;;  %v1391_v56 = vpack.c.bf16 %v151_v47, %v150_v46 }
  0x1c   :  { %1348 = vmatprep.subr.bf16.mxu1 %v1347_v18  ;;  %v102_v53 = vld [vmem:[%s2480_s1 + $0x210] sm:$0xff]  ;;  %v135_v57 = vld [vmem:[%s2480_s1 + $0x318] sm:$0xff]  ;;  %v120_v58 = vld [vmem:[%s2480_s1 + $0x2a0] sm:$0xff] }
  0x1d   :  { %1318 = vmatpush3.bf16.msra.mxu0 %v1317_v24  ;;  %v134_v55 = vld [vmem:[%s2480_s1 + $0x310] sm:$0xff]  ;;  %v121_v59 = vld [vmem:[%s2480_s1 + $0x2a8] sm:$0xff]  ;;  %v152_v60 = vld [vmem:[%s2480_s1 + $0x3a0] sm:$0xff]  ;;  %v1361_v62 = vpack.c.bf16 %v103_v54, %v102_v53 }
  0x1e   :  { %1320 = vmatprep.subr.bf16.mxu0 %v1319_v26  ;;  %v153_v61 = vld [vmem:[%s2480_s1 + $0x3a8] sm:$0xff]  ;;  %v1393_v63 = vpack.c.bf16 %v135_v57, %v134_v55  ;;  %v1363_v0 = vpack.c.bf16 %v121_v59, %v120_v58  ;;  %v104_v1 = vld [vmem:[%s2480_s1 + $0x220] sm:$0xff]  ;;  %v122_v6 = vld [vmem:[%s2480_s1 + $0x2b0] sm:$0xff] }
  0x1f   :  { %1350 = vmatpush3.bf16.msra.mxu1 %v1349_v25  ;;  %v105_v2 = vld [vmem:[%s2480_s1 + $0x228] sm:$0xff]  ;;  %v136_v3 = vld [vmem:[%s2480_s1 + $0x320] sm:$0xff]  ;;  %v1395_v4 = vpack.c.bf16 %v153_v61, %v152_v60  ;;  %v123_v7 = vld [vmem:[%s2480_s1 + $0x2b8] sm:$0xff] }
  0x20   :  { %1352 = vmatprep.subr.bf16.mxu1 %v1351_v30  ;;  %v137_v5 = vld [vmem:[%s2480_s1 + $0x328] sm:$0xff]  ;;  %v154_v8 = vld [vmem:[%s2480_s1 + $0x3b0] sm:$0xff]  ;;  %v155_v9 = vld [vmem:[%s2480_s1 + $0x3b8] sm:$0xff]  ;;  %v1365_v10 = vpack.c.bf16 %v105_v2, %v104_v1  ;;  %v1367_v12 = vpack.c.bf16 %v123_v7, %v122_v6 }
  0x21   :  { %1322 = vmatpush3.bf16.msra.mxu0 %v1321_v36  ;;  %v1397_v11 = vpack.c.bf16 %v137_v5, %v136_v3  ;;  %v106_v13 = vld [vmem:[%s2480_s1 + $0x230] sm:$0xff]  ;;  %v107_v14 = vld [vmem:[%s2480_s1 + $0x238] sm:$0xff]  ;;  %v1399_v16 = vpack.c.bf16 %v155_v9, %v154_v8  ;;  %v124_v18 = vld [vmem:[%s2480_s1 + $0x2c0] sm:$0xff] }
  0x22   :  { %1356 = vmatprep.subr.bf16.mxu0 %v1355_v38  ;;  %v138_v15 = vld [vmem:[%s2480_s1 + $0x330] sm:$0xff]  ;;  %v139_v17 = vld [vmem:[%s2480_s1 + $0x338] sm:$0xff]  ;;  %v125_v19 = vld [vmem:[%s2480_s1 + $0x2c8] sm:$0xff]  ;;  %v1369_v22 = vpack.c.bf16 %v107_v14, %v106_v13 }
  0x23   :  { %1354 = vmatpush3.bf16.msra.mxu1 %v1353_v37  ;;  %v156_v20 = vld [vmem:[%s2480_s1 + $0x3c0] sm:$0xff]  ;;  %v157_v21 = vld [vmem:[%s2480_s1 + $0x3c8] sm:$0xff]  ;;  %v1401_v25 = vpack.c.bf16 %v139_v17, %v138_v15  ;;  %v1371_v26 = vpack.c.bf16 %v125_v19, %v124_v18  ;;  %v27_v29 = vld [vmem:[%s2481_s0 + $0x38] sm:$0xff] }
  0x24   :  { %1388 = vmatprep.subr.bf16.mxu1 %v1387_v42  ;;  %364 = vmatmul.mubr.f32.vlgmr.msra.gmra.mrb[0].mxu0 %v20_v48  ;;  %v108_v23 = vld [vmem:[%s2480_s1 + $0x240] sm:$0xff]  ;;  %v25_v24 = vld [vmem:[%s2481_s0 + $0x28] sm:$0xff]  ;;  %v1403_v30 = vpack.c.bf16 %v157_v21, %v156_v20  ;;  %v126_v32 = vld [vmem:[%s2480_s1 + $0x2d0] sm:$0xff] }
  0x25   :  { %1358 = vmatpush3.bf16.msra.mxu0 %v1357_v49  ;;  %v109_v27 = vld [vmem:[%s2480_s1 + $0x248] sm:$0xff]  ;;  %v140_v28 = vld [vmem:[%s2480_s1 + $0x340] sm:$0xff]  ;;  %v127_v33 = vld [vmem:[%s2480_s1 + $0x2d8] sm:$0xff]  ;;  %503 = vmatprep.mubr.f32.mxu0 %v25_v24 }
  0x26   :  { %434 = vmatmul.mubr.f32.vlgmr.msra.gmra.mrb[0].mxu1 %v22_v50  ;;  %1360 = vmatprep.subr.bf16.mxu0 %v1359_v52  ;;  %v141_v31 = vld [vmem:[%s2480_s1 + $0x348] sm:$0xff]  ;;  %v158_v34 = vld [vmem:[%s2480_s1 + $0x3d0] sm:$0xff]  ;;  %v159_v35 = vld [vmem:[%s2480_s1 + $0x3d8] sm:$0xff]  ;;  %v1373_v36 = vpack.c.bf16 %v109_v27, %v108_v23  ;;  %v1375_v38 = vpack.c.bf16 %v127_v33, %v126_v32 }
  0x27   :  { %1390 = vmatpush3.bf16.msra.mxu1 %v1389_v51  ;;  %573 = vmatprep.mubr.f32.mxu1 %v27_v29  ;;  %v1405_v37 = vpack.c.bf16 %v141_v31, %v140_v28  ;;  %v110_v39 = vld [vmem:[%s2480_s1 + $0x250] sm:$0xff]  ;;  %v111_v40 = vld [vmem:[%s2480_s1 + $0x258] sm:$0xff]  ;;  %v1407_v42 = vpack.c.bf16 %v159_v35, %v158_v34  ;;  %v128_v44 = vld [vmem:[%s2480_s1 + $0x2e0] sm:$0xff] }
  0x28   :  { %1392 = vmatprep.subr.bf16.mxu1 %v1391_v56  ;;  %v142_v41 = vld [vmem:[%s2480_s1 + $0x350] sm:$0xff]  ;;  %v143_v43 = vld [vmem:[%s2480_s1 + $0x358] sm:$0xff]  ;;  %v129_v45 = vld [vmem:[%s2480_s1 + $0x2e8] sm:$0xff]  ;;  %v1377_v48 = vpack.c.bf16 %v111_v40, %v110_v39 }
  0x29   :  { %1362 = vmatpush3.bf16.msra.mxu0 %v1361_v62  ;;  %v160_v46 = vld [vmem:[%s2480_s1 + $0x3e0] sm:$0xff]  ;;  %v161_v47 = vld [vmem:[%s2480_s1 + $0x3e8] sm:$0xff]  ;;  %v1409_v49 = vpack.c.bf16 %v143_v43, %v142_v41  ;;  %v1379_v50 = vpack.c.bf16 %v129_v45, %v128_v44  ;;  %v130_v56 = vld [vmem:[%s2480_s1 + $0x2f0] sm:$0xff] }
  0x2a   :  { %1364 = vmatprep.subr.bf16.mxu0 %v1363_v0  ;;  %v112_v51 = vld [vmem:[%s2480_s1 + $0x260] sm:$0xff]  ;;  %v113_v52 = vld [vmem:[%s2480_s1 + $0x268] sm:$0xff]  ;;  %v1411_v54 = vpack.c.bf16 %v161_v47, %v160_v46  ;;  %v131_v57 = vld [vmem:[%s2480_s1 + $0x2f8] sm:$0xff] }
  0x2b   :  { %1394 = vmatpush3.bf16.msra.mxu1 %v1393_v63  ;;  %v144_v53 = vld [vmem:[%s2480_s1 + $0x360] sm:$0xff]  ;;  %v145_v55 = vld [vmem:[%s2480_s1 + $0x368] sm:$0xff]  ;;  %v162_v58 = vld [vmem:[%s2480_s1 + $0x3f0] sm:$0xff]  ;;  %v1381_v60 = vpack.c.bf16 %v113_v52, %v112_v51  ;;  %v1383_v62 = vpack.c.bf16 %v131_v57, %v130_v56 }
  0x2c   :  { %1396 = vmatprep.subr.bf16.mxu1 %v1395_v4  ;;  %v163_v59 = vld [vmem:[%s2480_s1 + $0x3f8] sm:$0xff]  ;;  %v1413_v61 = vpack.c.bf16 %v145_v55, %v144_v53  ;;  %v114_v63 = vld [vmem:[%s2480_s1 + $0x270] sm:$0xff]  ;;  %v180_v4 = vld [vmem:[%s2480_s1 + $0x480] sm:$0xff] }
  0x2d   :  { %1366 = vmatpush3.bf16.msra.mxu0 %v1365_v10  ;;  %v115_v0 = vld [vmem:[%s2480_s1 + $0x278] sm:$0xff]  ;;  %v146_v1 = vld [vmem:[%s2480_s1 + $0x370] sm:$0xff]  ;;  %v1415_v2 = vpack.c.bf16 %v163_v59, %v162_v58  ;;  %v181_v5 = vld [vmem:[%s2480_s1 + $0x488] sm:$0xff] }
  0x2e   :  { %1368 = vmatprep.subr.bf16.mxu0 %v1367_v12  ;;  %v147_v3 = vld [vmem:[%s2480_s1 + $0x378] sm:$0xff]  ;;  %v212_v6 = vld [vmem:[%s2480_s1 + $0x580] sm:$0xff]  ;;  %v213_v7 = vld [vmem:[%s2480_s1 + $0x588] sm:$0xff]  ;;  %v1385_v8 = vpack.c.bf16 %v115_v0, %v114_v63  ;;  %v1419_v10 = vpack.c.bf16 %v181_v5, %v180_v4 }
  0x2f   :  { %1398 = vmatpush3.bf16.msra.mxu1 %v1397_v11  ;;  %v1417_v9 = vpack.c.bf16 %v147_v3, %v146_v1  ;;  %v164_v11 = vld [vmem:[%s2480_s1 + $0x400] sm:$0xff]  ;;  %v165_v12 = vld [vmem:[%s2480_s1 + $0x408] sm:$0xff]  ;;  %v1451_v14 = vpack.c.bf16 %v213_v7, %v212_v6  ;;  %v183_v17 = vld [vmem:[%s2480_s1 + $0x498] sm:$0xff] }
  0x30   :  { %1400 = vmatprep.subr.bf16.mxu1 %v1399_v16  ;;  %v196_v13 = vld [vmem:[%s2480_s1 + $0x500] sm:$0xff]  ;;  %v197_v15 = vld [vmem:[%s2480_s1 + $0x508] sm:$0xff]  ;;  %v182_v16 = vld [vmem:[%s2480_s1 + $0x490] sm:$0xff]  ;;  %v1421_v21 = vpack.c.bf16 %v165_v12, %v164_v11 }
  0x31   :  { %1370 = vmatpush3.bf16.msra.mxu0 %v1369_v22  ;;  %v214_v18 = vld [vmem:[%s2480_s1 + $0x590] sm:$0xff]  ;;  %v215_v19 = vld [vmem:[%s2480_s1 + $0x598] sm:$0xff]  ;;  %v24_v20 = vld [vmem:[%s2481_s0 + $0x20] sm:$0xff]  ;;  %v1453_v23 = vpack.c.bf16 %v197_v15, %v196_v13  ;;  %v1423_v24 = vpack.c.bf16 %v183_v17, %v182_v16 }
  0x32   :  { %1372 = vmatprep.subr.bf16.mxu0 %v1371_v26  ;;  %v26_v22 = vld [vmem:[%s2481_s0 + $0x30] sm:$0xff]  ;;  %v167_v26 = vld [vmem:[%s2480_s1 + $0x418] sm:$0xff]  ;;  %v1455_v28 = vpack.c.bf16 %v215_v19, %v214_v18  ;;  %v185_v31 = vld [vmem:[%s2480_s1 + $0x4a8] sm:$0xff] }
  0x33   :  { %1402 = vmatpush3.bf16.msra.mxu1 %v1401_v25  ;;  %v166_v25 = vld [vmem:[%s2480_s1 + $0x410] sm:$0xff]  ;;  %v199_v29 = vld [vmem:[%s2480_s1 + $0x518] sm:$0xff]  ;;  %v216_v32 = vld [vmem:[%s2480_s1 + $0x5a0] sm:$0xff] }
  0x34   :  { %1404 = vmatprep.subr.bf16.mxu1 %v1403_v30  ;;  %v198_v27 = vld [vmem:[%s2480_s1 + $0x510] sm:$0xff]  ;;  %v184_v30 = vld [vmem:[%s2480_s1 + $0x4a0] sm:$0xff]  ;;  %v217_v33 = vld [vmem:[%s2480_s1 + $0x5a8] sm:$0xff]  ;;  %v1425_v35 = vpack.c.bf16 %v167_v26, %v166_v25 }
  0x35   :  { %1374 = vmatpush3.bf16.msra.mxu0 %v1373_v36  ;;  %v29_v34 = vld [vmem:[%s2481_s0 + $0x48] sm:$0xff]  ;;  %v31_v36 = vld [vmem:[%s2481_s0 + $0x58] sm:$0xff]  ;;  %v168_v39 = vld [vmem:[%s2480_s1 + $0x420] sm:$0xff] }
  0x36   :  { %1376 = vmatprep.subr.bf16.mxu0 %v1375_v38  ;;  %v1427_v38 = vpack.c.bf16 %v185_v31, %v184_v30  ;;  %v169_v40 = vld [vmem:[%s2480_s1 + $0x428] sm:$0xff]  ;;  %v200_v41 = vld [vmem:[%s2480_s1 + $0x520] sm:$0xff]  ;;  %v186_v44 = vld [vmem:[%s2480_s1 + $0x4b0] sm:$0xff] }
  0x37   :  { %1406 = vmatpush3.bf16.msra.mxu1 %v1405_v37  ;;  %v1457_v37 = vpack.c.bf16 %v199_v29, %v198_v27  ;;  %v201_v43 = vld [vmem:[%s2480_s1 + $0x528] sm:$0xff]  ;;  %v187_v45 = vld [vmem:[%s2480_s1 + $0x4b8] sm:$0xff]  ;;  %v218_v46 = vld [vmem:[%s2480_s1 + $0x5b0] sm:$0xff] }
  0x38   :  { %1408 = vmatprep.subr.bf16.mxu1 %v1407_v42  ;;  %v1459_v42 = vpack.c.bf16 %v217_v33, %v216_v32  ;;  %v219_v47 = vld [vmem:[%s2480_s1 + $0x5b8] sm:$0xff]  ;;  %v170_v51 = vld [vmem:[%s2480_s1 + $0x430] sm:$0xff]  ;;  %v188_v56 = vld [vmem:[%s2480_s1 + $0x4c0] sm:$0xff] }
  0x39   :  { %1378 = vmatpush3.bf16.msra.mxu0 %v1377_v48  ;;  %v1429_v48 = vpack.c.bf16 %v169_v40, %v168_v39  ;;  %v171_v52 = vld [vmem:[%s2480_s1 + $0x438] sm:$0xff]  ;;  %v202_v53 = vld [vmem:[%s2480_s1 + $0x530] sm:$0xff]  ;;  %v189_v57 = vld [vmem:[%s2480_s1 + $0x4c8] sm:$0xff] }
  0x3a   :  { %1380 = vmatprep.subr.bf16.mxu0 %v1379_v50  ;;  %v1431_v50 = vpack.c.bf16 %v187_v45, %v186_v44  ;;  %v203_v55 = vld [vmem:[%s2480_s1 + $0x538] sm:$0xff]  ;;  %v220_v58 = vld [vmem:[%s2480_s1 + $0x5c0] sm:$0xff]  ;;  %v221_v59 = vld [vmem:[%s2480_s1 + $0x5c8] sm:$0xff] }
  0x3b   :  { %1410 = vmatpush3.bf16.msra.mxu1 %v1409_v49  ;;  %v1461_v49 = vpack.c.bf16 %v201_v43, %v200_v41  ;;  %v172_v63 = vld [vmem:[%s2480_s1 + $0x440] sm:$0xff]  ;;  %v173_v0 = vld [vmem:[%s2480_s1 + $0x448] sm:$0xff]  ;;  %v190_v4 = vld [vmem:[%s2480_s1 + $0x4d0] sm:$0xff] }
  0x3c   :  { %1412 = vmatprep.subr.bf16.mxu1 %v1411_v54  ;;  %v1463_v54 = vpack.c.bf16 %v219_v47, %v218_v46  ;;  %v204_v1 = vld [vmem:[%s2480_s1 + $0x540] sm:$0xff]  ;;  %v205_v3 = vld [vmem:[%s2480_s1 + $0x548] sm:$0xff]  ;;  %v191_v5 = vld [vmem:[%s2480_s1 + $0x4d8] sm:$0xff] }
  0x3d   :  { %1382 = vmatpush3.bf16.msra.mxu0 %v1381_v60  ;;  %v1433_v60 = vpack.c.bf16 %v171_v52, %v170_v51  ;;  %v222_v6 = vld [vmem:[%s2480_s1 + $0x5d0] sm:$0xff]  ;;  %v223_v7 = vld [vmem:[%s2480_s1 + $0x5d8] sm:$0xff]  ;;  %v192_v16 = vld [vmem:[%s2480_s1 + $0x4e0] sm:$0xff] }
  0x3e   :  { %1384 = vmatprep.subr.bf16.mxu0 %v1383_v62  ;;  %v1435_v62 = vpack.c.bf16 %v189_v57, %v188_v56  ;;  %v174_v11 = vld [vmem:[%s2480_s1 + $0x450] sm:$0xff]  ;;  %v175_v12 = vld [vmem:[%s2480_s1 + $0x458] sm:$0xff]  ;;  %v193_v17 = vld [vmem:[%s2480_s1 + $0x4e8] sm:$0xff] }
  0x3f   :  { %1414 = vmatpush3.bf16.msra.mxu1 %v1413_v61  ;;  %v1465_v61 = vpack.c.bf16 %v203_v55, %v202_v53  ;;  %v206_v13 = vld [vmem:[%s2480_s1 + $0x550] sm:$0xff]  ;;  %v207_v15 = vld [vmem:[%s2480_s1 + $0x558] sm:$0xff]  ;;  %v224_v18 = vld [vmem:[%s2480_s1 + $0x5e0] sm:$0xff] }
  0x40   :  { %1416 = vmatprep.subr.bf16.mxu1 %v1415_v2  ;;  %v1467_v2 = vpack.c.bf16 %v221_v59, %v220_v58  ;;  %v225_v19 = vld [vmem:[%s2480_s1 + $0x5e8] sm:$0xff]  ;;  %v208_v25 = vld [vmem:[%s2480_s1 + $0x560] sm:$0xff]  ;;  %v195_v29 = vld [vmem:[%s2480_s1 + $0x4f8] sm:$0xff] }
  0x41   :  { %1386 = vmatpush3.bf16.msra.mxu0 %v1385_v8  ;;  %v1437_v8 = vpack.c.bf16 %v173_v0, %v172_v63  ;;  %v1475_v26 = vpack.c.bf16 %v225_v19, %v224_v18  ;;  %v209_v27 = vld [vmem:[%s2480_s1 + $0x568] sm:$0xff]  ;;  %v226_v30 = vld [vmem:[%s2480_s1 + $0x5f0] sm:$0xff]  ;;  %v227_v31 = vld [vmem:[%s2480_s1 + $0x5f8] sm:$0xff] }
  0x42   :  { %1420 = vmatprep.subr.bf16.mxu0 %v1419_v10  ;;  %v1439_v10 = vpack.c.bf16 %v191_v5, %v190_v4  ;;  %v1477_v33 = vpack.c.bf16 %v209_v27, %v208_v25  ;;  %v211_v39 = vld [vmem:[%s2480_s1 + $0x578] sm:$0xff]  ;;  %v244_v40 = vld [vmem:[%s2480_s1 + $0x680] sm:$0xff]  ;;  %v245_v41 = vld [vmem:[%s2480_s1 + $0x688] sm:$0xff] }
  0x43   :  { %1418 = vmatpush3.bf16.msra.mxu1 %v1417_v9  ;;  %v1469_v9 = vpack.c.bf16 %v205_v3, %v204_v1  ;;  %v277_v43 = vld [vmem:[%s2480_s1 + $0x788] sm:$0xff]  ;;  %v1483_v46 = vpack.c.bf16 %v245_v41, %v244_v40  ;;  %v228_v47 = vld [vmem:[%s2480_s1 + $0x600] sm:$0xff]  ;;  %v246_v52 = vld [vmem:[%s2480_s1 + $0x690] sm:$0xff] }
  0x44   :  { %1452 = vmatprep.subr.bf16.mxu1 %v1451_v14  ;;  %504 = vmatmul.mubr.f32.vlgmr.msra.gmra.mrb[2].mxu0 %v24_v20  ;;  %v1471_v14 = vpack.c.bf16 %v223_v7, %v222_v6  ;;  %v1441_v20 = vpack.c.bf16 %v175_v12, %v174_v11  ;;  %v261_v51 = vld [vmem:[%s2480_s1 + $0x708] sm:$0xff]  ;;  %v247_v53 = vld [vmem:[%s2480_s1 + $0x698] sm:$0xff]  ;;  %v28_v56 = vld [vmem:[%s2481_s0 + $0x40] sm:$0xff] }
  0x45   :  { %1422 = vmatpush3.bf16.msra.mxu0 %v1421_v21  ;;  %643 = vmatprep.mubr.f32.mxu0 %v29_v34  ;;  %v1473_v21 = vpack.c.bf16 %v207_v15, %v206_v13  ;;  %v279_v55 = vld [vmem:[%s2480_s1 + $0x798] sm:$0xff]  ;;  %v30_v58 = vld [vmem:[%s2481_s0 + $0x50] sm:$0xff]  ;;  %v249_v3 = vld [vmem:[%s2480_s1 + $0x6a8] sm:$0xff] }
  0x46   :  { %574 = vmatmul.mubr.f32.vlgmr.msra.gmra.mrb[2].mxu1 %v26_v22  ;;  %1424 = vmatprep.subr.bf16.mxu0 %v1423_v24  ;;  %v1443_v22 = vpack.c.bf16 %v193_v17, %v192_v16  ;;  %v177_v24 = vld [vmem:[%s2480_s1 + $0x468] sm:$0xff]  ;;  %v262_v63 = vld [vmem:[%s2480_s1 + $0x710] sm:$0xff]  ;;  %v263_v1 = vld [vmem:[%s2480_s1 + $0x718] sm:$0xff] }
  0x47   :  { %1454 = vmatpush3.bf16.msra.mxu1 %v1453_v23  ;;  %713 = vmatprep.mubr.f32.mxu1 %v31_v36  ;;  %v176_v23 = vld [vmem:[%s2480_s1 + $0x460] sm:$0xff]  ;;  %v179_v36 = vld [vmem:[%s2480_s1 + $0x478] sm:$0xff]  ;;  %v281_v5 = vld [vmem:[%s2480_s1 + $0x7a8] sm:$0xff] }
  0x48   :  { %1456 = vmatprep.subr.bf16.mxu1 %v1455_v28  ;;  %v194_v28 = vld [vmem:[%s2480_s1 + $0x4f0] sm:$0xff]  ;;  %v1445_v32 = vpack.c.bf16 %v177_v24, %v176_v23  ;;  %v280_v4 = vld [vmem:[%s2480_s1 + $0x7a0] sm:$0xff]  ;;  %v33_v6 = vld [vmem:[%s2481_s0 + $0x68] sm:$0xff] }
  0x49   :  { %1426 = vmatpush3.bf16.msra.mxu0 %v1425_v35  ;;  %v1447_v34 = vpack.c.bf16 %v195_v29, %v194_v28  ;;  %v178_v35 = vld [vmem:[%s2480_s1 + $0x470] sm:$0xff]  ;;  %v232_v11 = vld [vmem:[%s2480_s1 + $0x620] sm:$0xff]  ;;  %v233_v12 = vld [vmem:[%s2480_s1 + $0x628] sm:$0xff] }
  0x4a   :  { %1428 = vmatprep.subr.bf16.mxu0 %v1427_v38  ;;  %v1479_v38 = vpack.c.bf16 %v227_v31, %v226_v30  ;;  %v1449_v44 = vpack.c.bf16 %v179_v36, %v178_v35  ;;  %v264_v13 = vld [vmem:[%s2480_s1 + $0x720] sm:$0xff]  ;;  %v265_v15 = vld [vmem:[%s2480_s1 + $0x728] sm:$0xff]  ;;  %v250_v16 = vld [vmem:[%s2480_s1 + $0x6b0] sm:$0xff] }
  0x4b   :  { %1458 = vmatpush3.bf16.msra.mxu1 %v1457_v37  ;;  %v210_v37 = vld [vmem:[%s2480_s1 + $0x570] sm:$0xff]  ;;  %v251_v17 = vld [vmem:[%s2480_s1 + $0x6b8] sm:$0xff]  ;;  %v252_v28 = vld [vmem:[%s2480_s1 + $0x6c0] sm:$0xff] }
  0x4c   :  { %1460 = vmatprep.subr.bf16.mxu1 %v1459_v42  ;;  %v276_v42 = vld [vmem:[%s2480_s1 + $0x780] sm:$0xff]  ;;  %v1481_v45 = vpack.c.bf16 %v211_v39, %v210_v37  ;;  %v282_v18 = vld [vmem:[%s2480_s1 + $0x7b0] sm:$0xff]  ;;  %v283_v19 = vld [vmem:[%s2480_s1 + $0x7b8] sm:$0xff] }
  0x4d   :  { %1430 = vmatpush3.bf16.msra.mxu0 %v1429_v48  ;;  %v229_v48 = vld [vmem:[%s2480_s1 + $0x608] sm:$0xff]  ;;  %v234_v23 = vld [vmem:[%s2480_s1 + $0x630] sm:$0xff]  ;;  %v235_v24 = vld [vmem:[%s2480_s1 + $0x638] sm:$0xff] }
  0x4e   :  { %1432 = vmatprep.subr.bf16.mxu0 %v1431_v50  ;;  %v1515_v50 = vpack.c.bf16 %v277_v43, %v276_v42  ;;  %v1485_v57 = vpack.c.bf16 %v229_v48, %v228_v47  ;;  %v266_v25 = vld [vmem:[%s2480_s1 + $0x730] sm:$0xff]  ;;  %v267_v27 = vld [vmem:[%s2480_s1 + $0x738] sm:$0xff]  ;;  %v253_v29 = vld [vmem:[%s2480_s1 + $0x6c8] sm:$0xff] }
  0x4f   :  { %1462 = vmatpush3.bf16.msra.mxu1 %v1461_v49  ;;  %v260_v49 = vld [vmem:[%s2480_s1 + $0x700] sm:$0xff]  ;;  %v285_v31 = vld [vmem:[%s2480_s1 + $0x7c8] sm:$0xff]  ;;  %v254_v40 = vld [vmem:[%s2480_s1 + $0x6d0] sm:$0xff] }
  0x50   :  { %1464 = vmatprep.subr.bf16.mxu1 %v1463_v54  ;;  %v278_v54 = vld [vmem:[%s2480_s1 + $0x790] sm:$0xff]  ;;  %v1517_v59 = vpack.c.bf16 %v261_v51, %v260_v49  ;;  %v284_v30 = vld [vmem:[%s2480_s1 + $0x7c0] sm:$0xff]  ;;  %v237_v36 = vld [vmem:[%s2480_s1 + $0x648] sm:$0xff] }
  0x51   :  { %1434 = vmatpush3.bf16.msra.mxu0 %v1433_v60  ;;  %v1487_v60 = vpack.c.bf16 %v247_v53, %v246_v52  ;;  %v1519_v0 = vpack.c.bf16 %v279_v55, %v278_v54  ;;  %v236_v35 = vld [vmem:[%s2480_s1 + $0x640] sm:$0xff]  ;;  %v269_v39 = vld [vmem:[%s2480_s1 + $0x748] sm:$0xff]  ;;  %v255_v41 = vld [vmem:[%s2480_s1 + $0x6d8] sm:$0xff] }
  0x52   :  { %1436 = vmatprep.subr.bf16.mxu0 %v1435_v62  ;;  %v231_v62 = vld [vmem:[%s2480_s1 + $0x618] sm:$0xff]  ;;  %v268_v37 = vld [vmem:[%s2480_s1 + $0x740] sm:$0xff]  ;;  %v286_v42 = vld [vmem:[%s2480_s1 + $0x7d0] sm:$0xff] }
  0x53   :  { %1466 = vmatpush3.bf16.msra.mxu1 %v1465_v61  ;;  %v230_v61 = vld [vmem:[%s2480_s1 + $0x610] sm:$0xff]  ;;  %v287_v43 = vld [vmem:[%s2480_s1 + $0x7d8] sm:$0xff]  ;;  %v256_v52 = vld [vmem:[%s2480_s1 + $0x6e0] sm:$0xff] }
  0x54   :  { %1468 = vmatprep.subr.bf16.mxu1 %v1467_v2  ;;  %v248_v2 = vld [vmem:[%s2480_s1 + $0x6a0] sm:$0xff]  ;;  %v1489_v7 = vpack.c.bf16 %v231_v62, %v230_v61  ;;  %v238_v47 = vld [vmem:[%s2480_s1 + $0x650] sm:$0xff]  ;;  %v239_v48 = vld [vmem:[%s2480_s1 + $0x658] sm:$0xff] }
  0x55   :  { %1438 = vmatpush3.bf16.msra.mxu0 %v1437_v8  ;;  %v35_v8 = vld [vmem:[%s2481_s0 + $0x78] sm:$0xff]  ;;  %v270_v49 = vld [vmem:[%s2480_s1 + $0x750] sm:$0xff]  ;;  %v257_v53 = vld [vmem:[%s2480_s1 + $0x6e8] sm:$0xff] }
  0x56   :  { %1440 = vmatprep.subr.bf16.mxu0 %v1439_v10  ;;  %v1491_v10 = vpack.c.bf16 %v249_v3, %v248_v2  ;;  %v271_v51 = vld [vmem:[%s2480_s1 + $0x758] sm:$0xff]  ;;  %v288_v54 = vld [vmem:[%s2480_s1 + $0x7e0] sm:$0xff]  ;;  %v289_v55 = vld [vmem:[%s2480_s1 + $0x7e8] sm:$0xff] }
  0x57   :  { %1470 = vmatpush3.bf16.msra.mxu1 %v1469_v9  ;;  %v1521_v9 = vpack.c.bf16 %v263_v1, %v262_v63  ;;  %v272_v61 = vld [vmem:[%s2480_s1 + $0x760] sm:$0xff]  ;;  %v1539_v62 = vpack.c.bf16 %v289_v55, %v288_v54  ;;  %v273_v63 = vld [vmem:[%s2480_s1 + $0x768] sm:$0xff]  ;;  %v259_v1 = vld [vmem:[%s2480_s1 + $0x6f8] sm:$0xff] }
  0x58   :  { %1472 = vmatprep.subr.bf16.mxu1 %v1471_v14  ;;  %v1523_v14 = vpack.c.bf16 %v281_v5, %v280_v4  ;;  %v290_v2 = vld [vmem:[%s2480_s1 + $0x7f0] sm:$0xff]  ;;  %v291_v3 = vld [vmem:[%s2480_s1 + $0x7f8] sm:$0xff]  ;;  %v1541_v5 = vpack.c.bf16 %v273_v63, %v272_v61 }
  0x59   :  { %1442 = vmatpush3.bf16.msra.mxu0 %v1441_v20  ;;  %v1493_v20 = vpack.c.bf16 %v233_v12, %v232_v11  ;;  %v275_v11 = vld [vmem:[%s2480_s1 + $0x778] sm:$0xff] }
  0x5a   :  { %1444 = vmatprep.subr.bf16.mxu0 %v1443_v22  ;;  %v1495_v22 = vpack.c.bf16 %v251_v17, %v250_v16  ;;  %v859_v16 = vld [vmem:[%s2482_s3] sm:$0xff]  ;;  %v860_v17 = vld [vmem:[%s2482_s3 + $0x8] sm:$0xff] }
  0x5b   :  { %1474 = vmatpush3.bf16.msra.mxu1 %v1473_v21  ;;  %v1525_v21 = vpack.c.bf16 %v265_v15, %v264_v13  ;;  %v34_v15 = vld [vmem:[%s2481_s0 + $0x70] sm:$0xff] }
  0x5c   :  { %1476 = vmatprep.subr.bf16.mxu1 %v1475_v26  ;;  %v1527_v26 = vpack.c.bf16 %v283_v19, %v282_v18  ;;  %v861_v18 = vld [vmem:[%s2482_s3 + $0x10] sm:$0xff]  ;;  %v1574_v19 = vmov 0.0|0.0  }
  0x5d   :  { %1446 = vmatpush3.bf16.msra.mxu0 %v1445_v32  ;;  %v1497_v32 = vpack.c.bf16 %v235_v24, %v234_v23  ;;  %v863_v23 = vld [vmem:[%s2482_s3 + $0x20] sm:$0xff]  ;;  %v864_v24 = vld [vmem:[%s2482_s3 + $0x28] sm:$0xff] }
  0x5e   :  { %1448 = vmatprep.subr.bf16.mxu0 %v1447_v34  ;;  %v1499_v34 = vpack.c.bf16 %v253_v29, %v252_v28  ;;  %v867_v29 = vld [vmem:[%s2482_s3 + $0x40] sm:$0xff] }
  0x5f   :  { %1478 = vmatpush3.bf16.msra.mxu1 %v1477_v33  ;;  %v1529_v33 = vpack.c.bf16 %v267_v27, %v266_v25  ;;  %v1554_v25 = vpack.c.bf16 %v864_v24, %v863_v23  ;;  %v866_v27 = vld [vmem:[%s2482_s3 + $0x38] sm:$0xff] }
  0x60   :  { %1480 = vmatprep.subr.bf16.mxu1 %v1479_v38  ;;  %v1531_v38 = vpack.c.bf16 %v285_v31, %v284_v30  ;;  %v868_v30 = vld [vmem:[%s2482_s3 + $0x48] sm:$0xff] }
  0x61   :  { %1450 = vmatpush3.bf16.msra.mxu0 %v1449_v44  ;;  %v1501_v44 = vpack.c.bf16 %v237_v36, %v236_v35  ;;  %v1560_v31 = vpack.c.bf16 %v868_v30, %v867_v29  ;;  %v871_v35 = vld [vmem:[%s2482_s3 + $0x60] sm:$0xff]  ;;  %v872_v36 = vld [vmem:[%s2482_s3 + $0x68] sm:$0xff] }
  0x62   :  { %1484 = vmatprep.subr.bf16.mxu0 %v1483_v46  ;;  %v1503_v46 = vpack.c.bf16 %v255_v41, %v254_v40  ;;  %v1576_v41 = vmov 0.0  }
  0x63   :  { %1482 = vmatpush3.bf16.msra.mxu1 %v1481_v45  ;;  %v1533_v45 = vpack.c.bf16 %v269_v39, %v268_v37  ;;  %v1566_v37 = vpack.c.bf16 %v872_v36, %v871_v35  ;;  %v874_v39 = vld [vmem:[%s2482_s3 + $0x78] sm:$0xff] }
  0x64   :  { %1516 = vmatprep.subr.bf16.mxu1 %v1515_v50  ;;  %644 = vmatmul.mubr.f32.vlgmr.msra.gmra.mrb[4].mxu0 %v28_v56  ;;  %v1535_v50 = vpack.c.bf16 %v287_v43, %v286_v42  ;;  %v1505_v56 = vpack.c.bf16 %v239_v48, %v238_v47  ;;  %v957_v43 = vld [vmem:[%s2483_s2] ss:$0 sm:$0xff] }
  0x65   :  { %1486 = vmatpush3.bf16.msra.mxu0 %v1485_v57  ;;  %783 = vmatprep.mubr.f32.mxu0 %v33_v6  ;;  %v1537_v57 = vpack.c.bf16 %v271_v51, %v270_v49 }
  0x66   :  { %714 = vmatmul.mubr.f32.vlgmr.msra.gmra.mrb[4].mxu1 %v30_v58  ;;  %1488 = vmatprep.subr.bf16.mxu0 %v1487_v60  ;;  %v1507_v58 = vpack.c.bf16 %v257_v53, %v256_v52  ;;  %v241_v60 = vld [vmem:[%s2480_s1 + $0x668] sm:$0xff] }
  0x67   :  { %1518 = vmatpush3.bf16.msra.mxu1 %v1517_v59  ;;  %853 = vmatprep.mubr.f32.mxu1 %v35_v8  ;;  %v240_v59 = vld [vmem:[%s2480_s1 + $0x660] sm:$0xff]  ;;  %v243_v8 = vld [vmem:[%s2480_s1 + $0x678] sm:$0xff] }
  0x68   :  { %1520 = vmatprep.subr.bf16.mxu1 %v1519_v0  ;;  %v258_v0 = vld [vmem:[%s2480_s1 + $0x6f0] sm:$0xff]  ;;  %v1509_v4 = vpack.c.bf16 %v241_v60, %v240_v59 }
  0x69   :  { %1490 = vmatpush3.bf16.msra.mxu0 %v1489_v7  ;;  %v1511_v6 = vpack.c.bf16 %v259_v1, %v258_v0  ;;  %v242_v7 = vld [vmem:[%s2480_s1 + $0x670] sm:$0xff] }
  0x6a   :  { %1492 = vmatprep.subr.bf16.mxu0 %v1491_v10  ;;  %v274_v10 = vld [vmem:[%s2480_s1 + $0x770] sm:$0xff]  ;;  %v1513_v12 = vpack.c.bf16 %v243_v8, %v242_v7 }
  0x6b   :  { %1522 = vmatpush3.bf16.msra.mxu1 %v1521_v9  ;;  %v1543_v9 = vpack.c.bf16 %v291_v3, %v290_v2  ;;  %v1545_v13 = vpack.c.bf16 %v275_v11, %v274_v10  ;;  %v958_v11 = vld [vmem:[%s2484_s4] ss:$0 sm:$0xff] }
  0x6c   :  { %1524 = vmatprep.subr.bf16.mxu1 %v1523_v14  ;;  %v32_v14 = vld [vmem:[%s2481_s0 + $0x60] sm:$0xff] }
  0x6d   :  { %1494 = vmatpush3.bf16.msra.mxu0 %v1493_v20  ;;  %v1548_v20 = vpack.c.bf16 %v860_v17, %v859_v16 }
  0x6e   :  { %1496 = vmatprep.subr.bf16.mxu0 %v1495_v22 }
  0x6f   :  { %1526 = vmatpush3.bf16.msra.mxu1 %v1525_v21  ;;  %v862_v21 = vld [vmem:[%s2482_s3 + $0x18] sm:$0xff] }
  0x70   :  { %1528 = vmatprep.subr.bf16.mxu1 %v1527_v26  ;;  %v1551_v22 = vpack.c.bf16 %v862_v21, %v861_v18  ;;  %v865_v26 = vld [vmem:[%s2482_s3 + $0x30] sm:$0xff] }
  0x71   :  { %1498 = vmatpush3.bf16.msra.mxu0 %v1497_v32  ;;  %v1557_v28 = vpack.c.bf16 %v866_v27, %v865_v26  ;;  %v869_v32 = vld [vmem:[%s2482_s3 + $0x50] sm:$0xff] }
  0x72   :  { %1500 = vmatprep.subr.bf16.mxu0 %v1499_v34 }
  0x73   :  { %1530 = vmatpush3.bf16.msra.mxu1 %v1529_v33  ;;  %v870_v33 = vld [vmem:[%s2482_s3 + $0x58] sm:$0xff] }
  0x74   :  { %1532 = vmatprep.subr.bf16.mxu1 %v1531_v38  ;;  %v1563_v34 = vpack.c.bf16 %v870_v33, %v869_v32  ;;  %v873_v38 = vld [vmem:[%s2482_s3 + $0x70] sm:$0xff] }
  0x75   :  { %1502 = vmatpush3.bf16.msra.mxu0 %v1501_v44  ;;  %v1569_v40 = vpack.c.bf16 %v874_v39, %v873_v38 }
  0x76   :  { %1504 = vmatprep.subr.bf16.mxu0 %v1503_v46 }
  0x77   :  { %1534 = vmatpush3.bf16.msra.mxu1 %v1533_v45 }
  0x78   :  { %1536 = vmatprep.subr.bf16.mxu1 %v1535_v50 }
  0x79   :  { %1506 = vmatpush3.bf16.msra.mxu0 %v1505_v56 }
  0x7a   :  { %1508 = vmatprep.subr.bf16.mxu0 %v1507_v58 }
  0x7b   :  { %1538 = vmatpush3.bf16.msra.mxu1 %v1537_v57 }
  0x7c   :  { %1540 = vmatprep.subr.bf16.mxu1 %v1539_v62 }
  0x7d   :  { %1510 = vmatpush3.bf16.msra.mxu0 %v1509_v4 }
  0x7e   :  { %1512 = vmatprep.subr.bf16.mxu0 %v1511_v6 }
  0x7f   :  { %1542 = vmatpush3.bf16.msra.mxu1 %v1541_v5 }
  0x80   :  { %1544 = vmatprep.subr.bf16.mxu1 %v1543_v9 }
  0x81   :  { %1514 = vmatpush3.bf16.msra.mxu0 %v1513_v12 }
  0x82   :  { %1547 = vmatprep.subr.bf16.mxu0 %v1574_v19 }
  0x83   :  { %1546 = vmatpush3.bf16.msra.mxu1 %v1545_v13 }
  0x84   :  { %784 = vmatmul.mubr.f32.vlgmr.msra.gmra.mrb[6].mxu0 %v32_v14 }
  0x85   :  { %1549 = vmatpush3.bf16.msra.mxu0 %v1548_v20  ;;  %1288 = vmatprep.mubr.msk.f32.mxu0 %vm1575_vm0, %v1576_v41 }
  0x86   :  { %854 = vmatmul.mubr.f32.vlgmr.msra.gmra.mrb[6].mxu1 %v34_v15  ;;  %1550 = vmatprep.subr.bf16.mxu0 %v1574_v19 }
  0x89   :  { %1552 = vmatpush3.bf16.msra.mxu0 %v1551_v22 }
  0x8a   :  { %1553 = vmatprep.subr.bf16.mxu0 %v1574_v19 }
  0x8d   :  { %1555 = vmatpush3.bf16.msra.mxu0 %v1554_v25 }
  0x8e   :  { %1556 = vmatprep.subr.bf16.mxu0 %v1574_v19 }
  0x91   :  { %1558 = vmatpush3.bf16.msra.mxu0 %v1557_v28 }
  0x92   :  { %1559 = vmatprep.subr.bf16.mxu0 %v1574_v19 }
  0x95   :  { %1561 = vmatpush3.bf16.msra.mxu0 %v1560_v31 }
  0x96   :  { %1562 = vmatprep.subr.bf16.mxu0 %v1574_v19 }
  0x99   :  { %1564 = vmatpush3.bf16.msra.mxu0 %v1563_v34 }
  0x9a   :  { %1565 = vmatprep.subr.bf16.mxu0 %v1574_v19 }
  0x9d   :  { %1567 = vmatpush3.bf16.msra.mxu0 %v1566_v37 }
  0x9e   :  { %1568 = vmatprep.subr.bf16.mxu0 %v1574_v19 }
  0xa1   :  { %1570 = vmatpush3.bf16.msra.mxu0 %v1569_v40 }
  0xf7   :  { %v991_v42 = vpop.f32.mrb[0].mxu0 }
  0xf8   :  { %v992_v44 = vpop.f32.mrb[1].mxu0 }
  0xf9   :  { %v1026_v45 = vpop.f32.mrb[0].mxu1  ;;  %v993_v46 = vadd.f32 %v992_v44, %v991_v42 }
  0xfa   :  { %v1027_v47 = vpop.f32.mrb[1].mxu1 }
  0xfb   :  { %v1028_v48 = vadd.f32 %v1027_v47, %v1026_v45  ;;  %v366_v49 = vadd.f32 %v993_v46, %v957_v43 }
  0xfd   :  { %v436_v50 = vadd.f32 %v1028_v48, %v366_v49 }
 0x117   :  { %v1061_v51 = vpop.f32.mrb[2].mxu0 }
 0x118   :  { %v1062_v52 = vpop.f32.mrb[3].mxu0 }
 0x119   :  { %v1096_v53 = vpop.f32.mrb[2].mxu1  ;;  %v1063_v54 = vadd.f32 %v1062_v52, %v1061_v51 }
 0x11a   :  { %v1097_v55 = vpop.f32.mrb[3].mxu1 }
 0x11b   :  { %v1098_v56 = vadd.f32 %v1097_v55, %v1096_v53  ;;  %v506_v57 = vadd.f32 %v1063_v54, %v436_v50 }
 0x11d   :  { %v576_v58 = vadd.f32 %v1098_v56, %v506_v57 }
 0x137   :  { %v1131_v59 = vpop.f32.mrb[4].mxu0 }
 0x138   :  { %v1132_v60 = vpop.f32.mrb[5].mxu0 }
 0x139   :  { %v1166_v61 = vpop.f32.mrb[4].mxu1  ;;  %v1133_v62 = vadd.f32 %v1132_v60, %v1131_v59 }
 0x13a   :  { %v1167_v63 = vpop.f32.mrb[5].mxu1 }
 0x13b   :  { %v1168_v0 = vadd.f32 %v1167_v63, %v1166_v61  ;;  %v646_v1 = vadd.f32 %v1133_v62, %v576_v58 }
 0x13d   :  { %v716_v2 = vadd.f32 %v1168_v0, %v646_v1 }
 0x157   :  { %v1201_v3 = vpop.f32.mrb[6].mxu0 }
 0x158   :  { %v1202_v4 = vpop.f32.mrb[7].mxu0 }
 0x159   :  { %v1236_v5 = vpop.f32.mrb[6].mxu1  ;;  %v1203_v6 = vadd.f32 %v1202_v4, %v1201_v3 }
 0x15a   :  { %v1237_v7 = vpop.f32.mrb[7].mxu1 }
 0x15b   :  { %v1238_v8 = vadd.f32 %v1237_v7, %v1236_v5  ;;  %v786_v9 = vadd.f32 %v1203_v6, %v716_v2 }
 0x15d   :  { %v856_v10 = vadd.f32 %v1238_v8, %v786_v9 }
 0x15f   :  { %1289 = vmatmul.mubr.f32.vlgmr.msra.gmra.mrb[8].mxu0 %v856_v10 }
 0x232   :  { %v948_v12 = vpop.f32.mrb[8].mxu0 }
 0x233   :  { %v949_v13 = vadd.f32 %v958_v11, %v948_v12  ;;  %v1290_v14 = vpop.f32.mrb[9].mxu0 }
 0x235   :  { %952 = vst [vmem:[%s2485_s5] sm:$0xff] %v949_v13 }

</bundles_post_ra>
